<compile_context>
chip_gen: v6e
topology: v6e:2x2x1
jax: 0.10.0
libtpu: 0.0.40
codegen_flags: <defaults>
</compile_context>

<pallas_src>
import functools

import jax
import jax.numpy as jnp
import numpy as np
from jax.experimental import pallas as pl
from jax.experimental.pallas import tpu as pltpu

IMAGE_SIZE = 16                                   # config.image_size
C = 3                                             # conv in/out channels (width)
KSIZE = 5
PAD = 1
HIDDEN = C * IMAGE_SIZE * IMAGE_SIZE              # 768
IN_SPATIAL = IMAGE_SIZE + KSIZE - 1 - 2 * PAD     # 18
IN_FEATURES = C * IN_SPATIAL * IN_SPATIAL         # 972
K_PADDED = 1024                                   # contraction dim padded to lane multiple
NUM_LAYERS = 3


def _round_up(x, m):
    return (x + m - 1) // m * m


# --------------------------------------------------------------------------------------
# Kernel: one batch tile of the whole forward pass.
# --------------------------------------------------------------------------------------
def fused_forward_kernel(x_ref, wc_ref, bc_ref, w1_ref, b1_ref, w2_ref, b2_ref,
                         w3_ref, b3_ref, w4_ref, b4_ref, o_ref):
    """x_ref : (bm, 1024)  f32/bf16  flattened (3,18,18) input rows, zero-padded to K=1024
       wc_ref: (1024, 768) bf16      conv folded into a dense matmul (pad=1 + K-pad rows = 0)
       bc_ref: (1, 768)    f32       conv bias broadcast over the 16x16 spatial positions
       wK_ref: (768, 768)  bf16      hidden Linear weights, pre-transposed to (in, out)
       bK_ref: (1, 768)    f32
       w4_ref: (1, 768)    f32       final Linear weight row
       b4_ref: (1, 1)      f32
       o_ref : (bm, 1)     f32
    """
    wdt = wc_ref.dtype
    # Conv (as matmul) + bias + ReLU.  Low-precision inputs to the MXU, f32 accumulation.
    h = jnp.dot(x_ref[...].astype(wdt), wc_ref[...],
                preferred_element_type=jnp.float32)
    h = jnp.maximum(h + bc_ref[...], 0.0)

    # 3x (Linear + ReLU), statically unrolled.
    for w_ref, b_ref in ((w1_ref, b1_ref), (w2_ref, b2_ref), (w3_ref, b3_ref)):
        h = jnp.dot(h.astype(w_ref.dtype), w_ref[...],
                    preferred_element_type=jnp.float32)
        h = jnp.maximum(h + b_ref[...], 0.0)

    # Final Linear(768 -> 1): elementwise multiply + lane reduction (VPU + XLU)
    # instead of a 1-wide, heavily-masked MXU matmul.
    o_ref[...] = jnp.sum(h * w4_ref[...], axis=-1, keepdims=True) + b4_ref[...]


# --------------------------------------------------------------------------------------
# One-time host-side weight preparation.
# --------------------------------------------------------------------------------------
def _conv_as_matrix(conv_w):
    """Dense (972, 768) matrix M with flatten(conv(x)) == flatten(x) @ M for the
    5x5, stride-1, pad-1 conv on a (3,18,18) NCHW input (NCHW flatten order)."""
    w = np.asarray(conv_w, np.float32)        # (OC, IC, KH, KW)
    oc, ic, kh, kw, oh, ow = np.meshgrid(
        np.arange(C), np.arange(C), np.arange(KSIZE), np.arange(KSIZE),
        np.arange(IMAGE_SIZE), np.arange(IMAGE_SIZE), indexing="ij")
    ih = oh + kh - PAD
    iw = ow + kw - PAD
    valid = (ih >= 0) & (ih < IN_SPATIAL) & (iw >= 0) & (iw < IN_SPATIAL)
    rows = ((ic * IN_SPATIAL + ih) * IN_SPATIAL + iw)[valid]
    cols = ((oc * IMAGE_SIZE + oh) * IMAGE_SIZE + ow)[valid]
    mat = np.zeros((IN_FEATURES, HIDDEN), np.float32)
    mat[rows, cols] = w[oc, ic, kh, kw][valid]    # each (row, col) pair is unique
    return mat


def pack_params(params, weight_dtype=jnp.bfloat16):
    """Fold conv into a matmul (K padded 972->1024 with zero rows), transpose Linears to
    (in, out), cast big weights to `weight_dtype` (bf16 default; f32 for bit-faithful)."""
    wc = np.zeros((K_PADDED, HIDDEN), np.float32)
    wc[:IN_FEATURES, :] = _conv_as_matrix(params["conv_w"])
    return dict(
        wc=jnp.asarray(wc).astype(weight_dtype),
        bc=jnp.asarray(np.repeat(np.asarray(params["conv_b"], np.float32),
                                 IMAGE_SIZE * IMAGE_SIZE))[None, :],
        w1=jnp.asarray(params["ws"][0]).T.astype(weight_dtype),
        b1=jnp.asarray(params["bs"][0], jnp.float32)[None, :],
        w2=jnp.asarray(params["ws"][1]).T.astype(weight_dtype),
        b2=jnp.asarray(params["bs"][1], jnp.float32)[None, :],
        w3=jnp.asarray(params["ws"][2]).T.astype(weight_dtype),
        b3=jnp.asarray(params["bs"][2], jnp.float32)[None, :],
        w4=jnp.asarray(params["w4"], jnp.float32),             # (1, 768) row
        b4=jnp.asarray(params["b4"], jnp.float32).reshape(1, 1),
    )


# --------------------------------------------------------------------------------------
# Wrapper.
# --------------------------------------------------------------------------------------
@functools.partial(jax.jit, static_argnames=("block_m",))
def simple_model_forward(x, packed, block_m=512):
    """x: (N, 3, 18, 18) f32 or bf16 -> (N, 1, 1) f32.

    block_m: batch-tile rows. 512 amortizes the ~0.35 us/step grid overhead on v5e/v6e;
    on batches >= 512 the tile is auto-capped so the grid has >= 2 steps (v7x megacore).
    If x is already bf16 upstream, it is streamed as bf16 (half the activation DMA)."""
    n = x.shape[0]
    assert x.shape[1:] == (C, IN_SPATIAL, IN_SPATIAL), x.shape

    act_dtype = jnp.bfloat16 if x.dtype == jnp.bfloat16 else jnp.float32
    row_mult = 16 if act_dtype == jnp.bfloat16 else 8     # sublane packing multiple

    n_pad0 = _round_up(n, row_mult)
    bm = min(block_m, n_pad0)                             # tiny batches -> one small tile
    if n_pad0 >= 512:                                     # keep >=2 grid steps (v7x 2 TCs)
        bm = min(bm, max(256, _round_up(n_pad0 // 2, 256)))
    bm = _round_up(bm, row_mult)
    n_pad = _round_up(n, bm)

    # Single pad pass: batch rows to a tile multiple AND K from 972 -> 1024 (zero cols
    # match the zero rows appended to wc, so the matmul result is unchanged).
    x_flat = jnp.pad(x.reshape(n, IN_FEATURES).astype(act_dtype),
                     ((0, n_pad - n), (0, K_PADDED - IN_FEATURES)))

    def resident(shape):
        # Constant index_map -> DMA'd once, stays in VMEM across batch tiles.
        # Buffered(1): no pointless second buffer for blocks that never change.
        return pl.BlockSpec(shape, lambda i: (0, 0), pipeline_mode=pl.Buffered(1))

    out = pl.pallas_call(
        fused_forward_kernel,
        out_shape=jax.ShapeDtypeStruct((n_pad, 1), jnp.float32),
        grid=(n_pad // bm,),
        in_specs=[
            pl.BlockSpec((bm, K_PADDED), lambda i: (i, 0)),      # activations: pipelined
            resident((K_PADDED, HIDDEN)),                        # conv-as-matmul weight
            resident((1, HIDDEN)),
            resident((HIDDEN, HIDDEN)), resident((1, HIDDEN)),
            resident((HIDDEN, HIDDEN)), resident((1, HIDDEN)),
            resident((HIDDEN, HIDDEN)), resident((1, HIDDEN)),
            resident((1, HIDDEN)),
            resident((1, 1)),
        ],
        out_specs=pl.BlockSpec((bm, 1), lambda i: (i, 0)),
        compiler_params=pltpu.CompilerParams(
            dimension_semantics=("parallel",),   # shard batch tiles across TCs on v7x
            vmem_limit_bytes=32 << 20,           # ~12-14 MiB scoped at bm=512; 64 MiB = all of v7x
        ),
    )(x_flat, packed["wc"], packed["bc"], packed["w1"], packed["b1"],
      packed["w2"], packed["b2"], packed["w3"], packed["b3"],
      packed["w4"], packed["b4"])

    return out[:n, :, None]                       # r.unsqueeze(-1) -> (N, 1, 1)


# --------------------------------------------------------------------------------------
# Parameters (PyTorch shapes, kaiming-normal weights) and pure-JAX reference.
# --------------------------------------------------------------------------------------
def init_params(key):
    keys = jax.random.split(key, 2 + 2 * NUM_LAYERS + 2)
    fan_conv = C * KSIZE * KSIZE
    conv_w = jax.random.normal(keys[0], (C, C, KSIZE, KSIZE), jnp.float32) * np.sqrt(2.0 / fan_conv)
    conv_b = jax.random.uniform(keys[1], (C,), jnp.float32,
                                -1.0 / np.sqrt(fan_conv), 1.0 / np.sqrt(fan_conv))
    ws, bs = [], []
    for i in range(NUM_LAYERS):
        ws.append(jax.random.normal(keys[2 + 2 * i], (HIDDEN, HIDDEN), jnp.float32)
                  * np.sqrt(2.0 / HIDDEN))
        bs.append(jax.random.uniform(keys[3 + 2 * i], (HIDDEN,), jnp.float32,
                                     -1.0 / np.sqrt(HIDDEN), 1.0 / np.sqrt(HIDDEN)))
    w4 = jax.random.normal(keys[-2], (1, HIDDEN), jnp.float32) * np.sqrt(2.0 / HIDDEN)
    b4 = jax.random.uniform(keys[-1], (1,), jnp.float32,
                            -1.0 / np.sqrt(HIDDEN), 1.0 / np.sqrt(HIDDEN))
    return dict(conv_w=conv_w, conv_b=conv_b, ws=ws, bs=bs, w4=w4, b4=b4)


def reference_forward(x, params, bf16_weights=True):
    """Pure-JAX f32 reference of the PyTorch forward. With bf16_weights=True the large
    weight matrices are rounded to bf16 (exactly the values the kernel stores) so the
    check isolates kernel numerics from the deliberate bf16 weight quantization."""
    def q(w):
        return w.astype(jnp.bfloat16).astype(jnp.float32) if bf16_weights else w
    conv = jax.lax.conv_general_dilated(
        x, q(params["conv_w"]), window_strides=(1, 1),
        padding=((PAD, PAD), (PAD, PAD)),
        dimension_numbers=("NCHW", "OIHW", "NCHW"))
    conv = jnp.maximum(conv + params["conv_b"][None, :, None, None], 0.0)
    h = conv.reshape(x.shape[0], -1)              # nn.Flatten (NCHW order)
    for w, b in zip(params["ws"], params["bs"]):
        h = jnp.maximum(h @ q(w).T + b, 0.0)
    out = h @ params["w4"].T + params["b4"]
    return out[:, :, None]


if __name__ == "__main__":
    key = jax.random.PRNGKey(0)
    pkey, xkey, xkey2, xkey3 = jax.random.split(key, 4)
    params = init_params(pkey)
    packed = pack_params(params)

    # 1) Primary small test (single batch tile, f32 activations).
    N = 2
    x = jax.random.normal(xkey, (N, C, IN_SPATIAL, IN_SPATIAL), jnp.float32)
    out = jax.block_until_ready(simple_model_forward(x, packed))
    assert out.shape == (N, 1, 1), out.shape
    ref = reference_forward(x, params)
    np.testing.assert_allclose(np.asarray(out), np.asarray(ref), rtol=2e-2, atol=2e-2)

    # 2) Multi-tile test: exercises the batch grid (grid=(3,)) and row padding.
    N2 = 20
    x2 = jax.random.normal(xkey2, (N2, C, IN_SPATIAL, IN_SPATIAL), jnp.float32)
    out2 = jax.block_until_ready(simple_model_forward(x2, packed, block_m=8))
    ref2 = reference_forward(x2, params)
    np.testing.assert_allclose(np.asarray(out2), np.asarray(ref2), rtol=2e-2, atol=2e-2)

    # 3) bf16 activation path (producer-supplied bf16 input; halves activation DMA).
    N3 = 10
    x3 = jax.random.normal(xkey3, (N3, C, IN_SPATIAL, IN_SPATIAL),
                           jnp.float32).astype(jnp.bfloat16)
    out3 = jax.block_until_ready(simple_model_forward(x3, packed))
    ref3 = reference_forward(x3.astype(jnp.float32), params)   # same (rounded) input values
    np.testing.assert_allclose(np.asarray(out3), np.asarray(ref3), rtol=3e-2, atol=3e-2)

    print("KERNEL_OK")
</pallas_src>

<mosaic_0001>
module attributes {stable_mosaic.version = 11 : i64} {
  func.func @fused_forward_kernel(%arg0: i32, %arg1: memref<8x1024xf32, #tpu.memory_space<vmem>>, %arg2: memref<1024x768xbf16, #tpu.memory_space<vmem>>, %arg3: memref<1x768xf32, #tpu.memory_space<vmem>>, %arg4: memref<768x768xbf16, #tpu.memory_space<vmem>>, %arg5: memref<1x768xf32, #tpu.memory_space<vmem>>, %arg6: memref<768x768xbf16, #tpu.memory_space<vmem>>, %arg7: memref<1x768xf32, #tpu.memory_space<vmem>>, %arg8: memref<768x768xbf16, #tpu.memory_space<vmem>>, %arg9: memref<1x768xf32, #tpu.memory_space<vmem>>, %arg10: memref<1x768xf32, #tpu.memory_space<vmem>>, %arg11: memref<1x1xf32, #tpu.memory_space<vmem>>, %arg12: memref<8x1xf32, #tpu.memory_space<vmem>>) attributes {dimension_semantics = [#tpu.dimension_semantics<parallel>], iteration_bounds = array<i64: 1>, scalar_prefetch = 0 : i64, scratch_operands = 0 : i64, tpu.core_type = #tpu.core_type<tc>, window_params = [{transform_indices = @transform_0, window_bounds = array<i64: 8, 1024>}, {pipeline_mode = #tpu.pipeline_mode<synchronous>, transform_indices = @transform_1, window_bounds = array<i64: 1024, 768>}, {pipeline_mode = #tpu.pipeline_mode<synchronous>, transform_indices = @transform_2, window_bounds = array<i64: 1, 768>}, {pipeline_mode = #tpu.pipeline_mode<synchronous>, transform_indices = @transform_3, window_bounds = array<i64: 768, 768>}, {pipeline_mode = #tpu.pipeline_mode<synchronous>, transform_indices = @transform_4, window_bounds = array<i64: 1, 768>}, {pipeline_mode = #tpu.pipeline_mode<synchronous>, transform_indices = @transform_5, window_bounds = array<i64: 768, 768>}, {pipeline_mode = #tpu.pipeline_mode<synchronous>, transform_indices = @transform_6, window_bounds = array<i64: 1, 768>}, {pipeline_mode = #tpu.pipeline_mode<synchronous>, transform_indices = @transform_7, window_bounds = array<i64: 768, 768>}, {pipeline_mode = #tpu.pipeline_mode<synchronous>, transform_indices = @transform_8, window_bounds = array<i64: 1, 768>}, {pipeline_mode = #tpu.pipeline_mode<synchronous>, transform_indices = @transform_9, window_bounds = array<i64: 1, 768>}, {pipeline_mode = #tpu.pipeline_mode<synchronous>, transform_indices = @transform_10, window_bounds = array<i64: 1, 1>}, {transform_indices = @transform_11, window_bounds = array<i64: 8, 1>}]} {
    %c0 = arith.constant 0 : index
    %c0_0 = arith.constant 0 : index
    %0 = vector.load %arg1[%c0, %c0_0] : memref<8x1024xf32, #tpu.memory_space<vmem>>, vector<8x1024xf32>
    %1 = arith.truncf %0 : vector<8x1024xf32> to vector<8x1024xbf16>
    %c0_1 = arith.constant 0 : index
    %c0_2 = arith.constant 0 : index
    %2 = vector.load %arg2[%c0_1, %c0_2] : memref<1024x768xbf16, #tpu.memory_space<vmem>>, vector<1024x768xbf16>
    %cst = arith.constant dense<0.000000e+00> : vector<8x768xf32>
    %3 = tpu.matmul %1, %2, %cst {dimension_numbers = #tpu.dot_dimension_numbers<[1], [0], [0], [1], [0, 0, 1, 1], [], []>} : vector<8x1024xbf16>, vector<1024x768xbf16>, vector<8x768xf32> -> vector<8x768xf32>
    %c0_3 = arith.constant 0 : index
    %c0_4 = arith.constant 0 : index
    %4 = vector.load %arg3[%c0_3, %c0_4] : memref<1x768xf32, #tpu.memory_space<vmem>>, vector<1x768xf32>
    %5 = vector.broadcast %4 : vector<1x768xf32> to vector<8x768xf32>
    %6 = arith.addf %3, %5 : vector<8x768xf32>
    %cst_5 = arith.constant 0.000000e+00 : f32
    %7 = vector.broadcast %cst_5 : f32 to vector<8x768xf32>
    %8 = arith.maximumf %6, %7 : vector<8x768xf32>
    %9 = arith.truncf %8 : vector<8x768xf32> to vector<8x768xbf16>
    %c0_6 = arith.constant 0 : index
    %c0_7 = arith.constant 0 : index
    %10 = vector.load %arg4[%c0_6, %c0_7] : memref<768x768xbf16, #tpu.memory_space<vmem>>, vector<768x768xbf16>
    %cst_8 = arith.constant dense<0.000000e+00> : vector<8x768xf32>
    %11 = tpu.matmul %9, %10, %cst_8 {dimension_numbers = #tpu.dot_dimension_numbers<[1], [0], [0], [1], [0, 0, 1, 1], [], []>} : vector<8x768xbf16>, vector<768x768xbf16>, vector<8x768xf32> -> vector<8x768xf32>
    %c0_9 = arith.constant 0 : index
    %c0_10 = arith.constant 0 : index
    %12 = vector.load %arg5[%c0_9, %c0_10] : memref<1x768xf32, #tpu.memory_space<vmem>>, vector<1x768xf32>
    %13 = vector.broadcast %12 : vector<1x768xf32> to vector<8x768xf32>
    %14 = arith.addf %11, %13 : vector<8x768xf32>
    %cst_11 = arith.constant 0.000000e+00 : f32
    %15 = vector.broadcast %cst_11 : f32 to vector<8x768xf32>
    %16 = arith.maximumf %14, %15 : vector<8x768xf32>
    %17 = arith.truncf %16 : vector<8x768xf32> to vector<8x768xbf16>
    %c0_12 = arith.constant 0 : index
    %c0_13 = arith.constant 0 : index
    %18 = vector.load %arg6[%c0_12, %c0_13] : memref<768x768xbf16, #tpu.memory_space<vmem>>, vector<768x768xbf16>
    %cst_14 = arith.constant dense<0.000000e+00> : vector<8x768xf32>
    %19 = tpu.matmul %17, %18, %cst_14 {dimension_numbers = #tpu.dot_dimension_numbers<[1], [0], [0], [1], [0, 0, 1, 1], [], []>} : vector<8x768xbf16>, vector<768x768xbf16>, vector<8x768xf32> -> vector<8x768xf32>
    %c0_15 = arith.constant 0 : index
    %c0_16 = arith.constant 0 : index
    %20 = vector.load %arg7[%c0_15, %c0_16] : memref<1x768xf32, #tpu.memory_space<vmem>>, vector<1x768xf32>
    %21 = vector.broadcast %20 : vector<1x768xf32> to vector<8x768xf32>
    %22 = arith.addf %19, %21 : vector<8x768xf32>
    %cst_17 = arith.constant 0.000000e+00 : f32
    %23 = vector.broadcast %cst_17 : f32 to vector<8x768xf32>
    %24 = arith.maximumf %22, %23 : vector<8x768xf32>
    %25 = arith.truncf %24 : vector<8x768xf32> to vector<8x768xbf16>
    %c0_18 = arith.constant 0 : index
    %c0_19 = arith.constant 0 : index
    %26 = vector.load %arg8[%c0_18, %c0_19] : memref<768x768xbf16, #tpu.memory_space<vmem>>, vector<768x768xbf16>
    %cst_20 = arith.constant dense<0.000000e+00> : vector<8x768xf32>
    %27 = tpu.matmul %25, %26, %cst_20 {dimension_numbers = #tpu.dot_dimension_numbers<[1], [0], [0], [1], [0, 0, 1, 1], [], []>} : vector<8x768xbf16>, vector<768x768xbf16>, vector<8x768xf32> -> vector<8x768xf32>
    %c0_21 = arith.constant 0 : index
    %c0_22 = arith.constant 0 : index
    %28 = vector.load %arg9[%c0_21, %c0_22] : memref<1x768xf32, #tpu.memory_space<vmem>>, vector<1x768xf32>
    %29 = vector.broadcast %28 : vector<1x768xf32> to vector<8x768xf32>
    %30 = arith.addf %27, %29 : vector<8x768xf32>
    %cst_23 = arith.constant 0.000000e+00 : f32
    %31 = vector.broadcast %cst_23 : f32 to vector<8x768xf32>
    %32 = arith.maximumf %30, %31 : vector<8x768xf32>
    %c0_24 = arith.constant 0 : index
    %c0_25 = arith.constant 0 : index
    %33 = vector.load %arg10[%c0_24, %c0_25] : memref<1x768xf32, #tpu.memory_space<vmem>>, vector<1x768xf32>
    %34 = vector.broadcast %33 : vector<1x768xf32> to vector<8x768xf32>
    %35 = arith.mulf %32, %34 : vector<8x768xf32>
    %cst_26 = arith.constant dense<0.000000e+00> : vector<8xf32>
    %36 = vector.multi_reduction <add>, %35, %cst_26 [1] : vector<8x768xf32> to vector<8xf32>
    %37 = vector.shape_cast %36 : vector<8xf32> to vector<8x1xf32>
    %c0_27 = arith.constant 0 : index
    %c0_28 = arith.constant 0 : index
    %38 = vector.load %arg11[%c0_27, %c0_28] : memref<1x1xf32, #tpu.memory_space<vmem>>, vector<1x1xf32>
    %39 = vector.broadcast %38 : vector<1x1xf32> to vector<8x1xf32>
    %40 = arith.addf %37, %39 : vector<8x1xf32>
    %c0_29 = arith.constant 0 : index
    %c0_30 = arith.constant 0 : index
    %41 = vector.load %arg12[%c0_29, %c0_30] : memref<8x1xf32, #tpu.memory_space<vmem>>, vector<8x1xf32>
    tpu.vector_store %arg12[%c0_29, %c0_30], %40 {strides = array<i32>} : memref<8x1xf32, #tpu.memory_space<vmem>>, vector<8x1xf32>,
    return
  }
  func.func @transform_0(%arg0: i32) -> (i32, i32) {
    %c0_i32 = arith.constant 0 : i32
    %c0_i32_0 = arith.constant 0 : i32
    return %arg0, %c0_i32 : i32, i32
  }
  func.func @transform_1(%arg0: i32) -> (i32, i32) {
    %c0_i32 = arith.constant 0 : i32
    %c0_i32_0 = arith.constant 0 : i32
    %c0_i32_1 = arith.constant 0 : i32
    return %c0_i32, %c0_i32_0 : i32, i32
  }
  func.func @transform_2(%arg0: i32) -> (i32, i32) {
    %c0_i32 = arith.constant 0 : i32
    %c0_i32_0 = arith.constant 0 : i32
    %c0_i32_1 = arith.constant 0 : i32
    return %c0_i32, %c0_i32_0 : i32, i32
  }
  func.func @transform_3(%arg0: i32) -> (i32, i32) {
    %c0_i32 = arith.constant 0 : i32
    %c0_i32_0 = arith.constant 0 : i32
    %c0_i32_1 = arith.constant 0 : i32
    return %c0_i32, %c0_i32_0 : i32, i32
  }
  func.func @transform_4(%arg0: i32) -> (i32, i32) {
    %c0_i32 = arith.constant 0 : i32
    %c0_i32_0 = arith.constant 0 : i32
    %c0_i32_1 = arith.constant 0 : i32
    return %c0_i32, %c0_i32_0 : i32, i32
  }
  func.func @transform_5(%arg0: i32) -> (i32, i32) {
    %c0_i32 = arith.constant 0 : i32
    %c0_i32_0 = arith.constant 0 : i32
    %c0_i32_1 = arith.constant 0 : i32
    return %c0_i32, %c0_i32_0 : i32, i32
  }
  func.func @transform_6(%arg0: i32) -> (i32, i32) {
    %c0_i32 = arith.constant 0 : i32
    %c0_i32_0 = arith.constant 0 : i32
    %c0_i32_1 = arith.constant 0 : i32
    return %c0_i32, %c0_i32_0 : i32, i32
  }
  func.func @transform_7(%arg0: i32) -> (i32, i32) {
    %c0_i32 = arith.constant 0 : i32
    %c0_i32_0 = arith.constant 0 : i32
    %c0_i32_1 = arith.constant 0 : i32
    return %c0_i32, %c0_i32_0 : i32, i32
  }
  func.func @transform_8(%arg0: i32) -> (i32, i32) {
    %c0_i32 = arith.constant 0 : i32
    %c0_i32_0 = arith.constant 0 : i32
    %c0_i32_1 = arith.constant 0 : i32
    return %c0_i32, %c0_i32_0 : i32, i32
  }
  func.func @transform_9(%arg0: i32) -> (i32, i32) {
    %c0_i32 = arith.constant 0 : i32
    %c0_i32_0 = arith.constant 0 : i32
    %c0_i32_1 = arith.constant 0 : i32
    return %c0_i32, %c0_i32_0 : i32, i32
  }
  func.func @transform_10(%arg0: i32) -> (i32, i32) {
    %c0_i32 = arith.constant 0 : i32
    %c0_i32_0 = arith.constant 0 : i32
    %c0_i32_1 = arith.constant 0 : i32
    return %c0_i32, %c0_i32_0 : i32, i32
  }
  func.func @transform_11(%arg0: i32) -> (i32, i32) {
    %c0_i32 = arith.constant 0 : i32
    %c0_i32_0 = arith.constant 0 : i32
    return %arg0, %c0_i32 : i32, i32
  }
}

</mosaic_0001>

<bundles_post_ra>
// kernel: simple_model_forward.1
= control target key start
LH: loop header
LB: loop body
LE: loop exit
PB: predicated region body
PF: predicated region fallthrough
CT: control target
= control target key end

     0   :  { %s13292_s0 = inlined_call_operand.vmem [shape: f32[8,1024], index: 0, kind: input, shape index: {}]   ;;  %s13293_s1 = inlined_call_operand.hbm [shape: bf16[1024,768], index: 1, kind: input, shape index: {}]   ;;  %s13294_s2 = inlined_call_operand.hbm [shape: f32[1,768], index: 2, kind: input, shape index: {}]   ;;  %s13295_s3 = inlined_call_operand.hbm [shape: bf16[768,768], index: 3, kind: input, shape index: {}]   ;;  %s13296_s4 = inlined_call_operand.hbm [shape: f32[1,768], index: 4, kind: input, shape index: {}]   ;;  %s13297_s5 = inlined_call_operand.hbm [shape: bf16[768,768], index: 5, kind: input, shape index: {}]   ;;  %s13298_s6 = inlined_call_operand.hbm [shape: f32[1,768], index: 6, kind: input, shape index: {}]   ;;  %s13299_s7 = inlined_call_operand.hbm [shape: bf16[768,768], index: 7, kind: input, shape index: {}]   ;;  %s13300_s8 = inlined_call_operand.hbm [shape: f32[1,768], index: 8, kind: input, shape index: {}]   ;;  %s13301_s9 = inlined_call_operand.hbm [shape: f32[1,768], index: 9, kind: input, shape index: {}]   ;;  %s13302_s10 = inlined_call_operand.<no memory space> [shape: f32[1,1], index: 10, kind: input, shape index: {}]   ;;  %s13303_s11 = inlined_call_operand.vmem [shape: f32[8,1], index: 11, kind: output, shape index: {}]  }
   0x1   :  { %v16_v0 = vstv %s13302_s10 }
   0x2   :  { %17 = vst [vmem:[#allocation2] sm:$0x1] %v16_v0 }
   0x3   :  { %18 = vsyncpa [#allocation4], 0 }
   0x4   :  { %19 = vsyncpa [#allocation6], 0 }
   0x5   :  { %20 = vsyncpa [#allocation9], 0 }
   0x6   :  { %21 = vsyncpa [#allocation12], 0 }
   0x7   :  { %22 = vsyncpa [#allocation15], 0  ;;  %s12814_s19 = smov [#allocation5]   ;;  %s12815_s21 = smov [#allocation8]  }
   0x8   :  { %s43_s20 = sshll.u32 %s12814_s19, 4  ;;  %s65_s22 = sshll.u32 %s12815_s21, 4  ;;  %s44_s20 = int_to_ptr.vmem [resolvable:$true] %s43_s20  ;;  %s66_s22 = int_to_ptr.vmem [resolvable:$true] %s65_s22 }
   0x9   :  { %s12632_s23 = scalar_lea.vmem %s44_s20, 96  ;;  %p12637_p1 = scmp.lt.s32.totalorder %s44_s20, %s44_s20 }
   0xa   :  { %p12633_p0 = scmp.ne.s32.totalorder %s44_s20, %s12632_s23  ;;  %p12638_p2 = scmp.lt.s32.totalorder %s12632_s23, %s12632_s23 }
   0xc   :  { %p12639_p3 = por %p12638_p2, %p12637_p1 }
   0xe   :  { %p12640_p4 = pnand %p12639_p3, %p12633_p0 }
  0x10   :  { %12643 = shalt.err (!%p12640_p4)
}
  0x11   :  { %46 = dma.hbm_to_vmem [thread:$0]  %s13294_s2, 96, %s44_s20, [#allocation6]  }
  0x12   :  { %s12652_s25 = scalar_lea.vmem %s66_s22, 96  ;;  %p12657_p6 = scmp.lt.s32.totalorder %s66_s22, %s66_s22 }
  0x13   :  { %p12653_p5 = scmp.ne.s32.totalorder %s66_s22, %s12652_s25  ;;  %p12658_p7 = scmp.lt.s32.totalorder %s12652_s25, %s12652_s25 }
  0x15   :  { %p12659_p8 = por %p12658_p7, %p12657_p6 }
  0x17   :  { %p12660_p9 = pnand %p12659_p8, %p12653_p5 }
  0x19   :  { %12663 = shalt.err (!%p12660_p9)
}
  0x1a   :  { %68 = dma.hbm_to_vmem [thread:$0]  %s13296_s4, 96, %s66_s22, [#allocation9]  }
  0x1b   :  { %s12816_s28 = smov [#allocation11]   ;;  %s12817_s30 = smov [#allocation14]  }
  0x1c   :  { %s87_s29 = sshll.u32 %s12816_s28, 4  ;;  %s109_s12 = sshll.u32 %s12817_s30, 4  ;;  %s88_s29 = int_to_ptr.vmem [resolvable:$true] %s87_s29  ;;  %s110_s12 = int_to_ptr.vmem [resolvable:$true] %s109_s12 }
  0x1d   :  { %s12672_s13 = scalar_lea.vmem %s88_s29, 96  ;;  %p12677_p11 = scmp.lt.s32.totalorder %s88_s29, %s88_s29 }
  0x1e   :  { %p12673_p10 = scmp.ne.s32.totalorder %s88_s29, %s12672_s13  ;;  %p12678_p12 = scmp.lt.s32.totalorder %s12672_s13, %s12672_s13 }
  0x20   :  { %p12679_p13 = por %p12678_p12, %p12677_p11 }
  0x22   :  { %p12680_p0 = pnand %p12679_p13, %p12673_p10 }
  0x24   :  { %12683 = shalt.err (!%p12680_p0)
}
  0x25   :  { %90 = dma.hbm_to_vmem [thread:$0]  %s13298_s6, 96, %s88_s29, [#allocation12]  }
  0x26   :  { %s12692_s15 = scalar_lea.vmem %s110_s12, 96  ;;  %p12697_p2 = scmp.lt.s32.totalorder %s110_s12, %s110_s12 }
  0x27   :  { %p12693_p1 = scmp.ne.s32.totalorder %s110_s12, %s12692_s15  ;;  %p12698_p3 = scmp.lt.s32.totalorder %s12692_s15, %s12692_s15 }
  0x29   :  { %p12699_p4 = por %p12698_p3, %p12697_p2 }
  0x2b   :  { %p12700_p5 = pnand %p12699_p4, %p12693_p1 }
  0x2d   :  { %12703 = shalt.err (!%p12700_p5)
}
  0x2e   :  { %112 = dma.hbm_to_vmem [thread:$0]  %s13300_s8, 96, %s110_s12, [#allocation15]  }
  0x2f   :  { %s12818_s17 = smov [#allocation3]  }
  0x30   :  { %s30_s18 = sshll.u32 %s12818_s17, 4  ;;  %s31_s18 = int_to_ptr.vmem [resolvable:$true] %s30_s18 }
  0x31   :  { %s12712_s19 = scalar_lea.vmem %s31_s18, 49152  ;;  %p12717_p7 = scmp.lt.s32.totalorder %s31_s18, %s31_s18 }
  0x32   :  { %p12713_p6 = scmp.ne.s32.totalorder %s31_s18, %s12712_s19  ;;  %p12718_p8 = scmp.lt.s32.totalorder %s12712_s19, %s12712_s19 }
  0x34   :  { %p12719_p9 = por %p12718_p8, %p12717_p7 }
  0x36   :  { %p12720_p10 = pnand %p12719_p9, %p12713_p6 }
  0x38   :  { %12723 = shalt.err (!%p12720_p10)
}
  0x39   :  { %s12819_s6 = smov 384   ;;  %s12820_s20 = smov 24  }
  0x3a   :  { %36 = dma.hbm_to_vmem [thread:$0]  %s13293_s1, 49152, %s31_s18, [#allocation4], %s12819_s6, %s12819_s6, %s12820_s20  }
  0x3b   :  { %s12821_s8 = smov [#allocation7]   ;;  %s12822_s10 = smov [#allocation10]  }
  0x3c   :  { %s52_s23 = sshll.u32 %s12821_s8, 4  ;;  %s74_s24 = sshll.u32 %s12822_s10, 4  ;;  %s53_s23 = int_to_ptr.vmem [resolvable:$true] %s52_s23  ;;  %s75_s24 = int_to_ptr.vmem [resolvable:$true] %s74_s24 }
  0x3d   :  { %s12732_s25 = scalar_lea.vmem %s53_s23, 36864  ;;  %p12737_p12 = scmp.lt.s32.totalorder %s53_s23, %s53_s23 }
  0x3e   :  { %p12733_p11 = scmp.ne.s32.totalorder %s53_s23, %s12732_s25  ;;  %p12738_p13 = scmp.lt.s32.totalorder %s12732_s25, %s12732_s25 }
  0x40   :  { %p12739_p0 = por %p12738_p13, %p12737_p12 }
  0x42   :  { %p12740_p1 = pnand %p12739_p0, %p12733_p11 }
  0x44   :  { %12743 = shalt.err (!%p12740_p1)
}
  0x45   :  { %58 = dma.hbm_to_vmem [thread:$0]  %s13295_s3, 36864, %s53_s23, [#allocation6], %s12819_s6, %s12819_s6, %s12820_s20  }
  0x46   :  { %s12752_s1 = scalar_lea.vmem %s75_s24, 36864  ;;  %p12757_p3 = scmp.lt.s32.totalorder %s75_s24, %s75_s24 }
  0x47   :  { %p12753_p2 = scmp.ne.s32.totalorder %s75_s24, %s12752_s1  ;;  %p12758_p4 = scmp.lt.s32.totalorder %s12752_s1, %s12752_s1 }
  0x49   :  { %p12759_p5 = por %p12758_p4, %p12757_p3 }
  0x4b   :  { %p12760_p6 = pnand %p12759_p5, %p12753_p2 }
  0x4d   :  { %12763 = shalt.err (!%p12760_p6)
}
  0x4e   :  { %80 = dma.hbm_to_vmem [thread:$0]  %s13297_s5, 36864, %s75_s24, [#allocation9], %s12819_s6, %s12819_s6, %s12820_s20  }
  0x4f   :  { %s12823_s30 = smov [#allocation13]   ;;  %s12824_s13 = smov [#allocation16]  }
  0x50   :  { %s96_s12 = sshll.u32 %s12823_s30, 4  ;;  %s119_s3 = sshll.u32 %s12824_s13, 4  ;;  %s97_s12 = int_to_ptr.vmem [resolvable:$true] %s96_s12  ;;  %s120_s3 = int_to_ptr.vmem [resolvable:$true] %s119_s3 }
  0x51   :  { %s12772_s2 = scalar_lea.vmem %s97_s12, 36864  ;;  %p12777_p8 = scmp.lt.s32.totalorder %s97_s12, %s97_s12 }
  0x52   :  { %p12773_p7 = scmp.ne.s32.totalorder %s97_s12, %s12772_s2  ;;  %p12778_p9 = scmp.lt.s32.totalorder %s12772_s2, %s12772_s2 }
  0x54   :  { %p12779_p10 = por %p12778_p9, %p12777_p8 }
  0x56   :  { %p12780_p11 = pnand %p12779_p10, %p12773_p7 }
  0x58   :  { %12783 = shalt.err (!%p12780_p11)
}
  0x59   :  { %102 = dma.hbm_to_vmem [thread:$0]  %s13299_s7, 36864, %s97_s12, [#allocation12], %s12819_s6, %s12819_s6, %s12820_s20  }
  0x5a   :  { %s12792_s5 = scalar_lea.vmem %s120_s3, 96  ;;  %p12797_p13 = scmp.lt.s32.totalorder %s120_s3, %s120_s3 }
  0x5b   :  { %p12793_p12 = scmp.ne.s32.totalorder %s120_s3, %s12792_s5  ;;  %p12798_p0 = scmp.lt.s32.totalorder %s12792_s5, %s12792_s5 }
  0x5d   :  { %p12799_p1 = por %p12798_p0, %p12797_p13 }
  0x5f   :  { %p12800_p2 = pnand %p12799_p1, %p12793_p12 }
  0x61   :  { %12803 = shalt.err (!%p12800_p2)
}
  0x62   :  { %122 = dma.hbm_to_vmem [thread:$0]  %s13301_s9, 96, %s120_s3, [#allocation15]  }
  0x63   :  { %12804 = dma.done.wait [#allocation4], 49152  }
  0x64   :  { %12805 = vsyncadd [#allocation4], 4294918144 }
  0x65   :  { %12806 = dma.done.wait [#allocation6], 36960  }
  0x66   :  { %12807 = vsyncadd [#allocation6], 4294930336 }
  0x67   :  { %12808 = dma.done.wait [#allocation9], 36960  }
  0x68   :  { %12809 = vsyncadd [#allocation9], 4294930336 }
  0x69   :  { %12810 = dma.done.wait [#allocation12], 36960  }
  0x6a   :  { %12811 = vsyncadd [#allocation12], 4294930336 }
  0x6b   :  { %12812 = dma.done.wait [#allocation15], 192  }
  0x6c   :  { %12813 = vsyncadd [#allocation15], 4294967104  ;;  %v10749_v1 = vld [vmem:[#allocation3 + $0x154] ss:$24 sps:$4 sm:$0xff]   ;;  %v10753_v3 = vld [vmem:[#allocation3 + $0x150] ss:$24 sps:$4 sm:$0xff]  }
  0x6d   :  { %v10751_v2 = vld [vmem:[#allocation3 + $0x454] ss:$24 sps:$4 sm:$0xff]   ;;  %2504 = vmatprep.subr.bf16.mxu0 %v10749_v1  ;;  %v10754_v4 = vld [vmem:[#allocation3 + $0x450] ss:$24 sps:$4 sm:$0xff]   ;;  %v10755_v5 = vld [vmem:[#allocation3 + $0x124] ss:$24 sps:$4 sm:$0xff]  }
  0x6e   :  { %2545 = vmatprep.subr.bf16.mxu1 %v10751_v2  ;;  %2505 = vmatpush1.bf16.msra.mxu0 %v10753_v3  ;;  %v10757_v6 = vld [vmem:[#allocation3 + $0x424] ss:$24 sps:$4 sm:$0xff]   ;;  %v10759_v7 = vld [vmem:[#allocation3 + $0x120] ss:$24 sps:$4 sm:$0xff]   ;;  %v10761_v9 = vld [vmem:[#allocation3 + $0xf4] ss:$24 sps:$4 sm:$0xff]  }
  0x6f   :  { %2546 = vmatpush1.bf16.msra.mxu1 %v10754_v4  ;;  %2506 = vmatprep.subr.bf16.mxu0 %v10755_v5  ;;  %v10760_v8 = vld [vmem:[#allocation3 + $0x420] ss:$24 sps:$4 sm:$0xff]   ;;  %v10763_v10 = vld [vmem:[#allocation3 + $0x3f4] ss:$24 sps:$4 sm:$0xff]   ;;  %v10765_v11 = vld [vmem:[#allocation3 + $0xf0] ss:$24 sps:$4 sm:$0xff]  }
  0x70   :  { %2547 = vmatprep.subr.bf16.mxu1 %v10757_v6  ;;  %v10766_v12 = vld [vmem:[#allocation3 + $0x3f0] ss:$24 sps:$4 sm:$0xff]   ;;  %v10767_v13 = vld [vmem:[#allocation3 + $0xc4] ss:$24 sps:$4 sm:$0xff]   ;;  %v10771_v15 = vld [vmem:[#allocation3 + $0xc0] ss:$24 sps:$4 sm:$0xff]  }
  0x71   :  { %v10769_v14 = vld [vmem:[#allocation3 + $0x3c4] ss:$24 sps:$4 sm:$0xff]   ;;  %v10772_v16 = vld [vmem:[#allocation3 + $0x3c0] ss:$24 sps:$4 sm:$0xff]   ;;  %v10773_v17 = vld [vmem:[#allocation3 + $0x94] ss:$24 sps:$4 sm:$0xff]  }
  0x72   :  { %2507 = vmatpush1.bf16.msra.mxu0 %v10759_v7  ;;  %v10775_v18 = vld [vmem:[#allocation3 + $0x394] ss:$24 sps:$4 sm:$0xff]   ;;  %v10777_v19 = vld [vmem:[#allocation3 + $0x90] ss:$24 sps:$4 sm:$0xff]   ;;  %v10779_v21 = vld [vmem:[#allocation3 + $0x64] ss:$24 sps:$4 sm:$0xff]  }
  0x73   :  { %2548 = vmatpush1.bf16.msra.mxu1 %v10760_v8  ;;  %2508 = vmatprep.subr.bf16.mxu0 %v10761_v9  ;;  %v10778_v20 = vld [vmem:[#allocation3 + $0x390] ss:$24 sps:$4 sm:$0xff]   ;;  %v10781_v22 = vld [vmem:[#allocation3 + $0x364] ss:$24 sps:$4 sm:$0xff]   ;;  %v10783_v23 = vld [vmem:[#allocation3 + $0x60] ss:$24 sps:$4 sm:$0xff]  }
  0x74   :  { %2549 = vmatprep.subr.bf16.mxu1 %v10763_v10  ;;  %v10784_v24 = vld [vmem:[#allocation3 + $0x360] ss:$24 sps:$4 sm:$0xff]   ;;  %v10785_v25 = vld [vmem:[#allocation3 + $0x34] ss:$24 sps:$4 sm:$0xff]   ;;  %v10789_v27 = vld [vmem:[#allocation3 + $0x30] ss:$24 sps:$4 sm:$0xff]  }
  0x75   :  { %v10787_v26 = vld [vmem:[#allocation3 + $0x334] ss:$24 sps:$4 sm:$0xff]   ;;  %v10790_v28 = vld [vmem:[#allocation3 + $0x330] ss:$24 sps:$4 sm:$0xff]   ;;  %v10791_v29 = vld [vmem:[#allocation3 + $0x4] ss:$24 sps:$4 sm:$0xff]  }
  0x76   :  { %2509 = vmatpush1.bf16.msra.mxu0 %v10765_v11  ;;  %v10793_v30 = vld [vmem:[#allocation3 + $0x304] ss:$24 sps:$4 sm:$0xff]   ;;  %v10795_v31 = vld [vmem:[#allocation3] ss:$24 sps:$4 sm:$0xff]   ;;  %v10797_v33 = vld [vmem:[#allocation3 + $0x2d4] ss:$24 sps:$4 sm:$0xff]  }
  0x77   :  { %2550 = vmatpush1.bf16.msra.mxu1 %v10766_v12  ;;  %2510 = vmatprep.subr.bf16.mxu0 %v10767_v13  ;;  %v10796_v32 = vld [vmem:[#allocation3 + $0x300] ss:$24 sps:$4 sm:$0xff]   ;;  %v10799_v34 = vld [vmem:[#allocation3 + $0x5d4] ss:$24 sps:$4 sm:$0xff]   ;;  %v10801_v35 = vld [vmem:[#allocation3 + $0x2d0] ss:$24 sps:$4 sm:$0xff]  }
  0x78   :  { %2551 = vmatprep.subr.bf16.mxu1 %v10769_v14  ;;  %v10802_v36 = vld [vmem:[#allocation3 + $0x5d0] ss:$24 sps:$4 sm:$0xff]   ;;  %v10803_v37 = vld [vmem:[#allocation3 + $0x2a4] ss:$24 sps:$4 sm:$0xff]   ;;  %v10807_v39 = vld [vmem:[#allocation3 + $0x2a0] ss:$24 sps:$4 sm:$0xff]  }
  0x79   :  { %v10805_v38 = vld [vmem:[#allocation3 + $0x5a4] ss:$24 sps:$4 sm:$0xff]   ;;  %v10808_v40 = vld [vmem:[#allocation3 + $0x5a0] ss:$24 sps:$4 sm:$0xff]   ;;  %v10809_v41 = vld [vmem:[#allocation3 + $0x274] ss:$24 sps:$4 sm:$0xff]  }
  0x7a   :  { %2511 = vmatpush1.bf16.msra.mxu0 %v10771_v15  ;;  %v10811_v42 = vld [vmem:[#allocation3 + $0x574] ss:$24 sps:$4 sm:$0xff]   ;;  %v10813_v43 = vld [vmem:[#allocation3 + $0x270] ss:$24 sps:$4 sm:$0xff]   ;;  %v10815_v45 = vld [vmem:[#allocation3 + $0x244] ss:$24 sps:$4 sm:$0xff]  }
  0x7b   :  { %2552 = vmatpush1.bf16.msra.mxu1 %v10772_v16  ;;  %2512 = vmatprep.subr.bf16.mxu0 %v10773_v17  ;;  %v10814_v44 = vld [vmem:[#allocation3 + $0x570] ss:$24 sps:$4 sm:$0xff]   ;;  %v10817_v46 = vld [vmem:[#allocation3 + $0x544] ss:$24 sps:$4 sm:$0xff]   ;;  %v10819_v48 = vld [vmem:[#allocation3 + $0x240] ss:$24 sps:$4 sm:$0xff]  }
  0x7c   :  { %2553 = vmatprep.subr.bf16.mxu1 %v10775_v18  ;;  %v153_v47 = vld [vmem:[%s13292_s0 + $0x8] sm:$0xff]  ;;  %v10820_v49 = vld [vmem:[#allocation3 + $0x540] ss:$24 sps:$4 sm:$0xff]   ;;  %v154_v6 = vld [vmem:[%s13292_s0 + $0x10] sm:$0xff]  ;;  %vm9478_vm0 = vcmask 7168  }
  0x7d   :  { %v12930_v50 = vpack.c.bf16 %v153_v47, %v153_v47  ;;  %v155_v51 = vld [vmem:[%s13292_s0 + $0x18] sm:$0xff]  ;;  %v10825_v55 = vld [vmem:[#allocation3 + $0x210] ss:$24 sps:$4 sm:$0xff]   ;;  %v152_v5 = vld [vmem:[%s13292_s0] sm:$0xff]  ;;  %v12947_v10 = vpack.c.bf16 %v154_v6, %v154_v6 }
  0x7e   :  { %2513 = vmatpush1.bf16.msra.mxu0 %v10777_v19  ;;  %v10821_v52 = vld [vmem:[#allocation3 + $0x214] ss:$24 sps:$4 sm:$0xff]   ;;  %v12935_v53 = vpack.c.bf16 %v155_v51, %v155_v51  ;;  %v10826_v56 = vld [vmem:[#allocation3 + $0x510] ss:$24 sps:$4 sm:$0xff]   ;;  %v10827_v57 = vld [vmem:[#allocation3 + $0x1e4] ss:$24 sps:$4 sm:$0xff]   ;;  %v12945_v9 = vpack.c.bf16 %v152_v5, %v152_v5 }
  0x7f   :  { %2554 = vmatpush1.bf16.msra.mxu1 %v10778_v20  ;;  %2514 = vmatprep.subr.bf16.mxu0 %v10779_v21  ;;  %v10823_v54 = vld [vmem:[#allocation3 + $0x514] ss:$24 sps:$4 sm:$0xff]   ;;  %v10829_v58 = vld [vmem:[#allocation3 + $0x4e4] ss:$24 sps:$4 sm:$0xff]   ;;  %v10831_v59 = vld [vmem:[#allocation3 + $0x1e0] ss:$24 sps:$4 sm:$0xff]  }
  0x80   :  { %2555 = vmatprep.subr.bf16.mxu1 %v10781_v22  ;;  %2536 = vmatprep.mubr.bf16.mxu0 %v12930_v50  ;;  %v10832_v60 = vld [vmem:[#allocation3 + $0x4e0] ss:$24 sps:$4 sm:$0xff]   ;;  %v10833_v61 = vld [vmem:[#allocation3 + $0x1b4] ss:$24 sps:$4 sm:$0xff]   ;;  %v10837_v63 = vld [vmem:[#allocation3 + $0x1b0] ss:$24 sps:$4 sm:$0xff]  }
  0x81   :  { %2577 = vmatprep.mubr.bf16.mxu1 %v12935_v53  ;;  %v10835_v62 = vld [vmem:[#allocation3 + $0x4b4] ss:$24 sps:$4 sm:$0xff]   ;;  %v10838_v0 = vld [vmem:[#allocation3 + $0x4b0] ss:$24 sps:$4 sm:$0xff]   ;;  %v10839_v1 = vld [vmem:[#allocation3 + $0x184] ss:$24 sps:$4 sm:$0xff]  }
  0x82   :  { %2515 = vmatpush1.bf16.msra.mxu0 %v10783_v23  ;;  %v10841_v2 = vld [vmem:[#allocation3 + $0x484] ss:$24 sps:$4 sm:$0xff]   ;;  %v10843_v3 = vld [vmem:[#allocation3 + $0x180] ss:$24 sps:$4 sm:$0xff]   ;;  %v10847_v7 = vld [vmem:[#allocation3 + $0x754] ss:$24 sps:$4 sm:$0xff]  }
  0x83   :  { %2556 = vmatpush1.bf16.msra.mxu1 %v10784_v24  ;;  %2516 = vmatprep.subr.bf16.mxu0 %v10785_v25  ;;  %v10844_v4 = vld [vmem:[#allocation3 + $0x480] ss:$24 sps:$4 sm:$0xff]   ;;  %v10850_v8 = vld [vmem:[#allocation3 + $0xa54] ss:$24 sps:$4 sm:$0xff]   ;;  %v10845_v11 = vld [vmem:[#allocation3 + $0x750] ss:$24 sps:$4 sm:$0xff]  }
  0x84   :  { %2557 = vmatprep.subr.bf16.mxu1 %v10787_v26  ;;  %v10848_v12 = vld [vmem:[#allocation3 + $0xa50] ss:$24 sps:$4 sm:$0xff]   ;;  %v10853_v13 = vld [vmem:[#allocation3 + $0x724] ss:$24 sps:$4 sm:$0xff]   ;;  %v10851_v15 = vld [vmem:[#allocation3 + $0x720] ss:$24 sps:$4 sm:$0xff]  }
  0x85   :  { %v10856_v14 = vld [vmem:[#allocation3 + $0xa24] ss:$24 sps:$4 sm:$0xff]   ;;  %v10854_v16 = vld [vmem:[#allocation3 + $0xa20] ss:$24 sps:$4 sm:$0xff]   ;;  %v10859_v17 = vld [vmem:[#allocation3 + $0x6f4] ss:$24 sps:$4 sm:$0xff]  }
  0x86   :  { %2517 = vmatpush1.bf16.msra.mxu0 %v10789_v27  ;;  %v10862_v18 = vld [vmem:[#allocation3 + $0x9f4] ss:$24 sps:$4 sm:$0xff]   ;;  %v10857_v19 = vld [vmem:[#allocation3 + $0x6f0] ss:$24 sps:$4 sm:$0xff]   ;;  %v10865_v21 = vld [vmem:[#allocation3 + $0x6c4] ss:$24 sps:$4 sm:$0xff]  }
  0x87   :  { %2558 = vmatpush1.bf16.msra.mxu1 %v10790_v28  ;;  %2518 = vmatprep.subr.bf16.mxu0 %v10791_v29  ;;  %v10860_v20 = vld [vmem:[#allocation3 + $0x9f0] ss:$24 sps:$4 sm:$0xff]   ;;  %v10868_v22 = vld [vmem:[#allocation3 + $0x9c4] ss:$24 sps:$4 sm:$0xff]   ;;  %v10863_v23 = vld [vmem:[#allocation3 + $0x6c0] ss:$24 sps:$4 sm:$0xff]  }
  0x88   :  { %2559 = vmatprep.subr.bf16.mxu1 %v10793_v30  ;;  %v10866_v24 = vld [vmem:[#allocation3 + $0x9c0] ss:$24 sps:$4 sm:$0xff]   ;;  %v10871_v25 = vld [vmem:[#allocation3 + $0x694] ss:$24 sps:$4 sm:$0xff]   ;;  %v10869_v27 = vld [vmem:[#allocation3 + $0x690] ss:$24 sps:$4 sm:$0xff]  }
  0x89   :  { %v10874_v26 = vld [vmem:[#allocation3 + $0x994] ss:$24 sps:$4 sm:$0xff]   ;;  %v10872_v28 = vld [vmem:[#allocation3 + $0x990] ss:$24 sps:$4 sm:$0xff]   ;;  %v10877_v29 = vld [vmem:[#allocation3 + $0x664] ss:$24 sps:$4 sm:$0xff]  }
  0x8a   :  { %2519 = vmatpush1.bf16.msra.mxu0 %v10795_v31  ;;  %v10880_v30 = vld [vmem:[#allocation3 + $0x964] ss:$24 sps:$4 sm:$0xff]   ;;  %v10875_v31 = vld [vmem:[#allocation3 + $0x660] ss:$24 sps:$4 sm:$0xff]   ;;  %v10893_v47 = vld [vmem:[#allocation3 + $0x8d0] ss:$24 sps:$4 sm:$0xff]  }
  0x8b   :  { %2560 = vmatpush1.bf16.msra.mxu1 %v10796_v32  ;;  %2520 = vmatprep.subr.bf16.mxu0 %v10797_v33  ;;  %v10878_v32 = vld [vmem:[#allocation3 + $0x960] ss:$24 sps:$4 sm:$0xff]   ;;  %v10883_v33 = vld [vmem:[#allocation3 + $0x634] ss:$24 sps:$4 sm:$0xff]   ;;  %v10904_v51 = vld [vmem:[#allocation3 + $0xba4] ss:$24 sps:$4 sm:$0xff]  }
  0x8c   :  { %2561 = vmatprep.subr.bf16.mxu1 %v10799_v34  ;;  %v10886_v34 = vld [vmem:[#allocation3 + $0x934] ss:$24 sps:$4 sm:$0xff]   ;;  %v10923_v5 = vld [vmem:[#allocation3 + $0x7e0] ss:$24 sps:$4 sm:$0xff]  }
  0x8d   :  { %v10926_v6 = vld [vmem:[#allocation3 + $0xae0] ss:$24 sps:$4 sm:$0xff]  }
  0x8e   :  { %2521 = vmatpush2.bf16.msra.mxu0 %v10801_v35  ;;  %v157_v35 = vld [vmem:[%s13292_s0 + $0x28] sm:$0xff] }
  0x8f   :  { %2562 = vmatpush2.bf16.msra.mxu1 %v10802_v36  ;;  %2522 = vmatprep.subr.bf16.mxu0 %v10803_v37  ;;  %v10881_v36 = vld [vmem:[#allocation3 + $0x630] ss:$24 sps:$4 sm:$0xff]  }
  0x90   :  { %2563 = vmatprep.subr.bf16.mxu1 %v10805_v38  ;;  %v10884_v37 = vld [vmem:[#allocation3 + $0x930] ss:$24 sps:$4 sm:$0xff]   ;;  %v12954_v38 = vpack.c.bf16 %v157_v35, %v157_v35 }
  0x91   :  { %v10959_v35 = vld [vmem:[#allocation3 + $0xc8] ss:$24 sps:$4 sm:$0xff]  }
  0x92   :  { %2523 = vmatpush2.bf16.msra.mxu0 %v10807_v39  ;;  %v159_v39 = vld [vmem:[%s13292_s0 + $0x38] sm:$0xff] }
  0x93   :  { %2564 = vmatpush2.bf16.msra.mxu1 %v10808_v40  ;;  %2524 = vmatprep.subr.bf16.mxu0 %v10809_v41  ;;  %v10889_v40 = vld [vmem:[#allocation3 + $0x604] ss:$24 sps:$4 sm:$0xff]   ;;  %v12959_v41 = vpack.c.bf16 %v159_v39, %v159_v39 }
  0x94   :  { %2565 = vmatprep.subr.bf16.mxu1 %v10811_v42  ;;  %v10892_v42 = vld [vmem:[#allocation3 + $0x904] ss:$24 sps:$4 sm:$0xff]  }
  0x95   :  { %v10970_v39 = vld [vmem:[#allocation3 + $0x39c] ss:$24 sps:$4 sm:$0xff]  }
  0x96   :  { %2525 = vmatpush2.bf16.msra.mxu0 %v10813_v43  ;;  %v10887_v43 = vld [vmem:[#allocation3 + $0x600] ss:$24 sps:$4 sm:$0xff]  }
  0x97   :  { %2566 = vmatpush2.bf16.msra.mxu1 %v10814_v44  ;;  %2526 = vmatprep.subr.bf16.mxu0 %v10815_v45  ;;  %v10890_v44 = vld [vmem:[#allocation3 + $0x900] ss:$24 sps:$4 sm:$0xff]   ;;  %v10895_v45 = vld [vmem:[#allocation3 + $0x8d4] ss:$24 sps:$4 sm:$0xff]  }
  0x98   :  { %2567 = vmatprep.subr.bf16.mxu1 %v10817_v46  ;;  %v10898_v46 = vld [vmem:[#allocation3 + $0xbd4] ss:$24 sps:$4 sm:$0xff]  }
  0x9a   :  { %2527 = vmatpush2.bf16.msra.mxu0 %v10819_v48  ;;  %v10896_v48 = vld [vmem:[#allocation3 + $0xbd0] ss:$24 sps:$4 sm:$0xff]  }
  0x9b   :  { %2568 = vmatpush2.bf16.msra.mxu1 %v10820_v49  ;;  %2528 = vmatprep.subr.bf16.mxu0 %v10821_v52  ;;  %v10901_v49 = vld [vmem:[#allocation3 + $0x8a4] ss:$24 sps:$4 sm:$0xff]   ;;  %v10899_v52 = vld [vmem:[#allocation3 + $0x8a0] ss:$24 sps:$4 sm:$0xff]  }
  0x9c   :  { %2569 = vmatprep.subr.bf16.mxu1 %v10823_v54  ;;  %v10902_v54 = vld [vmem:[#allocation3 + $0xba0] ss:$24 sps:$4 sm:$0xff]  }
  0x9e   :  { %2529 = vmatpush2.bf16.msra.mxu0 %v10825_v55  ;;  %v10907_v55 = vld [vmem:[#allocation3 + $0x874] ss:$24 sps:$4 sm:$0xff]  }
  0x9f   :  { %2570 = vmatpush2.bf16.msra.mxu1 %v10826_v56  ;;  %2530 = vmatprep.subr.bf16.mxu0 %v10827_v57  ;;  %v10910_v56 = vld [vmem:[#allocation3 + $0xb74] ss:$24 sps:$4 sm:$0xff]   ;;  %v10905_v57 = vld [vmem:[#allocation3 + $0x870] ss:$24 sps:$4 sm:$0xff]  }
  0xa0   :  { %2571 = vmatprep.subr.bf16.mxu1 %v10829_v58  ;;  %v10908_v58 = vld [vmem:[#allocation3 + $0xb70] ss:$24 sps:$4 sm:$0xff]  }
  0xa2   :  { %2531 = vmatpush2.bf16.msra.mxu0 %v10831_v59  ;;  %v10913_v59 = vld [vmem:[#allocation3 + $0x844] ss:$24 sps:$4 sm:$0xff]  }
  0xa3   :  { %2572 = vmatpush2.bf16.msra.mxu1 %v10832_v60  ;;  %2532 = vmatprep.subr.bf16.mxu0 %v10833_v61  ;;  %v10916_v60 = vld [vmem:[#allocation3 + $0xb44] ss:$24 sps:$4 sm:$0xff]   ;;  %v10911_v61 = vld [vmem:[#allocation3 + $0x840] ss:$24 sps:$4 sm:$0xff]  }
  0xa4   :  { %2573 = vmatprep.subr.bf16.mxu1 %v10835_v62  ;;  %v10914_v62 = vld [vmem:[#allocation3 + $0xb40] ss:$24 sps:$4 sm:$0xff]  }
  0xa6   :  { %2533 = vmatpush2.bf16.msra.mxu0 %v10837_v63  ;;  %v10919_v63 = vld [vmem:[#allocation3 + $0x814] ss:$24 sps:$4 sm:$0xff]  }
  0xa7   :  { %2574 = vmatpush2.bf16.msra.mxu1 %v10838_v0  ;;  %2534 = vmatprep.subr.bf16.mxu0 %v10839_v1  ;;  %v10922_v0 = vld [vmem:[#allocation3 + $0xb14] ss:$24 sps:$4 sm:$0xff]   ;;  %v10917_v1 = vld [vmem:[#allocation3 + $0x810] ss:$24 sps:$4 sm:$0xff]  }
  0xa8   :  { %2575 = vmatprep.subr.bf16.mxu1 %v10841_v2  ;;  %v10920_v2 = vld [vmem:[#allocation3 + $0xb10] ss:$24 sps:$4 sm:$0xff]  }
  0xaa   :  { %2535 = vmatpush2.bf16.msra.mxu0 %v10843_v3  ;;  %v10925_v3 = vld [vmem:[#allocation3 + $0x7e4] ss:$24 sps:$4 sm:$0xff]  }
  0xab   :  { %2576 = vmatpush2.bf16.msra.mxu1 %v10844_v4  ;;  %2586 = vmatprep.subr.bf16.mxu0 %v10847_v7  ;;  %v10928_v4 = vld [vmem:[#allocation3 + $0xae4] ss:$24 sps:$4 sm:$0xff]   ;;  %v10931_v7 = vld [vmem:[#allocation3 + $0x7b4] ss:$24 sps:$4 sm:$0xff]  }
  0xac   :  { %2627 = vmatprep.subr.bf16.mxu1 %v10850_v8  ;;  %v10934_v8 = vld [vmem:[#allocation3 + $0xab4] ss:$24 sps:$4 sm:$0xff]  }
  0xad   :  { %2537 = vmatmul.mubr.bf16.vlgmr.msra.gmra.mxu0 %v12945_v9 }
  0xae   :  { %2578 = vmatmul.mubr.bf16.vlgmr.msra.gmra.mxu1 %v12947_v10  ;;  %2587 = vmatpush1.bf16.msra.mxu0 %v10845_v11  ;;  %v10929_v11 = vld [vmem:[#allocation3 + $0x7b0] ss:$24 sps:$4 sm:$0xff]  }
  0xaf   :  { %2628 = vmatpush1.bf16.msra.mxu1 %v10848_v12  ;;  %2588 = vmatprep.subr.bf16.mxu0 %v10853_v13  ;;  %v10932_v12 = vld [vmem:[#allocation3 + $0xab0] ss:$24 sps:$4 sm:$0xff]   ;;  %v10937_v13 = vld [vmem:[#allocation3 + $0x784] ss:$24 sps:$4 sm:$0xff]  }
  0xb0   :  { %2629 = vmatprep.subr.bf16.mxu1 %v10856_v14  ;;  %2618 = vmatprep.mubr.bf16.mxu0 %v12954_v38  ;;  %v10940_v14 = vld [vmem:[#allocation3 + $0xa84] ss:$24 sps:$4 sm:$0xff]  }
  0xb1   :  { %2659 = vmatprep.mubr.bf16.mxu1 %v12959_v41 }
  0xb2   :  { %2589 = vmatpush1.bf16.msra.mxu0 %v10851_v15  ;;  %v10935_v15 = vld [vmem:[#allocation3 + $0x780] ss:$24 sps:$4 sm:$0xff]  }
  0xb3   :  { %2630 = vmatpush1.bf16.msra.mxu1 %v10854_v16  ;;  %2590 = vmatprep.subr.bf16.mxu0 %v10859_v17  ;;  %v10938_v16 = vld [vmem:[#allocation3 + $0xa80] ss:$24 sps:$4 sm:$0xff]  }
  0xb4   :  { %2631 = vmatprep.subr.bf16.mxu1 %v10862_v18  ;;  %v156_v17 = vld [vmem:[%s13292_s0 + $0x20] sm:$0xff]  ;;  %v158_v18 = vld [vmem:[%s13292_s0 + $0x30] sm:$0xff] }
  0xb6   :  { %2591 = vmatpush1.bf16.msra.mxu0 %v10857_v19  ;;  %v10943_v19 = vld [vmem:[#allocation3 + $0x15c] ss:$24 sps:$4 sm:$0xff]  }
  0xb7   :  { %2632 = vmatpush1.bf16.msra.mxu1 %v10860_v20  ;;  %2592 = vmatprep.subr.bf16.mxu0 %v10865_v21  ;;  %v10946_v20 = vld [vmem:[#allocation3 + $0x45c] ss:$24 sps:$4 sm:$0xff]   ;;  %v12969_v21 = vpack.c.bf16 %v156_v17, %v156_v17  ;;  %v11019_v17 = vld [vmem:[#allocation3 + $0x1e8] ss:$24 sps:$4 sm:$0xff]  }
  0xb8   :  { %2633 = vmatprep.subr.bf16.mxu1 %v10868_v22  ;;  %v12971_v22 = vpack.c.bf16 %v158_v18, %v158_v18  ;;  %v11022_v18 = vld [vmem:[#allocation3 + $0x4e8] ss:$24 sps:$4 sm:$0xff]  }
  0xba   :  { %2593 = vmatpush1.bf16.msra.mxu0 %v10863_v23  ;;  %v10941_v23 = vld [vmem:[#allocation3 + $0x158] ss:$24 sps:$4 sm:$0xff]  }
  0xbb   :  { %2634 = vmatpush1.bf16.msra.mxu1 %v10866_v24  ;;  %2594 = vmatprep.subr.bf16.mxu0 %v10871_v25  ;;  %v10944_v24 = vld [vmem:[#allocation3 + $0x458] ss:$24 sps:$4 sm:$0xff]   ;;  %v10949_v25 = vld [vmem:[#allocation3 + $0x12c] ss:$24 sps:$4 sm:$0xff]  }
  0xbc   :  { %2635 = vmatprep.subr.bf16.mxu1 %v10874_v26  ;;  %v10952_v26 = vld [vmem:[#allocation3 + $0x42c] ss:$24 sps:$4 sm:$0xff]  }
  0xbe   :  { %2595 = vmatpush1.bf16.msra.mxu0 %v10869_v27  ;;  %v10947_v27 = vld [vmem:[#allocation3 + $0x128] ss:$24 sps:$4 sm:$0xff]  }
  0xbf   :  { %2636 = vmatpush1.bf16.msra.mxu1 %v10872_v28  ;;  %2596 = vmatprep.subr.bf16.mxu0 %v10877_v29  ;;  %v10950_v28 = vld [vmem:[#allocation3 + $0x428] ss:$24 sps:$4 sm:$0xff]   ;;  %v10955_v29 = vld [vmem:[#allocation3 + $0xfc] ss:$24 sps:$4 sm:$0xff]  }
  0xc0   :  { %2637 = vmatprep.subr.bf16.mxu1 %v10880_v30  ;;  %v10958_v30 = vld [vmem:[#allocation3 + $0x3fc] ss:$24 sps:$4 sm:$0xff]  }
  0xc2   :  { %2597 = vmatpush1.bf16.msra.mxu0 %v10875_v31  ;;  %v10953_v31 = vld [vmem:[#allocation3 + $0xf8] ss:$24 sps:$4 sm:$0xff]  }
  0xc3   :  { %2638 = vmatpush1.bf16.msra.mxu1 %v10878_v32  ;;  %2598 = vmatprep.subr.bf16.mxu0 %v10883_v33  ;;  %v10956_v32 = vld [vmem:[#allocation3 + $0x3f8] ss:$24 sps:$4 sm:$0xff]   ;;  %v10961_v33 = vld [vmem:[#allocation3 + $0xcc] ss:$24 sps:$4 sm:$0xff]  }
  0xc4   :  { %2639 = vmatprep.subr.bf16.mxu1 %v10886_v34  ;;  %v10964_v34 = vld [vmem:[#allocation3 + $0x3cc] ss:$24 sps:$4 sm:$0xff]  }
  0xc6   :  { %2599 = vmatpush1.bf16.msra.mxu0 %v10881_v36  ;;  %v10962_v36 = vld [vmem:[#allocation3 + $0x3c8] ss:$24 sps:$4 sm:$0xff]  }
  0xc7   :  { %2640 = vmatpush1.bf16.msra.mxu1 %v10884_v37  ;;  %2600 = vmatprep.subr.bf16.mxu0 %v10889_v40  ;;  %v10967_v37 = vld [vmem:[#allocation3 + $0x9c] ss:$24 sps:$4 sm:$0xff]   ;;  %v10965_v40 = vld [vmem:[#allocation3 + $0x98] ss:$24 sps:$4 sm:$0xff]  }
  0xc8   :  { %2641 = vmatprep.subr.bf16.mxu1 %v10892_v42  ;;  %v10968_v42 = vld [vmem:[#allocation3 + $0x398] ss:$24 sps:$4 sm:$0xff]  }
  0xca   :  { %2601 = vmatpush1.bf16.msra.mxu0 %v10887_v43  ;;  %v10973_v43 = vld [vmem:[#allocation3 + $0x6c] ss:$24 sps:$4 sm:$0xff]  }
  0xcb   :  { %2642 = vmatpush1.bf16.msra.mxu1 %v10890_v44  ;;  %2602 = vmatprep.subr.bf16.mxu0 %v10895_v45  ;;  %v10976_v44 = vld [vmem:[#allocation3 + $0x36c] ss:$24 sps:$4 sm:$0xff]   ;;  %v10971_v45 = vld [vmem:[#allocation3 + $0x68] ss:$24 sps:$4 sm:$0xff]  }
  0xcc   :  { %2643 = vmatprep.subr.bf16.mxu1 %v10898_v46  ;;  %v10974_v46 = vld [vmem:[#allocation3 + $0x368] ss:$24 sps:$4 sm:$0xff]  }
  0xce   :  { %2603 = vmatpush2.bf16.msra.mxu0 %v10893_v47  ;;  %v10979_v47 = vld [vmem:[#allocation3 + $0x3c] ss:$24 sps:$4 sm:$0xff]  }
  0xcf   :  { %2644 = vmatpush2.bf16.msra.mxu1 %v10896_v48  ;;  %2604 = vmatprep.subr.bf16.mxu0 %v10901_v49  ;;  %v10982_v48 = vld [vmem:[#allocation3 + $0x33c] ss:$24 sps:$4 sm:$0xff]   ;;  %v10977_v49 = vld [vmem:[#allocation3 + $0x38] ss:$24 sps:$4 sm:$0xff]  }
  0xd0   :  { %2645 = vmatprep.subr.bf16.mxu1 %v10904_v51  ;;  %v10980_v51 = vld [vmem:[#allocation3 + $0x338] ss:$24 sps:$4 sm:$0xff]  }
  0xd2   :  { %2605 = vmatpush2.bf16.msra.mxu0 %v10899_v52  ;;  %v10985_v52 = vld [vmem:[#allocation3 + $0xc] ss:$24 sps:$4 sm:$0xff]  }
  0xd3   :  { %2646 = vmatpush2.bf16.msra.mxu1 %v10902_v54  ;;  %2606 = vmatprep.subr.bf16.mxu0 %v10907_v55  ;;  %v10988_v54 = vld [vmem:[#allocation3 + $0x30c] ss:$24 sps:$4 sm:$0xff]   ;;  %v10983_v55 = vld [vmem:[#allocation3 + $0x8] ss:$24 sps:$4 sm:$0xff]  }
  0xd4   :  { %2647 = vmatprep.subr.bf16.mxu1 %v10910_v56  ;;  %v10986_v56 = vld [vmem:[#allocation3 + $0x308] ss:$24 sps:$4 sm:$0xff]  }
  0xd6   :  { %2607 = vmatpush2.bf16.msra.mxu0 %v10905_v57  ;;  %v10991_v57 = vld [vmem:[#allocation3 + $0x2dc] ss:$24 sps:$4 sm:$0xff]  }
  0xd7   :  { %2648 = vmatpush2.bf16.msra.mxu1 %v10908_v58  ;;  %2608 = vmatprep.subr.bf16.mxu0 %v10913_v59  ;;  %v10994_v58 = vld [vmem:[#allocation3 + $0x5dc] ss:$24 sps:$4 sm:$0xff]   ;;  %v10989_v59 = vld [vmem:[#allocation3 + $0x2d8] ss:$24 sps:$4 sm:$0xff]  }
  0xd8   :  { %2649 = vmatprep.subr.bf16.mxu1 %v10916_v60  ;;  %v10992_v60 = vld [vmem:[#allocation3 + $0x5d8] ss:$24 sps:$4 sm:$0xff]  }
  0xda   :  { %2609 = vmatpush2.bf16.msra.mxu0 %v10911_v61  ;;  %v10997_v61 = vld [vmem:[#allocation3 + $0x2ac] ss:$24 sps:$4 sm:$0xff]  }
  0xdb   :  { %2650 = vmatpush2.bf16.msra.mxu1 %v10914_v62  ;;  %2610 = vmatprep.subr.bf16.mxu0 %v10919_v63  ;;  %v11000_v62 = vld [vmem:[#allocation3 + $0x5ac] ss:$24 sps:$4 sm:$0xff]   ;;  %v10995_v63 = vld [vmem:[#allocation3 + $0x2a8] ss:$24 sps:$4 sm:$0xff]  }
  0xdc   :  { %2651 = vmatprep.subr.bf16.mxu1 %v10922_v0  ;;  %v10998_v0 = vld [vmem:[#allocation3 + $0x5a8] ss:$24 sps:$4 sm:$0xff]  }
  0xde   :  { %2611 = vmatpush2.bf16.msra.mxu0 %v10917_v1  ;;  %v11003_v1 = vld [vmem:[#allocation3 + $0x27c] ss:$24 sps:$4 sm:$0xff]  }
  0xdf   :  { %2652 = vmatpush2.bf16.msra.mxu1 %v10920_v2  ;;  %2612 = vmatprep.subr.bf16.mxu0 %v10925_v3  ;;  %v11006_v2 = vld [vmem:[#allocation3 + $0x57c] ss:$24 sps:$4 sm:$0xff]   ;;  %v11001_v3 = vld [vmem:[#allocation3 + $0x278] ss:$24 sps:$4 sm:$0xff]  }
  0xe0   :  { %2653 = vmatprep.subr.bf16.mxu1 %v10928_v4  ;;  %v11004_v4 = vld [vmem:[#allocation3 + $0x578] ss:$24 sps:$4 sm:$0xff]  }
  0xe2   :  { %2613 = vmatpush2.bf16.msra.mxu0 %v10923_v5  ;;  %v11009_v5 = vld [vmem:[#allocation3 + $0x24c] ss:$24 sps:$4 sm:$0xff]  }
  0xe3   :  { %2654 = vmatpush2.bf16.msra.mxu1 %v10926_v6  ;;  %2614 = vmatprep.subr.bf16.mxu0 %v10931_v7  ;;  %v11012_v6 = vld [vmem:[#allocation3 + $0x54c] ss:$24 sps:$4 sm:$0xff]   ;;  %v11007_v7 = vld [vmem:[#allocation3 + $0x248] ss:$24 sps:$4 sm:$0xff]  }
  0xe4   :  { %2655 = vmatprep.subr.bf16.mxu1 %v10934_v8  ;;  %v11010_v8 = vld [vmem:[#allocation3 + $0x548] ss:$24 sps:$4 sm:$0xff]  }
  0xe6   :  { %2615 = vmatpush2.bf16.msra.mxu0 %v10929_v11  ;;  %v11015_v11 = vld [vmem:[#allocation3 + $0x21c] ss:$24 sps:$4 sm:$0xff]  }
  0xe7   :  { %2656 = vmatpush2.bf16.msra.mxu1 %v10932_v12  ;;  %2616 = vmatprep.subr.bf16.mxu0 %v10937_v13  ;;  %v11018_v12 = vld [vmem:[#allocation3 + $0x51c] ss:$24 sps:$4 sm:$0xff]   ;;  %v11013_v13 = vld [vmem:[#allocation3 + $0x218] ss:$24 sps:$4 sm:$0xff]  }
  0xe8   :  { %2657 = vmatprep.subr.bf16.mxu1 %v10940_v14  ;;  %v11016_v14 = vld [vmem:[#allocation3 + $0x518] ss:$24 sps:$4 sm:$0xff]  }
  0xea   :  { %2617 = vmatpush2.bf16.msra.mxu0 %v10935_v15  ;;  %v11021_v15 = vld [vmem:[#allocation3 + $0x1ec] ss:$24 sps:$4 sm:$0xff]  }
  0xeb   :  { %2658 = vmatpush2.bf16.msra.mxu1 %v10938_v16  ;;  %2668 = vmatprep.subr.bf16.mxu0 %v10943_v19  ;;  %v11024_v16 = vld [vmem:[#allocation3 + $0x4ec] ss:$24 sps:$4 sm:$0xff]   ;;  %v11027_v19 = vld [vmem:[#allocation3 + $0x1bc] ss:$24 sps:$4 sm:$0xff]  }
  0xec   :  { %2709 = vmatprep.subr.bf16.mxu1 %v10946_v20  ;;  %v11030_v20 = vld [vmem:[#allocation3 + $0x4bc] ss:$24 sps:$4 sm:$0xff]  }
  0xed   :  { %2619 = vmatmul.mubr.bf16.vlgmr.msra.gmra.mxu0 %v12969_v21 }
  0xee   :  { %2660 = vmatmul.mubr.bf16.vlgmr.msra.gmra.mxu1 %v12971_v22  ;;  %2669 = vmatpush1.bf16.msra.mxu0 %v10941_v23  ;;  %v11025_v23 = vld [vmem:[#allocation3 + $0x1b8] ss:$24 sps:$4 sm:$0xff]  }
  0xef   :  { %2710 = vmatpush1.bf16.msra.mxu1 %v10944_v24  ;;  %2670 = vmatprep.subr.bf16.mxu0 %v10949_v25  ;;  %v11028_v24 = vld [vmem:[#allocation3 + $0x4b8] ss:$24 sps:$4 sm:$0xff]   ;;  %v11033_v25 = vld [vmem:[#allocation3 + $0x18c] ss:$24 sps:$4 sm:$0xff]  }
  0xf0   :  { %2711 = vmatprep.subr.bf16.mxu1 %v10952_v26  ;;  %2700 = vmatprep.mubr.bf16.mxu0 %v12930_v50  ;;  %v11036_v26 = vld [vmem:[#allocation3 + $0x48c] ss:$24 sps:$4 sm:$0xff]  }
  0xf1   :  { %2741 = vmatprep.mubr.bf16.mxu1 %v12935_v53 }
  0xf2   :  { %2671 = vmatpush1.bf16.msra.mxu0 %v10947_v27  ;;  %v11031_v27 = vld [vmem:[#allocation3 + $0x188] ss:$24 sps:$4 sm:$0xff]  }
  0xf3   :  { %2712 = vmatpush1.bf16.msra.mxu1 %v10950_v28  ;;  %2672 = vmatprep.subr.bf16.mxu0 %v10955_v29  ;;  %v11034_v28 = vld [vmem:[#allocation3 + $0x488] ss:$24 sps:$4 sm:$0xff]   ;;  %v11039_v29 = vld [vmem:[#allocation3 + $0x75c] ss:$24 sps:$4 sm:$0xff]  }
  0xf4   :  { %2713 = vmatprep.subr.bf16.mxu1 %v10958_v30  ;;  %v11042_v30 = vld [vmem:[#allocation3 + $0xa5c] ss:$24 sps:$4 sm:$0xff]  }
  0xf6   :  { %2673 = vmatpush1.bf16.msra.mxu0 %v10953_v31  ;;  %v11037_v31 = vld [vmem:[#allocation3 + $0x758] ss:$24 sps:$4 sm:$0xff]  }
  0xf7   :  { %2714 = vmatpush1.bf16.msra.mxu1 %v10956_v32  ;;  %2674 = vmatprep.subr.bf16.mxu0 %v10961_v33  ;;  %v11040_v32 = vld [vmem:[#allocation3 + $0xa58] ss:$24 sps:$4 sm:$0xff]   ;;  %v11045_v33 = vld [vmem:[#allocation3 + $0x72c] ss:$24 sps:$4 sm:$0xff]  }
  0xf8   :  { %2715 = vmatprep.subr.bf16.mxu1 %v10964_v34  ;;  %v11048_v34 = vld [vmem:[#allocation3 + $0xa2c] ss:$24 sps:$4 sm:$0xff]  }
  0xfa   :  { %2675 = vmatpush1.bf16.msra.mxu0 %v10959_v35  ;;  %v11043_v35 = vld [vmem:[#allocation3 + $0x728] ss:$24 sps:$4 sm:$0xff]  }
  0xfb   :  { %2716 = vmatpush1.bf16.msra.mxu1 %v10962_v36  ;;  %2676 = vmatprep.subr.bf16.mxu0 %v10967_v37  ;;  %v11046_v36 = vld [vmem:[#allocation3 + $0xa28] ss:$24 sps:$4 sm:$0xff]   ;;  %v11051_v37 = vld [vmem:[#allocation3 + $0x6fc] ss:$24 sps:$4 sm:$0xff]  }
  0xfc   :  { %2717 = vmatprep.subr.bf16.mxu1 %v10970_v39  ;;  %v11054_v39 = vld [vmem:[#allocation3 + $0x9fc] ss:$24 sps:$4 sm:$0xff]  }
  0xfe   :  { %2677 = vmatpush1.bf16.msra.mxu0 %v10965_v40  ;;  %v11049_v40 = vld [vmem:[#allocation3 + $0x6f8] ss:$24 sps:$4 sm:$0xff]  }
  0xff   :  { %2718 = vmatpush1.bf16.msra.mxu1 %v10968_v42  ;;  %2678 = vmatprep.subr.bf16.mxu0 %v10973_v43  ;;  %v11052_v42 = vld [vmem:[#allocation3 + $0x9f8] ss:$24 sps:$4 sm:$0xff]   ;;  %v11057_v43 = vld [vmem:[#allocation3 + $0x6cc] ss:$24 sps:$4 sm:$0xff]  }
 0x100   :  { %2719 = vmatprep.subr.bf16.mxu1 %v10976_v44  ;;  %v11060_v44 = vld [vmem:[#allocation3 + $0x9cc] ss:$24 sps:$4 sm:$0xff]  }
 0x102   :  { %2679 = vmatpush1.bf16.msra.mxu0 %v10971_v45  ;;  %v11055_v45 = vld [vmem:[#allocation3 + $0x6c8] ss:$24 sps:$4 sm:$0xff]  }
 0x103   :  { %2720 = vmatpush1.bf16.msra.mxu1 %v10974_v46  ;;  %2680 = vmatprep.subr.bf16.mxu0 %v10979_v47  ;;  %v11058_v46 = vld [vmem:[#allocation3 + $0x9c8] ss:$24 sps:$4 sm:$0xff]   ;;  %v11063_v47 = vld [vmem:[#allocation3 + $0x69c] ss:$24 sps:$4 sm:$0xff]  }
 0x104   :  { %2721 = vmatprep.subr.bf16.mxu1 %v10982_v48  ;;  %v11066_v48 = vld [vmem:[#allocation3 + $0x99c] ss:$24 sps:$4 sm:$0xff]  }
 0x106   :  { %2681 = vmatpush1.bf16.msra.mxu0 %v10977_v49  ;;  %v11061_v49 = vld [vmem:[#allocation3 + $0x698] ss:$24 sps:$4 sm:$0xff]  }
 0x107   :  { %2722 = vmatpush1.bf16.msra.mxu1 %v10980_v51  ;;  %2682 = vmatprep.subr.bf16.mxu0 %v10985_v52  ;;  %v11064_v51 = vld [vmem:[#allocation3 + $0x998] ss:$24 sps:$4 sm:$0xff]   ;;  %v11069_v52 = vld [vmem:[#allocation3 + $0x66c] ss:$24 sps:$4 sm:$0xff]  }
 0x108   :  { %2723 = vmatprep.subr.bf16.mxu1 %v10988_v54  ;;  %v11072_v54 = vld [vmem:[#allocation3 + $0x96c] ss:$24 sps:$4 sm:$0xff]  }
 0x10a   :  { %2683 = vmatpush1.bf16.msra.mxu0 %v10983_v55  ;;  %v11067_v55 = vld [vmem:[#allocation3 + $0x668] ss:$24 sps:$4 sm:$0xff]  }
 0x10b   :  { %2724 = vmatpush1.bf16.msra.mxu1 %v10986_v56  ;;  %2684 = vmatprep.subr.bf16.mxu0 %v10991_v57  ;;  %v11070_v56 = vld [vmem:[#allocation3 + $0x968] ss:$24 sps:$4 sm:$0xff]   ;;  %v11075_v57 = vld [vmem:[#allocation3 + $0x63c] ss:$24 sps:$4 sm:$0xff]  }
 0x10c   :  { %2725 = vmatprep.subr.bf16.mxu1 %v10994_v58  ;;  %v11078_v58 = vld [vmem:[#allocation3 + $0x93c] ss:$24 sps:$4 sm:$0xff]  }
 0x10e   :  { %2685 = vmatpush2.bf16.msra.mxu0 %v10989_v59  ;;  %v11073_v59 = vld [vmem:[#allocation3 + $0x638] ss:$24 sps:$4 sm:$0xff]  }
 0x10f   :  { %2726 = vmatpush2.bf16.msra.mxu1 %v10992_v60  ;;  %2686 = vmatprep.subr.bf16.mxu0 %v10997_v61  ;;  %v11076_v60 = vld [vmem:[#allocation3 + $0x938] ss:$24 sps:$4 sm:$0xff]   ;;  %v11081_v61 = vld [vmem:[#allocation3 + $0x60c] ss:$24 sps:$4 sm:$0xff]  }
 0x110   :  { %2727 = vmatprep.subr.bf16.mxu1 %v11000_v62  ;;  %v11084_v62 = vld [vmem:[#allocation3 + $0x90c] ss:$24 sps:$4 sm:$0xff]  }
 0x112   :  { %2687 = vmatpush2.bf16.msra.mxu0 %v10995_v63  ;;  %v11079_v63 = vld [vmem:[#allocation3 + $0x608] ss:$24 sps:$4 sm:$0xff]  }
 0x113   :  { %2728 = vmatpush2.bf16.msra.mxu1 %v10998_v0  ;;  %2688 = vmatprep.subr.bf16.mxu0 %v11003_v1  ;;  %v11082_v0 = vld [vmem:[#allocation3 + $0x908] ss:$24 sps:$4 sm:$0xff]   ;;  %v11087_v1 = vld [vmem:[#allocation3 + $0x8dc] ss:$24 sps:$4 sm:$0xff]  }
 0x114   :  { %2729 = vmatprep.subr.bf16.mxu1 %v11006_v2  ;;  %v11090_v2 = vld [vmem:[#allocation3 + $0xbdc] ss:$24 sps:$4 sm:$0xff]  }
 0x116   :  { %2689 = vmatpush2.bf16.msra.mxu0 %v11001_v3  ;;  %v11085_v3 = vld [vmem:[#allocation3 + $0x8d8] ss:$24 sps:$4 sm:$0xff]  }
 0x117   :  { %2730 = vmatpush2.bf16.msra.mxu1 %v11004_v4  ;;  %2690 = vmatprep.subr.bf16.mxu0 %v11009_v5  ;;  %v11088_v4 = vld [vmem:[#allocation3 + $0xbd8] ss:$24 sps:$4 sm:$0xff]   ;;  %v11093_v5 = vld [vmem:[#allocation3 + $0x8ac] ss:$24 sps:$4 sm:$0xff]  }
 0x118   :  { %2731 = vmatprep.subr.bf16.mxu1 %v11012_v6  ;;  %v11096_v6 = vld [vmem:[#allocation3 + $0xbac] ss:$24 sps:$4 sm:$0xff]  }
 0x11a   :  { %2691 = vmatpush2.bf16.msra.mxu0 %v11007_v7  ;;  %v11091_v7 = vld [vmem:[#allocation3 + $0x8a8] ss:$24 sps:$4 sm:$0xff]  }
 0x11b   :  { %2732 = vmatpush2.bf16.msra.mxu1 %v11010_v8  ;;  %2692 = vmatprep.subr.bf16.mxu0 %v11015_v11  ;;  %v11094_v8 = vld [vmem:[#allocation3 + $0xba8] ss:$24 sps:$4 sm:$0xff]   ;;  %v11099_v11 = vld [vmem:[#allocation3 + $0x87c] ss:$24 sps:$4 sm:$0xff]  }
 0x11c   :  { %2733 = vmatprep.subr.bf16.mxu1 %v11018_v12  ;;  %v11102_v12 = vld [vmem:[#allocation3 + $0xb7c] ss:$24 sps:$4 sm:$0xff]  }
 0x11e   :  { %2693 = vmatpush2.bf16.msra.mxu0 %v11013_v13  ;;  %v11097_v13 = vld [vmem:[#allocation3 + $0x878] ss:$24 sps:$4 sm:$0xff]  }
 0x11f   :  { %2734 = vmatpush2.bf16.msra.mxu1 %v11016_v14  ;;  %2694 = vmatprep.subr.bf16.mxu0 %v11021_v15  ;;  %v11100_v14 = vld [vmem:[#allocation3 + $0xb78] ss:$24 sps:$4 sm:$0xff]   ;;  %v11105_v15 = vld [vmem:[#allocation3 + $0x84c] ss:$24 sps:$4 sm:$0xff]  }
 0x120   :  { %2735 = vmatprep.subr.bf16.mxu1 %v11024_v16  ;;  %v11108_v16 = vld [vmem:[#allocation3 + $0xb4c] ss:$24 sps:$4 sm:$0xff]  }
 0x122   :  { %2695 = vmatpush2.bf16.msra.mxu0 %v11019_v17  ;;  %v11103_v17 = vld [vmem:[#allocation3 + $0x848] ss:$24 sps:$4 sm:$0xff]  }
 0x123   :  { %2736 = vmatpush2.bf16.msra.mxu1 %v11022_v18  ;;  %2696 = vmatprep.subr.bf16.mxu0 %v11027_v19  ;;  %v11106_v18 = vld [vmem:[#allocation3 + $0xb48] ss:$24 sps:$4 sm:$0xff]   ;;  %v11111_v19 = vld [vmem:[#allocation3 + $0x81c] ss:$24 sps:$4 sm:$0xff]  }
 0x124   :  { %2737 = vmatprep.subr.bf16.mxu1 %v11030_v20  ;;  %v11114_v20 = vld [vmem:[#allocation3 + $0xb1c] ss:$24 sps:$4 sm:$0xff]  }
 0x126   :  { %2697 = vmatpush2.bf16.msra.mxu0 %v11025_v23  ;;  %v11109_v23 = vld [vmem:[#allocation3 + $0x818] ss:$24 sps:$4 sm:$0xff]  }
 0x127   :  { %2738 = vmatpush2.bf16.msra.mxu1 %v11028_v24  ;;  %2698 = vmatprep.subr.bf16.mxu0 %v11033_v25  ;;  %v11112_v24 = vld [vmem:[#allocation3 + $0xb18] ss:$24 sps:$4 sm:$0xff]   ;;  %v11117_v25 = vld [vmem:[#allocation3 + $0x7ec] ss:$24 sps:$4 sm:$0xff]  }
 0x128   :  { %2739 = vmatprep.subr.bf16.mxu1 %v11036_v26  ;;  %v11120_v26 = vld [vmem:[#allocation3 + $0xaec] ss:$24 sps:$4 sm:$0xff]  }
 0x12a   :  { %2699 = vmatpush2.bf16.msra.mxu0 %v11031_v27  ;;  %v11115_v27 = vld [vmem:[#allocation3 + $0x7e8] ss:$24 sps:$4 sm:$0xff]  }
 0x12b   :  { %2740 = vmatpush2.bf16.msra.mxu1 %v11034_v28  ;;  %2750 = vmatprep.subr.bf16.mxu0 %v11039_v29  ;;  %v11118_v28 = vld [vmem:[#allocation3 + $0xae8] ss:$24 sps:$4 sm:$0xff]   ;;  %v554_v29 = vlaneseq }
 0x12c   :  { %2791 = vmatprep.subr.bf16.mxu1 %v11042_v30  ;;  %v11123_v30 = vld [vmem:[#allocation3 + $0x7bc] ss:$24 sps:$4 sm:$0xff]  }
 0x12d   :  { %2701 = vmatmul.mubr.bf16.vlgmr.msra.gmra.mxu0 %v12945_v9 }
 0x12e   :  { %2742 = vmatmul.mubr.bf16.vlgmr.msra.gmra.mxu1 %v12947_v10  ;;  %2751 = vmatpush1.bf16.msra.mxu0 %v11037_v31  ;;  %v11126_v31 = vld [vmem:[#allocation3 + $0xabc] ss:$24 sps:$4 sm:$0xff]  }
 0x12f   :  { %2792 = vmatpush1.bf16.msra.mxu1 %v11040_v32  ;;  %2752 = vmatprep.subr.bf16.mxu0 %v11045_v33  ;;  %v11121_v32 = vld [vmem:[#allocation3 + $0x7b8] ss:$24 sps:$4 sm:$0xff]  }
 0x130   :  { %2793 = vmatprep.subr.bf16.mxu1 %v11048_v34  ;;  %2782 = vmatprep.mubr.bf16.mxu0 %v12954_v38  ;;  %v11124_v33 = vld [vmem:[#allocation3 + $0xab8] ss:$24 sps:$4 sm:$0xff]   ;;  %v12981_v34 = vshrl.u32 %v554_v29, 7 }
 0x131   :  { %2823 = vmatprep.mubr.bf16.mxu1 %v12959_v41  ;;  %v11178_v29 = vld [vmem:[#allocation3 + $0x310] ss:$24 sps:$4 sm:$0xff]  }
 0x132   :  { %2753 = vmatpush1.bf16.msra.mxu0 %v11043_v35  ;;  %v11129_v35 = vld [vmem:[#allocation3 + $0x78c] ss:$24 sps:$4 sm:$0xff]  }
 0x133   :  { %2794 = vmatpush1.bf16.msra.mxu1 %v11046_v36  ;;  %2754 = vmatprep.subr.bf16.mxu0 %v11051_v37  ;;  %v11132_v36 = vld [vmem:[#allocation3 + $0xa8c] ss:$24 sps:$4 sm:$0xff]   ;;  %v11127_v37 = vld [vmem:[#allocation3 + $0x788] ss:$24 sps:$4 sm:$0xff]  }
 0x134   :  { %2795 = vmatprep.subr.bf16.mxu1 %v11054_v39  ;;  %v11130_v39 = vld [vmem:[#allocation3 + $0xa88] ss:$24 sps:$4 sm:$0xff]  }
 0x136   :  { %2755 = vmatpush1.bf16.msra.mxu0 %v11049_v40  ;;  %v552_v40 = vld [vmem:[#allocation5] sm:$0x3f] }
 0x137   :  { %2796 = vmatpush1.bf16.msra.mxu1 %v11052_v42  ;;  %2756 = vmatprep.subr.bf16.mxu0 %v11057_v43  ;;  %v12984_v42 = vsub.s32 0, %v12981_v34  ;;  %v11135_v43 = vld [vmem:[#allocation3 + $0x164] ss:$24 sps:$4 sm:$0xff]  }
 0x138   :  { %2797 = vmatprep.subr.bf16.mxu1 %v11060_v44  ;;  %v11138_v44 = vld [vmem:[#allocation3 + $0x464] ss:$24 sps:$4 sm:$0xff]  }
 0x13a   :  { %2757 = vmatpush1.bf16.msra.mxu0 %v11055_v45  ;;  %v12987_v45 = vsub.s32 1, %v12981_v34 }
 0x13b   :  { %2798 = vmatpush1.bf16.msra.mxu1 %v11058_v46  ;;  %2758 = vmatprep.subr.bf16.mxu0 %v11063_v47  ;;  %v11133_v46 = vld [vmem:[#allocation3 + $0x160] ss:$24 sps:$4 sm:$0xff]   ;;  %v557_v47 = vrot.slane %v552_v40, %v12984_v42 }
 0x13c   :  { %2799 = vmatprep.subr.bf16.mxu1 %v11066_v48  ;;  %v11136_v48 = vld [vmem:[#allocation3 + $0x460] ss:$24 sps:$4 sm:$0xff]  }
 0x13e   :  { %2759 = vmatpush1.bf16.msra.mxu0 %v11061_v49  ;;  %v11141_v49 = vld [vmem:[#allocation3 + $0x134] ss:$24 sps:$4 sm:$0xff]  }
 0x13f   :  { %2800 = vmatpush1.bf16.msra.mxu1 %v11064_v51  ;;  %2760 = vmatprep.subr.bf16.mxu0 %v11069_v52  ;;  %v11144_v51 = vld [vmem:[#allocation3 + $0x434] ss:$24 sps:$4 sm:$0xff]   ;;  %v561_v52 = vrot.slane %v552_v40, %v12987_v45  ;;  %v11195_v40 = vld [vmem:[#allocation3 + $0x284] ss:$24 sps:$4 sm:$0xff]  }
 0x140   :  { %2801 = vmatprep.subr.bf16.mxu1 %v11072_v54  ;;  %v11139_v54 = vld [vmem:[#allocation3 + $0x130] ss:$24 sps:$4 sm:$0xff]  }
 0x142   :  { %2761 = vmatpush1.bf16.msra.mxu0 %v11067_v55 }
 0x143   :  { %2802 = vmatpush1.bf16.msra.mxu1 %v11070_v56  ;;  %2762 = vmatprep.subr.bf16.mxu0 %v11075_v57  ;;  %v11142_v57 = vld [vmem:[#allocation3 + $0x430] ss:$24 sps:$4 sm:$0xff]  }
 0x144   :  { %2803 = vmatprep.subr.bf16.mxu1 %v11078_v58 }
 0x146   :  { %2763 = vmatpush1.bf16.msra.mxu0 %v11073_v59  ;;  %v11147_v59 = vld [vmem:[#allocation3 + $0x104] ss:$24 sps:$4 sm:$0xff]  }
 0x147   :  { %2804 = vmatpush1.bf16.msra.mxu1 %v11076_v60  ;;  %2764 = vmatprep.subr.bf16.mxu0 %v11081_v61 }
 0x148   :  { %2805 = vmatprep.subr.bf16.mxu1 %v11084_v62  ;;  %v11150_v62 = vld [vmem:[#allocation3 + $0x404] ss:$24 sps:$4 sm:$0xff]  }
 0x14a   :  { %2765 = vmatpush1.bf16.msra.mxu0 %v11079_v63 }
 0x14b   :  { %2806 = vmatpush1.bf16.msra.mxu1 %v11082_v0  ;;  %2766 = vmatprep.subr.bf16.mxu0 %v11087_v1  ;;  %v11145_v1 = vld [vmem:[#allocation3 + $0x100] ss:$24 sps:$4 sm:$0xff]  }
 0x14c   :  { %2807 = vmatprep.subr.bf16.mxu1 %v11090_v2  ;;  %v11148_v2 = vld [vmem:[#allocation3 + $0x400] ss:$24 sps:$4 sm:$0xff]  }
 0x14e   :  { %2767 = vmatpush2.bf16.msra.mxu0 %v11085_v3 }
 0x14f   :  { %2808 = vmatpush2.bf16.msra.mxu1 %v11088_v4  ;;  %2768 = vmatprep.subr.bf16.mxu0 %v11093_v5 }
 0x150   :  { %2809 = vmatprep.subr.bf16.mxu1 %v11096_v6 }
 0x152   :  { %2769 = vmatpush2.bf16.msra.mxu0 %v11091_v7 }
 0x153   :  { %2810 = vmatpush2.bf16.msra.mxu1 %v11094_v8  ;;  %2770 = vmatprep.subr.bf16.mxu0 %v11099_v11  ;;  %v11153_v8 = vld [vmem:[#allocation3 + $0xd4] ss:$24 sps:$4 sm:$0xff]  }
 0x154   :  { %2811 = vmatprep.subr.bf16.mxu1 %v11102_v12  ;;  %v11156_v11 = vld [vmem:[#allocation3 + $0x3d4] ss:$24 sps:$4 sm:$0xff]   ;;  %v11151_v12 = vld [vmem:[#allocation3 + $0xd0] ss:$24 sps:$4 sm:$0xff]  }
 0x156   :  { %2771 = vmatpush2.bf16.msra.mxu0 %v11097_v13  ;;  %v11154_v13 = vld [vmem:[#allocation3 + $0x3d0] ss:$24 sps:$4 sm:$0xff]  }
 0x157   :  { %2812 = vmatpush2.bf16.msra.mxu1 %v11100_v14  ;;  %2772 = vmatprep.subr.bf16.mxu0 %v11105_v15  ;;  %v11159_v14 = vld [vmem:[#allocation3 + $0xa4] ss:$24 sps:$4 sm:$0xff]   ;;  %v11160_v15 = vld [vmem:[#allocation3 + $0x3a0] ss:$24 sps:$4 sm:$0xff]  }
 0x158   :  { %2813 = vmatprep.subr.bf16.mxu1 %v11108_v16  ;;  %v11165_v16 = vld [vmem:[#allocation3 + $0x74] ss:$24 sps:$4 sm:$0xff]  }
 0x15a   :  { %2773 = vmatpush2.bf16.msra.mxu0 %v11103_v17  ;;  %v11168_v17 = vld [vmem:[#allocation3 + $0x374] ss:$24 sps:$4 sm:$0xff]  }
 0x15b   :  { %2814 = vmatpush2.bf16.msra.mxu1 %v11106_v18  ;;  %2774 = vmatprep.subr.bf16.mxu0 %v11111_v19  ;;  %v11163_v18 = vld [vmem:[#allocation3 + $0x70] ss:$24 sps:$4 sm:$0xff]  }
 0x15c   :  { %2815 = vmatprep.subr.bf16.mxu1 %v11114_v20  ;;  %v11166_v19 = vld [vmem:[#allocation3 + $0x370] ss:$24 sps:$4 sm:$0xff]   ;;  %v11171_v20 = vld [vmem:[#allocation3 + $0x44] ss:$24 sps:$4 sm:$0xff]  }
 0x15e   :  { %2775 = vmatpush2.bf16.msra.mxu0 %v11109_v23  ;;  %v11174_v23 = vld [vmem:[#allocation3 + $0x344] ss:$24 sps:$4 sm:$0xff]  }
 0x15f   :  { %2816 = vmatpush2.bf16.msra.mxu1 %v11112_v24  ;;  %2776 = vmatprep.subr.bf16.mxu0 %v11117_v25  ;;  %v11169_v24 = vld [vmem:[#allocation3 + $0x40] ss:$24 sps:$4 sm:$0xff]  }
 0x160   :  { %2817 = vmatprep.subr.bf16.mxu1 %v11120_v26  ;;  %v11172_v25 = vld [vmem:[#allocation3 + $0x340] ss:$24 sps:$4 sm:$0xff]   ;;  %v11177_v26 = vld [vmem:[#allocation3 + $0x14] ss:$24 sps:$4 sm:$0xff]  }
 0x162   :  { %2777 = vmatpush2.bf16.msra.mxu0 %v11115_v27  ;;  %v11180_v27 = vld [vmem:[#allocation3 + $0x314] ss:$24 sps:$4 sm:$0xff]  }
 0x163   :  { %2818 = vmatpush2.bf16.msra.mxu1 %v11118_v28  ;;  %2778 = vmatprep.subr.bf16.mxu0 %v11123_v30  ;;  %v11175_v28 = vld [vmem:[#allocation3 + $0x10] ss:$24 sps:$4 sm:$0xff]   ;;  %v11183_v30 = vld [vmem:[#allocation3 + $0x2e4] ss:$24 sps:$4 sm:$0xff]  }
 0x164   :  { %2819 = vmatprep.subr.bf16.mxu1 %v11126_v31  ;;  %v11186_v31 = vld [vmem:[#allocation3 + $0x5e4] ss:$24 sps:$4 sm:$0xff]  }
 0x166   :  { %2779 = vmatpush2.bf16.msra.mxu0 %v11121_v32  ;;  %v11181_v32 = vld [vmem:[#allocation3 + $0x2e0] ss:$24 sps:$4 sm:$0xff]  }
 0x167   :  { %2820 = vmatpush2.bf16.msra.mxu1 %v11124_v33  ;;  %2780 = vmatprep.subr.bf16.mxu0 %v11129_v35  ;;  %v11184_v33 = vld [vmem:[#allocation3 + $0x5e0] ss:$24 sps:$4 sm:$0xff]   ;;  %v11189_v35 = vld [vmem:[#allocation3 + $0x2b4] ss:$24 sps:$4 sm:$0xff]  }
 0x168   :  { %2821 = vmatprep.subr.bf16.mxu1 %v11132_v36  ;;  %v11192_v36 = vld [vmem:[#allocation3 + $0x5b4] ss:$24 sps:$4 sm:$0xff]  }
 0x16a   :  { %2781 = vmatpush2.bf16.msra.mxu0 %v11127_v37  ;;  %v11187_v37 = vld [vmem:[#allocation3 + $0x2b0] ss:$24 sps:$4 sm:$0xff]  }
 0x16b   :  { %2822 = vmatpush2.bf16.msra.mxu1 %v11130_v39  ;;  %2832 = vmatprep.subr.bf16.mxu0 %v11135_v43  ;;  %v11190_v39 = vld [vmem:[#allocation3 + $0x5b0] ss:$24 sps:$4 sm:$0xff]   ;;  %v11198_v43 = vld [vmem:[#allocation3 + $0x584] ss:$24 sps:$4 sm:$0xff]  }
 0x16c   :  { %2873 = vmatprep.subr.bf16.mxu1 %v11138_v44  ;;  %v11193_v44 = vld [vmem:[#allocation3 + $0x280] ss:$24 sps:$4 sm:$0xff]  }
 0x16d   :  { %v2538_v55 = vpop.f32.mrf.mxu0  ;;  %2783 = vmatmul.mubr.bf16.vlgmr.msra.gmra.mxu0 %v12969_v21 }
 0x16e   :  { %v2579_v56 = vpop.f32.mrf.mxu1  ;;  %2824 = vmatmul.mubr.bf16.vlgmr.msra.gmra.mxu1 %v12971_v22  ;;  %v2539_v58 = vadd.f32 %v2538_v55, %v557_v47  ;;  %2833 = vmatpush1.bf16.msra.mxu0 %v11133_v46  ;;  %v11196_v46 = vld [vmem:[#allocation3 + $0x580] ss:$24 sps:$4 sm:$0xff]   ;;  %v11201_v47 = vld [vmem:[#allocation3 + $0x254] ss:$24 sps:$4 sm:$0xff]  }
 0x16f   :  { %2874 = vmatpush1.bf16.msra.mxu1 %v11136_v48  ;;  %v2540_v60 = vpop.f32.mrf.mxu0  ;;  %2834 = vmatprep.subr.bf16.mxu0 %v11141_v49  ;;  %v11204_v48 = vld [vmem:[#allocation3 + $0x554] ss:$24 sps:$4 sm:$0xff]   ;;  %v11199_v49 = vld [vmem:[#allocation3 + $0x250] ss:$24 sps:$4 sm:$0xff]   ;;  %v11205_v55 = vld [vmem:[#allocation3 + $0x220] ss:$24 sps:$4 sm:$0xff]  }
 0x170   :  { %v2581_v61 = vpop.f32.mrf.mxu1  ;;  %2875 = vmatprep.subr.bf16.mxu1 %v11144_v51  ;;  %v12993_v63 = vadd.f32 %v2579_v56, %v2539_v58  ;;  %v2541_v0 = vadd.f32 %v2540_v60, %v561_v52  ;;  %2864 = vmatprep.mubr.bf16.mxu0 %v12930_v50  ;;  %v11162_v50 = vld [vmem:[#allocation3 + $0x3a4] ss:$24 sps:$4 sm:$0xff]   ;;  %v11202_v51 = vld [vmem:[#allocation3 + $0x550] ss:$24 sps:$4 sm:$0xff]   ;;  %v11208_v56 = vld [vmem:[#allocation3 + $0x520] ss:$24 sps:$4 sm:$0xff]  }
 0x171   :  { %2905 = vmatprep.mubr.bf16.mxu1 %v12935_v53  ;;  %v2542_v3 = vpop.f32.mrf.mxu0  ;;  %v11157_v53 = vld [vmem:[#allocation3 + $0xa0] ss:$24 sps:$4 sm:$0xff]   ;;  %v11207_v52 = vld [vmem:[#allocation3 + $0x224] ss:$24 sps:$4 sm:$0xff]   ;;  %v11216_v58 = vld [vmem:[#allocation3 + $0x4f4] ss:$24 sps:$4 sm:$0xff]  }
 0x172   :  { %v2583_v4 = vpop.f32.mrf.mxu1  ;;  %v12997_v5 = vadd.f32 %v2581_v61, %v2541_v0  ;;  %2835 = vmatpush1.bf16.msra.mxu0 %v11139_v54  ;;  %v11210_v54 = vld [vmem:[#allocation3 + $0x524] ss:$24 sps:$4 sm:$0xff]   ;;  %v11214_v60 = vld [vmem:[#allocation3 + $0x4f0] ss:$24 sps:$4 sm:$0xff]   ;;  %v11217_v0 = vld [vmem:[#allocation3 + $0x1c0] ss:$24 sps:$4 sm:$0xff]  }
 0x173   :  { %2876 = vmatpush1.bf16.msra.mxu1 %v11142_v57  ;;  %v2543_v6 = vpop.f32.mrf.mxu0  ;;  %2836 = vmatprep.subr.bf16.mxu0 %v11147_v59  ;;  %v11213_v57 = vld [vmem:[#allocation3 + $0x1f4] ss:$24 sps:$4 sm:$0xff]   ;;  %v11211_v59 = vld [vmem:[#allocation3 + $0x1f0] ss:$24 sps:$4 sm:$0xff]   ;;  %v11219_v61 = vld [vmem:[#allocation3 + $0x1c4] ss:$24 sps:$4 sm:$0xff]  }
 0x174   :  { %v2584_v7 = vpop.f32.mrf.mxu1  ;;  %2877 = vmatprep.subr.bf16.mxu1 %v11150_v62  ;;  %v11222_v62 = vld [vmem:[#allocation3 + $0x4c4] ss:$24 sps:$4 sm:$0xff]   ;;  %v11228_v3 = vld [vmem:[#allocation3 + $0x494] ss:$24 sps:$4 sm:$0xff]   ;;  %v11223_v4 = vld [vmem:[#allocation3 + $0x190] ss:$24 sps:$4 sm:$0xff]  }
 0x175   :  { %v11226_v6 = vld [vmem:[#allocation3 + $0x490] ss:$24 sps:$4 sm:$0xff]   ;;  %v11231_v7 = vld [vmem:[#allocation3 + $0x764] ss:$24 sps:$4 sm:$0xff]  }
 0x176   :  { %2837 = vmatpush1.bf16.msra.mxu0 %v11145_v1  ;;  %v11220_v1 = vld [vmem:[#allocation3 + $0x4c0] ss:$24 sps:$4 sm:$0xff]  }
 0x177   :  { %2878 = vmatpush1.bf16.msra.mxu1 %v11148_v2  ;;  %2838 = vmatprep.subr.bf16.mxu0 %v11153_v8  ;;  %v11225_v2 = vld [vmem:[#allocation3 + $0x194] ss:$24 sps:$4 sm:$0xff]   ;;  %v11234_v8 = vld [vmem:[#allocation3 + $0xa64] ss:$24 sps:$4 sm:$0xff]  }
 0x178   :  { %2879 = vmatprep.subr.bf16.mxu1 %v11156_v11  ;;  %v11229_v11 = vld [vmem:[#allocation3 + $0x760] ss:$24 sps:$4 sm:$0xff]  }
 0x17a   :  { %2839 = vmatpush1.bf16.msra.mxu0 %v11151_v12  ;;  %v11232_v12 = vld [vmem:[#allocation3 + $0xa60] ss:$24 sps:$4 sm:$0xff]  }
 0x17b   :  { %2880 = vmatpush1.bf16.msra.mxu1 %v11154_v13  ;;  %2840 = vmatprep.subr.bf16.mxu0 %v11159_v14  ;;  %v11237_v13 = vld [vmem:[#allocation3 + $0x734] ss:$24 sps:$4 sm:$0xff]  }
 0x17c   :  { %2881 = vmatprep.subr.bf16.mxu1 %v11162_v50  ;;  %v11240_v14 = vld [vmem:[#allocation3 + $0xa34] ss:$24 sps:$4 sm:$0xff]   ;;  %v11235_v50 = vld [vmem:[#allocation3 + $0x730] ss:$24 sps:$4 sm:$0xff]  }
 0x17e   :  { %2841 = vmatpush1.bf16.msra.mxu0 %v11157_v53  ;;  %v11238_v53 = vld [vmem:[#allocation3 + $0xa30] ss:$24 sps:$4 sm:$0xff]  }
 0x17f   :  { %2882 = vmatpush1.bf16.msra.mxu1 %v11160_v15  ;;  %2842 = vmatprep.subr.bf16.mxu0 %v11165_v16 }
 0x180   :  { %2883 = vmatprep.subr.bf16.mxu1 %v11168_v17 }
 0x182   :  { %2843 = vmatpush1.bf16.msra.mxu0 %v11163_v18  ;;  %v11243_v18 = vld [vmem:[#allocation3 + $0x704] ss:$24 sps:$4 sm:$0xff]  }
 0x183   :  { %2884 = vmatpush1.bf16.msra.mxu1 %v11166_v19  ;;  %2844 = vmatprep.subr.bf16.mxu0 %v11171_v20 }
 0x184   :  { %2885 = vmatprep.subr.bf16.mxu1 %v11174_v23  ;;  %v11246_v23 = vld [vmem:[#allocation3 + $0xa04] ss:$24 sps:$4 sm:$0xff]  }
 0x186   :  { %2845 = vmatpush1.bf16.msra.mxu0 %v11169_v24 }
 0x187   :  { %2886 = vmatpush1.bf16.msra.mxu1 %v11172_v25  ;;  %2846 = vmatprep.subr.bf16.mxu0 %v11177_v26  ;;  %v11241_v25 = vld [vmem:[#allocation3 + $0x700] ss:$24 sps:$4 sm:$0xff]  }
 0x188   :  { %2887 = vmatprep.subr.bf16.mxu1 %v11180_v27  ;;  %v11244_v26 = vld [vmem:[#allocation3 + $0xa00] ss:$24 sps:$4 sm:$0xff]  }
 0x18a   :  { %2847 = vmatpush1.bf16.msra.mxu0 %v11175_v28 }
 0x18b   :  { %2888 = vmatpush1.bf16.msra.mxu1 %v11178_v29  ;;  %2848 = vmatprep.subr.bf16.mxu0 %v11183_v30  ;;  %v11252_v29 = vld [vmem:[#allocation3 + $0x9d4] ss:$24 sps:$4 sm:$0xff]   ;;  %v11247_v30 = vld [vmem:[#allocation3 + $0x6d0] ss:$24 sps:$4 sm:$0xff]  }
 0x18c   :  { %2889 = vmatprep.subr.bf16.mxu1 %v11186_v31  ;;  %v11250_v31 = vld [vmem:[#allocation3 + $0x9d0] ss:$24 sps:$4 sm:$0xff]  }
 0x18e   :  { %2849 = vmatpush2.bf16.msra.mxu0 %v11181_v32  ;;  %v11255_v32 = vld [vmem:[#allocation3 + $0x6a4] ss:$24 sps:$4 sm:$0xff]  }
 0x18f   :  { %2890 = vmatpush2.bf16.msra.mxu1 %v11184_v33  ;;  %2850 = vmatprep.subr.bf16.mxu0 %v11189_v35  ;;  %v11253_v33 = vld [vmem:[#allocation3 + $0x6a0] ss:$24 sps:$4 sm:$0xff]   ;;  %v11261_v35 = vld [vmem:[#allocation3 + $0x674] ss:$24 sps:$4 sm:$0xff]  }
 0x190   :  { %2891 = vmatprep.subr.bf16.mxu1 %v11192_v36  ;;  %v11264_v36 = vld [vmem:[#allocation3 + $0x974] ss:$24 sps:$4 sm:$0xff]  }
 0x192   :  { %2851 = vmatpush2.bf16.msra.mxu0 %v11187_v37  ;;  %v11259_v37 = vld [vmem:[#allocation3 + $0x670] ss:$24 sps:$4 sm:$0xff]  }
 0x193   :  { %2892 = vmatpush2.bf16.msra.mxu1 %v11190_v39  ;;  %2852 = vmatprep.subr.bf16.mxu0 %v11195_v40  ;;  %v11262_v39 = vld [vmem:[#allocation3 + $0x970] ss:$24 sps:$4 sm:$0xff]   ;;  %v11267_v40 = vld [vmem:[#allocation3 + $0x644] ss:$24 sps:$4 sm:$0xff]  }
 0x194   :  { %2893 = vmatprep.subr.bf16.mxu1 %v11198_v43  ;;  %v11270_v43 = vld [vmem:[#allocation3 + $0x944] ss:$24 sps:$4 sm:$0xff]  }
 0x196   :  { %2853 = vmatpush2.bf16.msra.mxu0 %v11193_v44  ;;  %v11265_v44 = vld [vmem:[#allocation3 + $0x640] ss:$24 sps:$4 sm:$0xff]  }
 0x197   :  { %2894 = vmatpush2.bf16.msra.mxu1 %v11196_v46  ;;  %2854 = vmatprep.subr.bf16.mxu0 %v11201_v47  ;;  %v11268_v46 = vld [vmem:[#allocation3 + $0x940] ss:$24 sps:$4 sm:$0xff]   ;;  %v11273_v47 = vld [vmem:[#allocation3 + $0x614] ss:$24 sps:$4 sm:$0xff]  }
 0x198   :  { %2895 = vmatprep.subr.bf16.mxu1 %v11204_v48  ;;  %v11276_v48 = vld [vmem:[#allocation3 + $0x914] ss:$24 sps:$4 sm:$0xff]  }
 0x19a   :  { %2855 = vmatpush2.bf16.msra.mxu0 %v11199_v49  ;;  %v11271_v49 = vld [vmem:[#allocation3 + $0x610] ss:$24 sps:$4 sm:$0xff]  }
 0x19b   :  { %2896 = vmatpush2.bf16.msra.mxu1 %v11202_v51  ;;  %2856 = vmatprep.subr.bf16.mxu0 %v11207_v52  ;;  %v11274_v51 = vld [vmem:[#allocation3 + $0x910] ss:$24 sps:$4 sm:$0xff]   ;;  %v11279_v52 = vld [vmem:[#allocation3 + $0x8e4] ss:$24 sps:$4 sm:$0xff]  }
 0x19c   :  { %2897 = vmatprep.subr.bf16.mxu1 %v11210_v54  ;;  %v11282_v54 = vld [vmem:[#allocation3 + $0xbe4] ss:$24 sps:$4 sm:$0xff]  }
 0x19e   :  { %2857 = vmatpush2.bf16.msra.mxu0 %v11205_v55  ;;  %v11277_v55 = vld [vmem:[#allocation3 + $0x8e0] ss:$24 sps:$4 sm:$0xff]  }
 0x19f   :  { %2898 = vmatpush2.bf16.msra.mxu1 %v11208_v56  ;;  %2858 = vmatprep.subr.bf16.mxu0 %v11213_v57  ;;  %v11280_v56 = vld [vmem:[#allocation3 + $0xbe0] ss:$24 sps:$4 sm:$0xff]   ;;  %v11285_v57 = vld [vmem:[#allocation3 + $0x8b4] ss:$24 sps:$4 sm:$0xff]  }
 0x1a0   :  { %2899 = vmatprep.subr.bf16.mxu1 %v11216_v58  ;;  %v11288_v58 = vld [vmem:[#allocation3 + $0xbb4] ss:$24 sps:$4 sm:$0xff]  }
 0x1a2   :  { %2859 = vmatpush2.bf16.msra.mxu0 %v11211_v59  ;;  %v11283_v59 = vld [vmem:[#allocation3 + $0x8b0] ss:$24 sps:$4 sm:$0xff]  }
 0x1a3   :  { %2900 = vmatpush2.bf16.msra.mxu1 %v11214_v60  ;;  %2860 = vmatprep.subr.bf16.mxu0 %v11219_v61  ;;  %v11286_v60 = vld [vmem:[#allocation3 + $0xbb0] ss:$24 sps:$4 sm:$0xff]   ;;  %v11291_v61 = vld [vmem:[#allocation3 + $0x884] ss:$24 sps:$4 sm:$0xff]  }
 0x1a4   :  { %2901 = vmatprep.subr.bf16.mxu1 %v11222_v62  ;;  %v11294_v62 = vld [vmem:[#allocation3 + $0xb84] ss:$24 sps:$4 sm:$0xff]  }
 0x1a6   :  { %2861 = vmatpush2.bf16.msra.mxu0 %v11217_v0  ;;  %v11289_v0 = vld [vmem:[#allocation3 + $0x880] ss:$24 sps:$4 sm:$0xff]  }
 0x1a7   :  { %2902 = vmatpush2.bf16.msra.mxu1 %v11220_v1  ;;  %2862 = vmatprep.subr.bf16.mxu0 %v11225_v2  ;;  %v11292_v1 = vld [vmem:[#allocation3 + $0xb80] ss:$24 sps:$4 sm:$0xff]   ;;  %v11297_v2 = vld [vmem:[#allocation3 + $0x854] ss:$24 sps:$4 sm:$0xff]  }
 0x1a8   :  { %2903 = vmatprep.subr.bf16.mxu1 %v11228_v3  ;;  %v11300_v3 = vld [vmem:[#allocation3 + $0xb54] ss:$24 sps:$4 sm:$0xff]  }
 0x1aa   :  { %2863 = vmatpush2.bf16.msra.mxu0 %v11223_v4  ;;  %v11295_v4 = vld [vmem:[#allocation3 + $0x850] ss:$24 sps:$4 sm:$0xff]  }
 0x1ab   :  { %2904 = vmatpush2.bf16.msra.mxu1 %v11226_v6  ;;  %2914 = vmatprep.subr.bf16.mxu0 %v11231_v7  ;;  %v11298_v6 = vld [vmem:[#allocation3 + $0xb50] ss:$24 sps:$4 sm:$0xff]   ;;  %v11303_v7 = vld [vmem:[#allocation3 + $0x824] ss:$24 sps:$4 sm:$0xff]  }
 0x1ac   :  { %2955 = vmatprep.subr.bf16.mxu1 %v11234_v8  ;;  %v11306_v8 = vld [vmem:[#allocation3 + $0xb24] ss:$24 sps:$4 sm:$0xff]  }
 0x1ad   :  { %v2620_v15 = vpop.f32.mrf.mxu0  ;;  %2865 = vmatmul.mubr.bf16.vlgmr.msra.gmra.mxu0 %v12945_v9 }
 0x1ae   :  { %v2661_v16 = vpop.f32.mrf.mxu1  ;;  %2906 = vmatmul.mubr.bf16.vlgmr.msra.gmra.mxu1 %v12947_v10  ;;  %v2621_v17 = vadd.f32 %v2620_v15, %v12993_v63  ;;  %2915 = vmatpush1.bf16.msra.mxu0 %v11229_v11  ;;  %v11249_v63 = vld [vmem:[#allocation3 + $0x6d4] ss:$24 sps:$4 sm:$0xff]   ;;  %v11301_v11 = vld [vmem:[#allocation3 + $0x820] ss:$24 sps:$4 sm:$0xff]   ;;  %v11315_v15 = vld [vmem:[#allocation3 + $0x7c4] ss:$24 sps:$4 sm:$0xff]  }
 0x1af   :  { %2956 = vmatpush1.bf16.msra.mxu1 %v11232_v12  ;;  %v13002_v19 = vpop.f32.mrf.mxu0  ;;  %2916 = vmatprep.subr.bf16.mxu0 %v11237_v13  ;;  %v11304_v12 = vld [vmem:[#allocation3 + $0xb20] ss:$24 sps:$4 sm:$0xff]   ;;  %v11309_v13 = vld [vmem:[#allocation3 + $0x7f4] ss:$24 sps:$4 sm:$0xff]  }
 0x1b0   :  { %v13004_v20 = vpop.f32.mrf.mxu1  ;;  %2957 = vmatprep.subr.bf16.mxu1 %v11240_v14  ;;  %v13006_v24 = vadd.f32 %v2661_v16, %v2621_v17  ;;  %2946 = vmatprep.mubr.bf16.mxu0 %v12954_v38  ;;  %v11258_v38 = vld [vmem:[#allocation3 + $0x9a4] ss:$24 sps:$4 sm:$0xff]   ;;  %v11312_v14 = vld [vmem:[#allocation3 + $0xaf4] ss:$24 sps:$4 sm:$0xff]   ;;  %v2623_v17 = vadd.f32 %v13002_v19, %v12997_v5 }
 0x1b1   :  { %2987 = vmatprep.mubr.bf16.mxu1 %v12959_v41  ;;  %v2624_v9 = vpop.f32.mrf.mxu0  ;;  %v11256_v41 = vld [vmem:[#allocation3 + $0x9a0] ss:$24 sps:$4 sm:$0xff]   ;;  %v11318_v16 = vld [vmem:[#allocation3 + $0xac4] ss:$24 sps:$4 sm:$0xff]  }
 0x1b2   :  { %v2665_v10 = vpop.f32.mrf.mxu1  ;;  %2917 = vmatpush1.bf16.msra.mxu0 %v11235_v50  ;;  %v11307_v50 = vld [vmem:[#allocation3 + $0x7f0] ss:$24 sps:$4 sm:$0xff]   ;;  %v2664_v9 = vadd.f32 %v13004_v20, %v2623_v17 }
 0x1b3   :  { %2958 = vmatpush1.bf16.msra.mxu1 %v11238_v53  ;;  %v2625_v27 = vpop.f32.mrf.mxu0  ;;  %2918 = vmatprep.subr.bf16.mxu0 %v11243_v18  ;;  %v11310_v53 = vld [vmem:[#allocation3 + $0xaf0] ss:$24 sps:$4 sm:$0xff]   ;;  %v11313_v18 = vld [vmem:[#allocation3 + $0x7c0] ss:$24 sps:$4 sm:$0xff]  }
 0x1b4   :  { %v2666_v28 = vpop.f32.mrf.mxu1  ;;  %2959 = vmatprep.subr.bf16.mxu1 %v11246_v23  ;;  %v11316_v23 = vld [vmem:[#allocation3 + $0xac0] ss:$24 sps:$4 sm:$0xff]   ;;  %v11319_v10 = vld [vmem:[#allocation3 + $0x790] ss:$24 sps:$4 sm:$0xff]  }
 0x1b5   :  { %v11327_v27 = vld [vmem:[#allocation7 + $0x154] ss:$24 sps:$4 sm:$0xff]   ;;  %v11325_v5 = vld [vmem:[#allocation7 + $0x150] ss:$24 sps:$4 sm:$0xff]   ;;  %v11330_v19 = vld [vmem:[#allocation7 + $0x124] ss:$24 sps:$4 sm:$0xff]  }
 0x1b6   :  { %2919 = vmatpush1.bf16.msra.mxu0 %v11241_v25  ;;  %v11321_v25 = vld [vmem:[#allocation3 + $0x794] ss:$24 sps:$4 sm:$0xff]   ;;  %v11328_v20 = vld [vmem:[#allocation7 + $0x120] ss:$24 sps:$4 sm:$0xff]  }
 0x1b7   :  { %2960 = vmatpush1.bf16.msra.mxu1 %v11244_v26  ;;  %2920 = vmatprep.subr.bf16.mxu0 %v11249_v63  ;;  %v11324_v26 = vld [vmem:[#allocation3 + $0xa94] ss:$24 sps:$4 sm:$0xff]   ;;  %v11322_v63 = vld [vmem:[#allocation3 + $0xa90] ss:$24 sps:$4 sm:$0xff]  }
 0x1b8   :  { %2961 = vmatprep.subr.bf16.mxu1 %v11252_v29  ;;  %v11336_v28 = vld [vmem:[#allocation7 + $0x454] ss:$24 sps:$4 sm:$0xff]   ;;  %v2997_v29 = vmax.f32 %v2664_v9, 0.0  ;;  %v11379_v17 = vld [vmem:[#allocation7 + $0x270] ss:$24 sps:$4 sm:$0xff]  }
 0x1b9   :  { %v11393_v9 = vld [vmem:[#allocation7 + $0x214] ss:$24 sps:$4 sm:$0xff]  }
 0x1ba   :  { %2921 = vmatpush1.bf16.msra.mxu0 %v11247_v30  ;;  %v11334_v30 = vld [vmem:[#allocation7 + $0x450] ss:$24 sps:$4 sm:$0xff]  }
 0x1bb   :  { %2962 = vmatpush1.bf16.msra.mxu1 %v11250_v31  ;;  %2922 = vmatprep.subr.bf16.mxu0 %v11255_v32  ;;  %v11342_v31 = vld [vmem:[#allocation7 + $0x424] ss:$24 sps:$4 sm:$0xff]   ;;  %v13013_v32 = vpack.c.bf16 %v2997_v29, %v2997_v29  ;;  %v11406_v29 = vld [vmem:[#allocation7 + $0x510] ss:$24 sps:$4 sm:$0xff]  }
 0x1bc   :  { %2963 = vmatprep.subr.bf16.mxu1 %v11258_v38 }
 0x1be   :  { %2923 = vmatpush1.bf16.msra.mxu0 %v11253_v33 }
 0x1bf   :  { %2964 = vmatpush1.bf16.msra.mxu1 %v11256_v41  ;;  %2924 = vmatprep.subr.bf16.mxu0 %v11261_v35  ;;  %v11333_v41 = vld [vmem:[#allocation7 + $0xf4] ss:$24 sps:$4 sm:$0xff]  }
 0x1c0   :  { %2965 = vmatprep.subr.bf16.mxu1 %v11264_v36 }
 0x1c2   :  { %2925 = vmatpush1.bf16.msra.mxu0 %v11259_v37  ;;  %v11340_v37 = vld [vmem:[#allocation7 + $0x420] ss:$24 sps:$4 sm:$0xff]  }
 0x1c3   :  { %2966 = vmatpush1.bf16.msra.mxu1 %v11262_v39  ;;  %2926 = vmatprep.subr.bf16.mxu0 %v11267_v40  ;;  %v11331_v39 = vld [vmem:[#allocation7 + $0xf0] ss:$24 sps:$4 sm:$0xff]   ;;  %v11348_v40 = vld [vmem:[#allocation7 + $0x3f4] ss:$24 sps:$4 sm:$0xff]  }
 0x1c4   :  { %2967 = vmatprep.subr.bf16.mxu1 %v11270_v43 }
 0x1c6   :  { %2927 = vmatpush1.bf16.msra.mxu0 %v11265_v44 }
 0x1c7   :  { %2968 = vmatpush1.bf16.msra.mxu1 %v11268_v46  ;;  %2928 = vmatprep.subr.bf16.mxu0 %v11273_v47  ;;  %v11339_v46 = vld [vmem:[#allocation7 + $0xc4] ss:$24 sps:$4 sm:$0xff]   ;;  %v11346_v47 = vld [vmem:[#allocation7 + $0x3f0] ss:$24 sps:$4 sm:$0xff]  }
 0x1c8   :  { %2969 = vmatprep.subr.bf16.mxu1 %v11276_v48  ;;  %v11354_v48 = vld [vmem:[#allocation7 + $0x3c4] ss:$24 sps:$4 sm:$0xff]  }
 0x1ca   :  { %2929 = vmatpush1.bf16.msra.mxu0 %v11271_v49  ;;  %v11337_v49 = vld [vmem:[#allocation7 + $0xc0] ss:$24 sps:$4 sm:$0xff]  }
 0x1cb   :  { %2970 = vmatpush1.bf16.msra.mxu1 %v11274_v51  ;;  %2930 = vmatprep.subr.bf16.mxu0 %v11279_v52  ;;  %v11345_v51 = vld [vmem:[#allocation7 + $0x94] ss:$24 sps:$4 sm:$0xff]   ;;  %v11352_v52 = vld [vmem:[#allocation7 + $0x3c0] ss:$24 sps:$4 sm:$0xff]  }
 0x1cc   :  { %2971 = vmatprep.subr.bf16.mxu1 %v11282_v54  ;;  %v11360_v54 = vld [vmem:[#allocation7 + $0x394] ss:$24 sps:$4 sm:$0xff]  }
 0x1ce   :  { %2931 = vmatpush2.bf16.msra.mxu0 %v11277_v55  ;;  %v11343_v55 = vld [vmem:[#allocation7 + $0x90] ss:$24 sps:$4 sm:$0xff]  }
 0x1cf   :  { %2972 = vmatpush2.bf16.msra.mxu1 %v11280_v56  ;;  %2932 = vmatprep.subr.bf16.mxu0 %v11285_v57  ;;  %v11351_v56 = vld [vmem:[#allocation7 + $0x64] ss:$24 sps:$4 sm:$0xff]   ;;  %v11358_v57 = vld [vmem:[#allocation7 + $0x390] ss:$24 sps:$4 sm:$0xff]  }
 0x1d0   :  { %2973 = vmatprep.subr.bf16.mxu1 %v11288_v58  ;;  %v11366_v58 = vld [vmem:[#allocation7 + $0x364] ss:$24 sps:$4 sm:$0xff]  }
 0x1d2   :  { %2933 = vmatpush2.bf16.msra.mxu0 %v11283_v59  ;;  %v11349_v59 = vld [vmem:[#allocation7 + $0x60] ss:$24 sps:$4 sm:$0xff]  }
 0x1d3   :  { %2974 = vmatpush2.bf16.msra.mxu1 %v11286_v60  ;;  %2934 = vmatprep.subr.bf16.mxu0 %v11291_v61  ;;  %v11357_v60 = vld [vmem:[#allocation7 + $0x34] ss:$24 sps:$4 sm:$0xff]   ;;  %v11364_v61 = vld [vmem:[#allocation7 + $0x360] ss:$24 sps:$4 sm:$0xff]  }
 0x1d4   :  { %2975 = vmatprep.subr.bf16.mxu1 %v11294_v62  ;;  %v11372_v62 = vld [vmem:[#allocation7 + $0x334] ss:$24 sps:$4 sm:$0xff]  }
 0x1d6   :  { %2935 = vmatpush2.bf16.msra.mxu0 %v11289_v0  ;;  %v11355_v0 = vld [vmem:[#allocation7 + $0x30] ss:$24 sps:$4 sm:$0xff]  }
 0x1d7   :  { %2976 = vmatpush2.bf16.msra.mxu1 %v11292_v1  ;;  %2936 = vmatprep.subr.bf16.mxu0 %v11297_v2  ;;  %v11363_v1 = vld [vmem:[#allocation7 + $0x4] ss:$24 sps:$4 sm:$0xff]   ;;  %v11370_v2 = vld [vmem:[#allocation7 + $0x330] ss:$24 sps:$4 sm:$0xff]  }
 0x1d8   :  { %2977 = vmatprep.subr.bf16.mxu1 %v11300_v3  ;;  %v11378_v3 = vld [vmem:[#allocation7 + $0x304] ss:$24 sps:$4 sm:$0xff]  }
 0x1da   :  { %2937 = vmatpush2.bf16.msra.mxu0 %v11295_v4  ;;  %v11361_v4 = vld [vmem:[#allocation7] ss:$24 sps:$4 sm:$0xff]  }
 0x1db   :  { %2978 = vmatpush2.bf16.msra.mxu1 %v11298_v6  ;;  %2938 = vmatprep.subr.bf16.mxu0 %v11303_v7  ;;  %v11369_v6 = vld [vmem:[#allocation7 + $0x2d4] ss:$24 sps:$4 sm:$0xff]   ;;  %v11376_v7 = vld [vmem:[#allocation7 + $0x300] ss:$24 sps:$4 sm:$0xff]  }
 0x1dc   :  { %2979 = vmatprep.subr.bf16.mxu1 %v11306_v8  ;;  %v11384_v8 = vld [vmem:[#allocation7 + $0x5d4] ss:$24 sps:$4 sm:$0xff]  }
 0x1de   :  { %2939 = vmatpush2.bf16.msra.mxu0 %v11301_v11  ;;  %v11367_v11 = vld [vmem:[#allocation7 + $0x2d0] ss:$24 sps:$4 sm:$0xff]  }
 0x1df   :  { %2980 = vmatpush2.bf16.msra.mxu1 %v11304_v12  ;;  %2940 = vmatprep.subr.bf16.mxu0 %v11309_v13  ;;  %v11375_v12 = vld [vmem:[#allocation7 + $0x2a4] ss:$24 sps:$4 sm:$0xff]   ;;  %v11382_v13 = vld [vmem:[#allocation7 + $0x5d0] ss:$24 sps:$4 sm:$0xff]  }
 0x1e0   :  { %2981 = vmatprep.subr.bf16.mxu1 %v11312_v14  ;;  %v11390_v14 = vld [vmem:[#allocation7 + $0x5a4] ss:$24 sps:$4 sm:$0xff]  }
 0x1e2   :  { %2941 = vmatpush2.bf16.msra.mxu0 %v11307_v50  ;;  %v11373_v50 = vld [vmem:[#allocation7 + $0x2a0] ss:$24 sps:$4 sm:$0xff]  }
 0x1e3   :  { %2982 = vmatpush2.bf16.msra.mxu1 %v11310_v53  ;;  %2942 = vmatprep.subr.bf16.mxu0 %v11315_v15  ;;  %v11381_v53 = vld [vmem:[#allocation7 + $0x274] ss:$24 sps:$4 sm:$0xff]   ;;  %v11388_v15 = vld [vmem:[#allocation7 + $0x5a0] ss:$24 sps:$4 sm:$0xff]  }
 0x1e4   :  { %2983 = vmatprep.subr.bf16.mxu1 %v11318_v16  ;;  %v11396_v16 = vld [vmem:[#allocation7 + $0x574] ss:$24 sps:$4 sm:$0xff]  }
 0x1e6   :  { %2943 = vmatpush2.bf16.msra.mxu0 %v11313_v18  ;;  %v11387_v18 = vld [vmem:[#allocation7 + $0x244] ss:$24 sps:$4 sm:$0xff]  }
 0x1e7   :  { %2984 = vmatpush2.bf16.msra.mxu1 %v11316_v23  ;;  %2944 = vmatprep.subr.bf16.mxu0 %v11321_v25  ;;  %v11394_v23 = vld [vmem:[#allocation7 + $0x570] ss:$24 sps:$4 sm:$0xff]   ;;  %v11402_v25 = vld [vmem:[#allocation7 + $0x544] ss:$24 sps:$4 sm:$0xff]  }
 0x1e8   :  { %2985 = vmatprep.subr.bf16.mxu1 %v11324_v26  ;;  %v11385_v26 = vld [vmem:[#allocation7 + $0x240] ss:$24 sps:$4 sm:$0xff]  }
 0x1ea   :  { %2945 = vmatpush2.bf16.msra.mxu0 %v11319_v10  ;;  %v11400_v10 = vld [vmem:[#allocation7 + $0x540] ss:$24 sps:$4 sm:$0xff]  }
 0x1eb   :  { %2986 = vmatpush2.bf16.msra.mxu1 %v11322_v63  ;;  %4768 = vmatprep.subr.bf16.mxu0 %v11327_v27  ;;  %v11408_v63 = vld [vmem:[#allocation7 + $0x514] ss:$24 sps:$4 sm:$0xff]   ;;  %v11391_v27 = vld [vmem:[#allocation7 + $0x210] ss:$24 sps:$4 sm:$0xff]  }
 0x1ec   :  { %4809 = vmatprep.subr.bf16.mxu1 %v11336_v28  ;;  %v11399_v28 = vld [vmem:[#allocation7 + $0x1e4] ss:$24 sps:$4 sm:$0xff]  }
 0x1ed   :  { %v13015_v38 = vpop.f32.mrf.mxu0  ;;  %2947 = vmatmul.mubr.bf16.vlgmr.msra.gmra.mxu0 %v12969_v21 }
 0x1ee   :  { %v13017_v33 = vpop.f32.mrf.mxu1  ;;  %2988 = vmatmul.mubr.bf16.vlgmr.msra.gmra.mxu1 %v12971_v22  ;;  %4769 = vmatpush1.bf16.msra.mxu0 %v11325_v5  ;;  %v11414_v5 = vld [vmem:[#allocation7 + $0x4e4] ss:$24 sps:$4 sm:$0xff]  }
 0x1ef   :  { %4800 = vmatprep.mubr.bf16.mxu0 %v13013_v32  ;;  %v13022_v35 = vpop.f32.mrf.mxu0  ;;  %4770 = vmatprep.subr.bf16.mxu0 %v11330_v19  ;;  %v11397_v19 = vld [vmem:[#allocation7 + $0x1e0] ss:$24 sps:$4 sm:$0xff]  }
 0x1f0   :  { %v13024_v36 = vpop.f32.mrf.mxu1  ;;  %4810 = vmatpush1.bf16.msra.mxu1 %v11334_v30  ;;  %v11405_v30 = vld [vmem:[#allocation7 + $0x1b4] ss:$24 sps:$4 sm:$0xff]  }
 0x1f1   :  { %4811 = vmatprep.subr.bf16.mxu1 %v11342_v31  ;;  %v2706_v43 = vpop.f32.mrf.mxu0  ;;  %v11412_v31 = vld [vmem:[#allocation7 + $0x4e0] ss:$24 sps:$4 sm:$0xff]  }
 0x1f2   :  { %v2747_v44 = vpop.f32.mrf.mxu1  ;;  %4771 = vmatpush1.bf16.msra.mxu0 %v11328_v20  ;;  %v11417_v20 = vld [vmem:[#allocation7 + $0x4b4] ss:$24 sps:$4 sm:$0xff]   ;;  %v11415_v43 = vld [vmem:[#allocation7 + $0x4b0] ss:$24 sps:$4 sm:$0xff]  }
 0x1f3   :  { %v2707_v21 = vpop.f32.mrf.mxu0  ;;  %4772 = vmatprep.subr.bf16.mxu0 %v11333_v41  ;;  %v13027_v41 = vsub.s32 2, %v12981_v34  ;;  %v11420_v44 = vld [vmem:[#allocation7 + $0x484] ss:$24 sps:$4 sm:$0xff]  }
 0x1f4   :  { %v2748_v22 = vpop.f32.mrf.mxu1  ;;  %4812 = vmatpush1.bf16.msra.mxu1 %v11340_v37  ;;  %v13030_v37 = vsub.s32 3, %v12981_v34 }
 0x1f5   :  { %4813 = vmatprep.subr.bf16.mxu1 %v11348_v40  ;;  %v11411_v40 = vld [vmem:[#allocation7 + $0x184] ss:$24 sps:$4 sm:$0xff]  }
 0x1f6   :  { %4773 = vmatpush1.bf16.msra.mxu0 %v11331_v39  ;;  %v11403_v39 = vld [vmem:[#allocation7 + $0x1b0] ss:$24 sps:$4 sm:$0xff]  }
 0x1f7   :  { %4774 = vmatprep.subr.bf16.mxu0 %v11339_v46  ;;  %v13032_v46 = vld [vmem:[#allocation5] sm:$0x3f] }
 0x1f8   :  { %4814 = vmatpush1.bf16.msra.mxu1 %v11346_v47  ;;  %v565_v21 = vrot.slane %v13032_v46, %v13027_v41  ;;  %v569_v22 = vrot.slane %v13032_v46, %v13030_v37  ;;  %v11409_v47 = vld [vmem:[#allocation7 + $0x180] ss:$24 sps:$4 sm:$0xff]  }
 0x1f9   :  { %4815 = vmatprep.subr.bf16.mxu1 %v11354_v48  ;;  %v11418_v48 = vld [vmem:[#allocation7 + $0x480] ss:$24 sps:$4 sm:$0xff]  }
 0x1fa   :  { %4775 = vmatpush1.bf16.msra.mxu0 %v11337_v49  ;;  %v11423_v49 = vld [vmem:[#allocation7 + $0x15c] ss:$24 sps:$4 sm:$0xff]  }
 0x1fb   :  { %4776 = vmatprep.subr.bf16.mxu0 %v11345_v51  ;;  %v2996_v51 = vmax.f32 %v13006_v24, 0.0 }
 0x1fc   :  { %4816 = vmatpush1.bf16.msra.mxu1 %v11352_v52  ;;  %v11471_v52 = vld [vmem:[#allocation7 + $0x754] ss:$24 sps:$4 sm:$0xff]  }
 0x1fd   :  { %4817 = vmatprep.subr.bf16.mxu1 %v11360_v54  ;;  %v2703_v54 = vadd.f32 %v13015_v38, %v565_v21  ;;  %v11525_v21 = vld [vmem:[#allocation7 + $0x8a4] ss:$24 sps:$4 sm:$0xff]  }
 0x1fe   :  { %4777 = vmatpush1.bf16.msra.mxu0 %v11343_v55  ;;  %v2705_v55 = vadd.f32 %v13022_v35, %v569_v22  ;;  %v11439_v22 = vld [vmem:[#allocation7 + $0x38] ss:$24 sps:$4 sm:$0xff]  }
 0x1ff   :  { %4778 = vmatprep.subr.bf16.mxu0 %v11351_v56  ;;  %v11469_v56 = vld [vmem:[#allocation7 + $0x750] ss:$24 sps:$4 sm:$0xff]  }
 0x200   :  { %4818 = vmatpush1.bf16.msra.mxu1 %v11358_v57  ;;  %v13041_v57 = vpack.c.bf16 %v2996_v51, %v2996_v51  ;;  %v2746_v38 = vadd.f32 %v13024_v36, %v2705_v55  ;;  %v11421_v36 = vld [vmem:[#allocation7 + $0x158] ss:$24 sps:$4 sm:$0xff]   ;;  %v11442_v51 = vld [vmem:[#allocation7 + $0x8] ss:$24 sps:$4 sm:$0xff]   ;;  %v11537_v55 = vld [vmem:[#allocation7 + $0x844] ss:$24 sps:$4 sm:$0xff]  }
 0x201   :  { %4819 = vmatprep.subr.bf16.mxu1 %v11366_v58  ;;  %v11477_v58 = vld [vmem:[#allocation7 + $0x724] ss:$24 sps:$4 sm:$0xff]  }
 0x202   :  { %4779 = vmatpush1.bf16.msra.mxu0 %v11349_v59  ;;  %v2744_v59 = vadd.f32 %v13017_v33, %v2703_v54  ;;  %v11529_v54 = vld [vmem:[#allocation7 + $0x870] ss:$24 sps:$4 sm:$0xff]  }
 0x203   :  { %4780 = vmatprep.subr.bf16.mxu0 %v11357_v60  ;;  %v11475_v60 = vld [vmem:[#allocation7 + $0x720] ss:$24 sps:$4 sm:$0xff]  }
 0x204   :  { %4820 = vmatpush1.bf16.msra.mxu1 %v11364_v61 }
 0x205   :  { %4821 = vmatprep.subr.bf16.mxu1 %v11372_v62 }
 0x206   :  { %4781 = vmatpush1.bf16.msra.mxu0 %v11355_v0 }
 0x207   :  { %4782 = vmatprep.subr.bf16.mxu0 %v11363_v1  ;;  %v11483_v1 = vld [vmem:[#allocation7 + $0x6f4] ss:$24 sps:$4 sm:$0xff]  }
 0x208   :  { %4822 = vmatpush1.bf16.msra.mxu1 %v11370_v2 }
 0x209   :  { %4823 = vmatprep.subr.bf16.mxu1 %v11378_v3 }
 0x20a   :  { %4783 = vmatpush1.bf16.msra.mxu0 %v11361_v4  ;;  %v11481_v4 = vld [vmem:[#allocation7 + $0x6f0] ss:$24 sps:$4 sm:$0xff]  }
 0x20b   :  { %4784 = vmatprep.subr.bf16.mxu0 %v11369_v6 }
 0x20c   :  { %4824 = vmatpush1.bf16.msra.mxu1 %v11376_v7 }
 0x20d   :  { %4825 = vmatprep.subr.bf16.mxu1 %v11384_v8 }
 0x20e   :  { %4785 = vmatpush2.bf16.msra.mxu0 %v11367_v11 }
 0x20f   :  { %4786 = vmatprep.subr.bf16.mxu0 %v11375_v12 }
 0x210   :  { %4826 = vmatpush2.bf16.msra.mxu1 %v11382_v13  ;;  %v11489_v13 = vld [vmem:[#allocation7 + $0x6c4] ss:$24 sps:$4 sm:$0xff]  }
 0x211   :  { %4827 = vmatprep.subr.bf16.mxu1 %v11390_v14 }
 0x212   :  { %4787 = vmatpush2.bf16.msra.mxu0 %v11373_v50 }
 0x213   :  { %4788 = vmatprep.subr.bf16.mxu0 %v11381_v53 }
 0x214   :  { %4828 = vmatpush2.bf16.msra.mxu1 %v11388_v15  ;;  %v11426_v15 = vld [vmem:[#allocation7 + $0x12c] ss:$24 sps:$4 sm:$0xff]  }
 0x215   :  { %4829 = vmatprep.subr.bf16.mxu1 %v11396_v16  ;;  %v11487_v16 = vld [vmem:[#allocation7 + $0x6c0] ss:$24 sps:$4 sm:$0xff]  }
 0x216   :  { %4789 = vmatpush2.bf16.msra.mxu0 %v11379_v17  ;;  %v11424_v17 = vld [vmem:[#allocation7 + $0x128] ss:$24 sps:$4 sm:$0xff]  }
 0x217   :  { %4790 = vmatprep.subr.bf16.mxu0 %v11387_v18  ;;  %v11495_v18 = vld [vmem:[#allocation7 + $0x694] ss:$24 sps:$4 sm:$0xff]  }
 0x218   :  { %4830 = vmatpush2.bf16.msra.mxu1 %v11394_v23  ;;  %v11429_v23 = vld [vmem:[#allocation7 + $0xfc] ss:$24 sps:$4 sm:$0xff]  }
 0x219   :  { %4831 = vmatprep.subr.bf16.mxu1 %v11402_v25  ;;  %v11493_v25 = vld [vmem:[#allocation7 + $0x690] ss:$24 sps:$4 sm:$0xff]  }
 0x21a   :  { %4791 = vmatpush2.bf16.msra.mxu0 %v11385_v26  ;;  %v11501_v26 = vld [vmem:[#allocation7 + $0x664] ss:$24 sps:$4 sm:$0xff]  }
 0x21b   :  { %4792 = vmatprep.subr.bf16.mxu0 %v11393_v9  ;;  %v11427_v9 = vld [vmem:[#allocation7 + $0xf8] ss:$24 sps:$4 sm:$0xff]  }
 0x21c   :  { %4832 = vmatpush2.bf16.msra.mxu1 %v11400_v10  ;;  %v11432_v10 = vld [vmem:[#allocation7 + $0xcc] ss:$24 sps:$4 sm:$0xff]  }
 0x21d   :  { %4833 = vmatprep.subr.bf16.mxu1 %v11408_v63  ;;  %v11499_v63 = vld [vmem:[#allocation7 + $0x660] ss:$24 sps:$4 sm:$0xff]  }
 0x21e   :  { %4793 = vmatpush2.bf16.msra.mxu0 %v11391_v27  ;;  %v11507_v27 = vld [vmem:[#allocation7 + $0x634] ss:$24 sps:$4 sm:$0xff]  }
 0x21f   :  { %4794 = vmatprep.subr.bf16.mxu0 %v11399_v28  ;;  %v11430_v28 = vld [vmem:[#allocation7 + $0xc8] ss:$24 sps:$4 sm:$0xff]  }
 0x220   :  { %4834 = vmatpush2.bf16.msra.mxu1 %v11406_v29  ;;  %v11435_v29 = vld [vmem:[#allocation7 + $0x9c] ss:$24 sps:$4 sm:$0xff]  }
 0x221   :  { %4835 = vmatprep.subr.bf16.mxu1 %v11414_v5  ;;  %v11505_v5 = vld [vmem:[#allocation7 + $0x630] ss:$24 sps:$4 sm:$0xff]  }
 0x222   :  { %4795 = vmatpush2.bf16.msra.mxu0 %v11397_v19  ;;  %v11513_v19 = vld [vmem:[#allocation7 + $0x604] ss:$24 sps:$4 sm:$0xff]  }
 0x223   :  { %4796 = vmatprep.subr.bf16.mxu0 %v11405_v30  ;;  %v11433_v30 = vld [vmem:[#allocation7 + $0x98] ss:$24 sps:$4 sm:$0xff]  }
 0x224   :  { %4836 = vmatpush2.bf16.msra.mxu1 %v11412_v31  ;;  %v11438_v31 = vld [vmem:[#allocation7 + $0x6c] ss:$24 sps:$4 sm:$0xff]  }
 0x225   :  { %4837 = vmatprep.subr.bf16.mxu1 %v11417_v20  ;;  %v11511_v20 = vld [vmem:[#allocation7 + $0x600] ss:$24 sps:$4 sm:$0xff]  }
 0x226   :  { %4797 = vmatpush2.bf16.msra.mxu0 %v11403_v39  ;;  %v11519_v39 = vld [vmem:[#allocation7 + $0x8d4] ss:$24 sps:$4 sm:$0xff]  }
 0x227   :  { %4798 = vmatprep.subr.bf16.mxu0 %v11411_v40  ;;  %v11436_v40 = vld [vmem:[#allocation7 + $0x68] ss:$24 sps:$4 sm:$0xff]  }
 0x228   :  { %4838 = vmatpush2.bf16.msra.mxu1 %v11415_v43  ;;  %v11441_v43 = vld [vmem:[#allocation7 + $0x3c] ss:$24 sps:$4 sm:$0xff]  }
 0x229   :  { %4839 = vmatprep.subr.bf16.mxu1 %v11420_v44  ;;  %v11517_v44 = vld [vmem:[#allocation7 + $0x8d0] ss:$24 sps:$4 sm:$0xff]  }
 0x22a   :  { %4799 = vmatpush2.bf16.msra.mxu0 %v11409_v47  ;;  %v11444_v47 = vld [vmem:[#allocation7 + $0xc] ss:$24 sps:$4 sm:$0xff]  }
 0x22b   :  { %4850 = vmatprep.subr.bf16.mxu0 %v11471_v52  ;;  %v11447_v52 = vld [vmem:[#allocation7 + $0x2dc] ss:$24 sps:$4 sm:$0xff]  }
 0x22c   :  { %4840 = vmatpush2.bf16.msra.mxu1 %v11418_v48  ;;  %v11523_v48 = vld [vmem:[#allocation7 + $0x8a0] ss:$24 sps:$4 sm:$0xff]  }
 0x22d   :  { %4891 = vmatprep.subr.bf16.mxu1 %v11423_v49  ;;  %v2784_v24 = vpop.f32.mrf.mxu0  ;;  %4801 = vmatmul.mubr.bf16.vlgmr.msra.gmra.mxu0 %v13041_v57  ;;  %v11531_v49 = vld [vmem:[#allocation7 + $0x874] ss:$24 sps:$4 sm:$0xff]  }
 0x22e   :  { %v2825_v61 = vpop.f32.mrf.mxu1  ;;  %v2785_v62 = vadd.f32 %v2784_v24, %v2744_v59  ;;  %4851 = vmatpush1.bf16.msra.mxu0 %v11469_v56  ;;  %v11445_v56 = vld [vmem:[#allocation7 + $0x2d8] ss:$24 sps:$4 sm:$0xff]   ;;  %v11448_v24 = vld [vmem:[#allocation7 + $0x2a8] ss:$24 sps:$4 sm:$0xff]  }
 0x22f   :  { %v2786_v35 = vpop.f32.mrf.mxu0  ;;  %4852 = vmatprep.subr.bf16.mxu0 %v11477_v58  ;;  %v11450_v58 = vld [vmem:[#allocation7 + $0x2ac] ss:$24 sps:$4 sm:$0xff]   ;;  %v11535_v59 = vld [vmem:[#allocation7 + $0x840] ss:$24 sps:$4 sm:$0xff]  }
 0x230   :  { %v2827_v0 = vpop.f32.mrf.mxu1  ;;  %v2826_v2 = vadd.f32 %v2825_v61, %v2785_v62  ;;  %v2787_v3 = vadd.f32 %v2786_v35, %v2746_v38  ;;  %v11453_v61 = vld [vmem:[#allocation7 + $0x27c] ss:$24 sps:$4 sm:$0xff]   ;;  %v11541_v38 = vld [vmem:[#allocation7 + $0x810] ss:$24 sps:$4 sm:$0xff]  }
 0x231   :  { %v2788_v6 = vpop.f32.mrf.mxu0  ;;  %v11549_v62 = vld [vmem:[#allocation7 + $0x7e4] ss:$24 sps:$4 sm:$0xff]   ;;  %v11451_v35 = vld [vmem:[#allocation7 + $0x278] ss:$24 sps:$4 sm:$0xff]  }
 0x232   :  { %v2829_v7 = vpop.f32.mrf.mxu1  ;;  %v2828_v33 = vadd.f32 %v2827_v0, %v2787_v3  ;;  %4853 = vmatpush1.bf16.msra.mxu0 %v11475_v60  ;;  %v2998_v8 = vmax.f32 %v2826_v2, 0.0  ;;  %v11543_v60 = vld [vmem:[#allocation7 + $0x814] ss:$24 sps:$4 sm:$0xff]   ;;  %v11454_v3 = vld [vmem:[#allocation7 + $0x248] ss:$24 sps:$4 sm:$0xff]  }
 0x233   :  { %v2789_v11 = vpop.f32.mrf.mxu0  ;;  %4854 = vmatprep.subr.bf16.mxu0 %v11483_v1  ;;  %v11456_v0 = vld [vmem:[#allocation7 + $0x24c] ss:$24 sps:$4 sm:$0xff]   ;;  %v11547_v1 = vld [vmem:[#allocation7 + $0x7e0] ss:$24 sps:$4 sm:$0xff]   ;;  %v11553_v6 = vld [vmem:[#allocation7 + $0x7b0] ss:$24 sps:$4 sm:$0xff]  }
 0x234   :  { %v2830_v12 = vpop.f32.mrf.mxu1  ;;  %v2999_v14 = vmax.f32 %v2828_v33, 0.0  ;;  %v13048_v53 = vpack.c.bf16 %v2998_v8, %v2998_v8  ;;  %v11555_v2 = vld [vmem:[#allocation7 + $0x7b4] ss:$24 sps:$4 sm:$0xff]   ;;  %v11561_v7 = vld [vmem:[#allocation7 + $0x784] ss:$24 sps:$4 sm:$0xff]  }
 0x235   :  { %v11457_v33 = vld [vmem:[#allocation7 + $0x218] ss:$24 sps:$4 sm:$0xff]   ;;  %v11462_v8 = vld [vmem:[#allocation7 + $0x1ec] ss:$24 sps:$4 sm:$0xff]   ;;  %v11567_v12 = vld [vmem:[#allocation7 + $0x45c] ss:$24 sps:$4 sm:$0xff]  }
 0x236   :  { %v13046_v50 = vpack.c.bf16 %v2999_v14, %v2999_v14  ;;  %4855 = vmatpush1.bf16.msra.mxu0 %v11481_v4  ;;  %v11459_v4 = vld [vmem:[#allocation7 + $0x21c] ss:$24 sps:$4 sm:$0xff]   ;;  %v11559_v11 = vld [vmem:[#allocation7 + $0x780] ss:$24 sps:$4 sm:$0xff]  }
 0x237   :  { %4856 = vmatprep.subr.bf16.mxu0 %v11489_v13  ;;  %v11460_v13 = vld [vmem:[#allocation7 + $0x1e8] ss:$24 sps:$4 sm:$0xff]   ;;  %v11465_v14 = vld [vmem:[#allocation7 + $0x1bc] ss:$24 sps:$4 sm:$0xff]  }
 0x238   :  { %4841 = vmatprep.mubr.bf16.mxu1 %v13046_v50 }
 0x239   :  { %4842 = vmatmul.mubr.bf16.vlgmr.msra.gmra.mxu1 %v13048_v53 }
 0x23a   :  { %4892 = vmatpush1.bf16.msra.mxu1 %v11421_v36  ;;  %4923 = vmatprep.mubr.bf16.mxu1 %v13013_v32  ;;  %v11463_v36 = vld [vmem:[#allocation7 + $0x1b8] ss:$24 sps:$4 sm:$0xff]  }
 0x23b   :  { %4893 = vmatprep.subr.bf16.mxu1 %v11426_v15  ;;  %4857 = vmatpush1.bf16.msra.mxu0 %v11487_v16 }
 0x23c   :  { %4858 = vmatprep.subr.bf16.mxu0 %v11495_v18 }
 0x23e   :  { %4894 = vmatpush1.bf16.msra.mxu1 %v11424_v17 }
 0x23f   :  { %4895 = vmatprep.subr.bf16.mxu1 %v11429_v23  ;;  %4859 = vmatpush1.bf16.msra.mxu0 %v11493_v25  ;;  %v11468_v23 = vld [vmem:[#allocation7 + $0x18c] ss:$24 sps:$4 sm:$0xff]   ;;  %v11466_v25 = vld [vmem:[#allocation7 + $0x188] ss:$24 sps:$4 sm:$0xff]  }
 0x240   :  { %4860 = vmatprep.subr.bf16.mxu0 %v11501_v26 }
 0x242   :  { %4896 = vmatpush1.bf16.msra.mxu1 %v11427_v9 }
 0x243   :  { %4897 = vmatprep.subr.bf16.mxu1 %v11432_v10  ;;  %4861 = vmatpush1.bf16.msra.mxu0 %v11499_v63 }
 0x244   :  { %4862 = vmatprep.subr.bf16.mxu0 %v11507_v27  ;;  %v11474_v27 = vld [vmem:[#allocation7 + $0x75c] ss:$24 sps:$4 sm:$0xff]  }
 0x246   :  { %4898 = vmatpush1.bf16.msra.mxu1 %v11430_v28  ;;  %v11472_v28 = vld [vmem:[#allocation7 + $0x758] ss:$24 sps:$4 sm:$0xff]  }
 0x247   :  { %4899 = vmatprep.subr.bf16.mxu1 %v11435_v29  ;;  %4863 = vmatpush1.bf16.msra.mxu0 %v11505_v5  ;;  %v11480_v29 = vld [vmem:[#allocation7 + $0x72c] ss:$24 sps:$4 sm:$0xff]   ;;  %v11478_v5 = vld [vmem:[#allocation7 + $0x728] ss:$24 sps:$4 sm:$0xff]  }
 0x248   :  { %4864 = vmatprep.subr.bf16.mxu0 %v11513_v19  ;;  %v11486_v19 = vld [vmem:[#allocation7 + $0x6fc] ss:$24 sps:$4 sm:$0xff]  }
 0x24a   :  { %4900 = vmatpush1.bf16.msra.mxu1 %v11433_v30  ;;  %v11484_v30 = vld [vmem:[#allocation7 + $0x6f8] ss:$24 sps:$4 sm:$0xff]  }
 0x24b   :  { %4901 = vmatprep.subr.bf16.mxu1 %v11438_v31  ;;  %4865 = vmatpush1.bf16.msra.mxu0 %v11511_v20  ;;  %v11492_v31 = vld [vmem:[#allocation7 + $0x6cc] ss:$24 sps:$4 sm:$0xff]   ;;  %v11490_v20 = vld [vmem:[#allocation7 + $0x6c8] ss:$24 sps:$4 sm:$0xff]  }
 0x24c   :  { %4866 = vmatprep.subr.bf16.mxu0 %v11519_v39  ;;  %v11498_v39 = vld [vmem:[#allocation7 + $0x69c] ss:$24 sps:$4 sm:$0xff]  }
 0x24e   :  { %4902 = vmatpush1.bf16.msra.mxu1 %v11436_v40  ;;  %v11496_v40 = vld [vmem:[#allocation7 + $0x698] ss:$24 sps:$4 sm:$0xff]  }
 0x24f   :  { %4903 = vmatprep.subr.bf16.mxu1 %v11441_v43  ;;  %4867 = vmatpush2.bf16.msra.mxu0 %v11517_v44  ;;  %v11504_v43 = vld [vmem:[#allocation7 + $0x66c] ss:$24 sps:$4 sm:$0xff]   ;;  %v11502_v44 = vld [vmem:[#allocation7 + $0x668] ss:$24 sps:$4 sm:$0xff]  }
 0x250   :  { %4868 = vmatprep.subr.bf16.mxu0 %v11525_v21  ;;  %v11510_v21 = vld [vmem:[#allocation7 + $0x63c] ss:$24 sps:$4 sm:$0xff]  }
 0x252   :  { %4904 = vmatpush1.bf16.msra.mxu1 %v11439_v22  ;;  %v11508_v22 = vld [vmem:[#allocation7 + $0x638] ss:$24 sps:$4 sm:$0xff]  }
 0x253   :  { %4905 = vmatprep.subr.bf16.mxu1 %v11444_v47  ;;  %4869 = vmatpush2.bf16.msra.mxu0 %v11523_v48  ;;  %v11516_v47 = vld [vmem:[#allocation7 + $0x60c] ss:$24 sps:$4 sm:$0xff]   ;;  %v11514_v48 = vld [vmem:[#allocation7 + $0x608] ss:$24 sps:$4 sm:$0xff]  }
 0x254   :  { %4870 = vmatprep.subr.bf16.mxu0 %v11531_v49  ;;  %v11522_v49 = vld [vmem:[#allocation7 + $0x8dc] ss:$24 sps:$4 sm:$0xff]  }
 0x256   :  { %4906 = vmatpush1.bf16.msra.mxu1 %v11442_v51  ;;  %v11520_v51 = vld [vmem:[#allocation7 + $0x8d8] ss:$24 sps:$4 sm:$0xff]  }
 0x257   :  { %4907 = vmatprep.subr.bf16.mxu1 %v11447_v52  ;;  %4871 = vmatpush2.bf16.msra.mxu0 %v11529_v54  ;;  %v11528_v52 = vld [vmem:[#allocation7 + $0x8ac] ss:$24 sps:$4 sm:$0xff]   ;;  %v11526_v54 = vld [vmem:[#allocation7 + $0x8a8] ss:$24 sps:$4 sm:$0xff]  }
 0x258   :  { %4872 = vmatprep.subr.bf16.mxu0 %v11537_v55  ;;  %v11534_v55 = vld [vmem:[#allocation7 + $0x87c] ss:$24 sps:$4 sm:$0xff]  }
 0x25a   :  { %4908 = vmatpush2.bf16.msra.mxu1 %v11445_v56  ;;  %v11532_v56 = vld [vmem:[#allocation7 + $0x878] ss:$24 sps:$4 sm:$0xff]  }
 0x25b   :  { %4909 = vmatprep.subr.bf16.mxu1 %v11450_v58  ;;  %4873 = vmatpush2.bf16.msra.mxu0 %v11535_v59  ;;  %v11540_v58 = vld [vmem:[#allocation7 + $0x84c] ss:$24 sps:$4 sm:$0xff]   ;;  %v13063_v59 = vsub.s32 4, %v12981_v34 }
 0x25c   :  { %4874 = vmatprep.subr.bf16.mxu0 %v11543_v60  ;;  %v13066_v60 = vsub.s32 5, %v12981_v34  ;;  %v11550_v34 = vld [vmem:[#allocation7 + $0x7e8] ss:$24 sps:$4 sm:$0xff]  }
 0x25e   :  { %4910 = vmatpush2.bf16.msra.mxu1 %v11448_v24  ;;  %v11538_v24 = vld [vmem:[#allocation7 + $0x848] ss:$24 sps:$4 sm:$0xff]  }
 0x25f   :  { %4911 = vmatprep.subr.bf16.mxu1 %v11453_v61  ;;  %4875 = vmatpush2.bf16.msra.mxu0 %v11541_v38  ;;  %v11546_v61 = vld [vmem:[#allocation7 + $0x81c] ss:$24 sps:$4 sm:$0xff]   ;;  %v573_v38 = vrot.slane %v13032_v46, %v13063_v59 }
 0x260   :  { %4876 = vmatprep.subr.bf16.mxu0 %v11549_v62  ;;  %v12622_v62 = vld [vmem:[#allocation5] sm:$0x3f] }
 0x262   :  { %4912 = vmatpush2.bf16.msra.mxu1 %v11451_v35  ;;  %v577_v35 = vrot.slane %v12622_v62, %v13066_v60  ;;  %v11604_v62 = vld [vmem:[#allocation7 + $0x340] ss:$24 sps:$4 sm:$0xff]  }
 0x263   :  { %4913 = vmatprep.subr.bf16.mxu1 %v11456_v0  ;;  %4877 = vmatpush2.bf16.msra.mxu0 %v11547_v1  ;;  %v11544_v0 = vld [vmem:[#allocation7 + $0x818] ss:$24 sps:$4 sm:$0xff]   ;;  %v11552_v1 = vld [vmem:[#allocation7 + $0x7ec] ss:$24 sps:$4 sm:$0xff]  }
 0x264   :  { %4878 = vmatprep.subr.bf16.mxu0 %v11555_v2 }
 0x266   :  { %4914 = vmatpush2.bf16.msra.mxu1 %v11454_v3 }
 0x267   :  { %4915 = vmatprep.subr.bf16.mxu1 %v11459_v4  ;;  %4879 = vmatpush2.bf16.msra.mxu0 %v11553_v6  ;;  %v11558_v4 = vld [vmem:[#allocation7 + $0x7bc] ss:$24 sps:$4 sm:$0xff]  }
 0x268   :  { %4880 = vmatprep.subr.bf16.mxu0 %v11561_v7 }
 0x26a   :  { %4916 = vmatpush2.bf16.msra.mxu1 %v11457_v33 }
 0x26b   :  { %4917 = vmatprep.subr.bf16.mxu1 %v11462_v8  ;;  %4881 = vmatpush2.bf16.msra.mxu0 %v11559_v11  ;;  %v11556_v11 = vld [vmem:[#allocation7 + $0x7b8] ss:$24 sps:$4 sm:$0xff]  }
 0x26c   :  { %4932 = vmatprep.subr.bf16.mxu0 %v11567_v12  ;;  %v11564_v12 = vld [vmem:[#allocation7 + $0x78c] ss:$24 sps:$4 sm:$0xff]  }
 0x26d   :  { %v13053_v15 = vpop.f32.mrf.mxu0 }
 0x26e   :  { %v13055_v16 = vpop.f32.mrf.mxu1  ;;  %4918 = vmatpush2.bf16.msra.mxu1 %v11460_v13  ;;  %v2867_v2 = vadd.f32 %v13053_v15, %v573_v38  ;;  %v11601_v38 = vld [vmem:[#allocation7 + $0x338] ss:$24 sps:$4 sm:$0xff]  }
 0x26f   :  { %v13057_v17 = vpop.f32.mrf.mxu0  ;;  %4919 = vmatprep.subr.bf16.mxu1 %v11465_v14 }
 0x270   :  { %v13059_v18 = vpop.f32.mrf.mxu1  ;;  %v2869_v3 = vadd.f32 %v13057_v17, %v577_v35  ;;  %v2908_v6 = vadd.f32 %v13055_v16, %v2867_v2  ;;  %v11609_v35 = vld [vmem:[#allocation7 + $0x30c] ss:$24 sps:$4 sm:$0xff]   ;;  %v11610_v2 = vld [vmem:[#allocation7 + $0x310] ss:$24 sps:$4 sm:$0xff]  }
 0x271   :  { %v2870_v26 = vpop.f32.mrf.mxu0 }
 0x272   :  { %v2911_v9 = vpop.f32.mrf.mxu1  ;;  %4920 = vmatpush2.bf16.msra.mxu1 %v11463_v36  ;;  %v2910_v46 = vadd.f32 %v13059_v18, %v2869_v3  ;;  %v11562_v26 = vld [vmem:[#allocation7 + $0x788] ss:$24 sps:$4 sm:$0xff]   ;;  %v11615_v3 = vld [vmem:[#allocation7 + $0x5dc] ss:$24 sps:$4 sm:$0xff]  }
 0x273   :  { %v2871_v10 = vpop.f32.mrf.mxu0  ;;  %4921 = vmatprep.subr.bf16.mxu1 %v11468_v23  ;;  %v11570_v9 = vld [vmem:[#allocation7 + $0x464] ss:$24 sps:$4 sm:$0xff]  }
 0x274   :  { %v2912_v63 = vpop.f32.mrf.mxu1 }
 0x276   :  { %4922 = vmatpush2.bf16.msra.mxu1 %v11466_v25 }
 0x277   :  { %4973 = vmatprep.subr.bf16.mxu1 %v11474_v27  ;;  %v11565_v27 = vld [vmem:[#allocation7 + $0x458] ss:$24 sps:$4 sm:$0xff]  }
 0x279   :  { %4924 = vmatmul.mubr.bf16.vlgmr.msra.gmra.mxu1 %v13041_v57 }
 0x27a   :  { %4974 = vmatpush1.bf16.msra.mxu1 %v11472_v28  ;;  %v11568_v28 = vld [vmem:[#allocation7 + $0x460] ss:$24 sps:$4 sm:$0xff]  }
 0x27b   :  { %4975 = vmatprep.subr.bf16.mxu1 %v11480_v29 }
 0x27e   :  { %4976 = vmatpush1.bf16.msra.mxu1 %v11478_v5  ;;  %v11573_v5 = vld [vmem:[#allocation7 + $0x42c] ss:$24 sps:$4 sm:$0xff]  }
 0x27f   :  { %4977 = vmatprep.subr.bf16.mxu1 %v11486_v19 }
 0x282   :  { %4978 = vmatpush1.bf16.msra.mxu1 %v11484_v30  ;;  %v11576_v30 = vld [vmem:[#allocation7 + $0x434] ss:$24 sps:$4 sm:$0xff]  }
 0x283   :  { %4979 = vmatprep.subr.bf16.mxu1 %v11492_v31  ;;  %v11571_v31 = vld [vmem:[#allocation7 + $0x428] ss:$24 sps:$4 sm:$0xff]  }
 0x286   :  { %4980 = vmatpush1.bf16.msra.mxu1 %v11490_v20  ;;  %v11574_v20 = vld [vmem:[#allocation7 + $0x430] ss:$24 sps:$4 sm:$0xff]  }
 0x287   :  { %4981 = vmatprep.subr.bf16.mxu1 %v11498_v39  ;;  %v11579_v39 = vld [vmem:[#allocation7 + $0x3fc] ss:$24 sps:$4 sm:$0xff]  }
 0x28a   :  { %4982 = vmatpush1.bf16.msra.mxu1 %v11496_v40  ;;  %v11582_v40 = vld [vmem:[#allocation7 + $0x404] ss:$24 sps:$4 sm:$0xff]  }
 0x28b   :  { %4983 = vmatprep.subr.bf16.mxu1 %v11504_v43  ;;  %v11577_v43 = vld [vmem:[#allocation7 + $0x3f8] ss:$24 sps:$4 sm:$0xff]  }
 0x28e   :  { %4984 = vmatpush1.bf16.msra.mxu1 %v11502_v44  ;;  %v11580_v44 = vld [vmem:[#allocation7 + $0x400] ss:$24 sps:$4 sm:$0xff]  }
 0x28f   :  { %4985 = vmatprep.subr.bf16.mxu1 %v11510_v21  ;;  %v11585_v21 = vld [vmem:[#allocation7 + $0x3cc] ss:$24 sps:$4 sm:$0xff]  }
 0x292   :  { %4986 = vmatpush1.bf16.msra.mxu1 %v11508_v22  ;;  %v11588_v22 = vld [vmem:[#allocation7 + $0x3d4] ss:$24 sps:$4 sm:$0xff]  }
 0x293   :  { %4987 = vmatprep.subr.bf16.mxu1 %v11516_v47  ;;  %v11583_v47 = vld [vmem:[#allocation7 + $0x3c8] ss:$24 sps:$4 sm:$0xff]  }
 0x296   :  { %4988 = vmatpush1.bf16.msra.mxu1 %v11514_v48  ;;  %v11586_v48 = vld [vmem:[#allocation7 + $0x3d0] ss:$24 sps:$4 sm:$0xff]  }
 0x297   :  { %4989 = vmatprep.subr.bf16.mxu1 %v11522_v49  ;;  %v11591_v49 = vld [vmem:[#allocation7 + $0x39c] ss:$24 sps:$4 sm:$0xff]  }
 0x29a   :  { %4990 = vmatpush2.bf16.msra.mxu1 %v11520_v51  ;;  %v11594_v51 = vld [vmem:[#allocation7 + $0x3a4] ss:$24 sps:$4 sm:$0xff]  }
 0x29b   :  { %4991 = vmatprep.subr.bf16.mxu1 %v11528_v52  ;;  %v11592_v52 = vld [vmem:[#allocation7 + $0x3a0] ss:$24 sps:$4 sm:$0xff]  }
 0x29e   :  { %4992 = vmatpush2.bf16.msra.mxu1 %v11526_v54  ;;  %v11597_v54 = vld [vmem:[#allocation7 + $0x36c] ss:$24 sps:$4 sm:$0xff]  }
 0x29f   :  { %4993 = vmatprep.subr.bf16.mxu1 %v11534_v55  ;;  %v11600_v55 = vld [vmem:[#allocation7 + $0x374] ss:$24 sps:$4 sm:$0xff]  }
 0x2a2   :  { %4994 = vmatpush2.bf16.msra.mxu1 %v11532_v56  ;;  %v11595_v56 = vld [vmem:[#allocation7 + $0x368] ss:$24 sps:$4 sm:$0xff]  }
 0x2a3   :  { %4995 = vmatprep.subr.bf16.mxu1 %v11540_v58  ;;  %v11598_v58 = vld [vmem:[#allocation7 + $0x370] ss:$24 sps:$4 sm:$0xff]  }
 0x2a6   :  { %4996 = vmatpush2.bf16.msra.mxu1 %v11538_v24  ;;  %v11603_v24 = vld [vmem:[#allocation7 + $0x33c] ss:$24 sps:$4 sm:$0xff]  }
 0x2a7   :  { %4997 = vmatprep.subr.bf16.mxu1 %v11546_v61  ;;  %v11606_v61 = vld [vmem:[#allocation7 + $0x344] ss:$24 sps:$4 sm:$0xff]  }
 0x2aa   :  { %4998 = vmatpush2.bf16.msra.mxu1 %v11544_v0  ;;  %v11612_v0 = vld [vmem:[#allocation7 + $0x314] ss:$24 sps:$4 sm:$0xff]  }
 0x2ab   :  { %4999 = vmatprep.subr.bf16.mxu1 %v11552_v1  ;;  %v11607_v1 = vld [vmem:[#allocation7 + $0x308] ss:$24 sps:$4 sm:$0xff]  }
 0x2ad   :  { %v2948_v7 = vpop.f32.mrf.mxu0 }
 0x2ae   :  { %v2989_v33 = vpop.f32.mrf.mxu1  ;;  %v2949_v8 = vadd.f32 %v2948_v7, %v2908_v6  ;;  %5000 = vmatpush2.bf16.msra.mxu1 %v11550_v34  ;;  %v11618_v34 = vld [vmem:[#allocation7 + $0x5e4] ss:$24 sps:$4 sm:$0xff]   ;;  %v11616_v6 = vld [vmem:[#allocation7 + $0x5e0] ss:$24 sps:$4 sm:$0xff]  }
 0x2af   :  { %v2950_v13 = vpop.f32.mrf.mxu0  ;;  %5001 = vmatprep.subr.bf16.mxu1 %v11558_v4  ;;  %v11613_v4 = vld [vmem:[#allocation7 + $0x5d8] ss:$24 sps:$4 sm:$0xff]   ;;  %v11621_v7 = vld [vmem:[#allocation7 + $0x5ac] ss:$24 sps:$4 sm:$0xff]  }
 0x2b0   :  { %v2991_v14 = vpop.f32.mrf.mxu1  ;;  %v2990_v36 = vadd.f32 %v2989_v33, %v2949_v8  ;;  %v2951_v15 = vadd.f32 %v2950_v13, %v2910_v46  ;;  %v11624_v33 = vld [vmem:[#allocation7 + $0x5b4] ss:$24 sps:$4 sm:$0xff]   ;;  %v11619_v46 = vld [vmem:[#allocation7 + $0x5a8] ss:$24 sps:$4 sm:$0xff]   ;;  %v11625_v13 = vld [vmem:[#allocation7 + $0x578] ss:$24 sps:$4 sm:$0xff]  }
 0x2b1   :  { %v2952_v17 = vpop.f32.mrf.mxu0  ;;  %v11622_v8 = vld [vmem:[#allocation7 + $0x5b0] ss:$24 sps:$4 sm:$0xff]  }
 0x2b2   :  { %v2993_v23 = vpop.f32.mrf.mxu1  ;;  %v2992_v25 = vadd.f32 %v2991_v14, %v2951_v15  ;;  %5002 = vmatpush2.bf16.msra.mxu1 %v11556_v11  ;;  %v3000_v16 = vmax.f32 %v2990_v36, 0.0  ;;  %v11627_v11 = vld [vmem:[#allocation7 + $0x57c] ss:$24 sps:$4 sm:$0xff]   ;;  %v11628_v14 = vld [vmem:[#allocation7 + $0x580] ss:$24 sps:$4 sm:$0xff]  }
 0x2b3   :  { %v2953_v10 = vpop.f32.mrf.mxu0  ;;  %5003 = vmatprep.subr.bf16.mxu1 %v11564_v12  ;;  %v11630_v12 = vld [vmem:[#allocation7 + $0x584] ss:$24 sps:$4 sm:$0xff]   ;;  %v11636_v15 = vld [vmem:[#allocation7 + $0x554] ss:$24 sps:$4 sm:$0xff]   ;;  %v11631_v17 = vld [vmem:[#allocation7 + $0x548] ss:$24 sps:$4 sm:$0xff]  }
 0x2b4   :  { %v2994_v63 = vpop.f32.mrf.mxu1  ;;  %v3001_v18 = vmax.f32 %v2992_v25, 0.0  ;;  %v13077_v19 = vpack.c.bf16 %v3000_v16, %v3000_v16  ;;  %v11633_v36 = vld [vmem:[#allocation7 + $0x54c] ss:$24 sps:$4 sm:$0xff]   ;;  %v11634_v23 = vld [vmem:[#allocation7 + $0x550] ss:$24 sps:$4 sm:$0xff]  }
 0x2b5   :  { %v11639_v25 = vld [vmem:[#allocation7 + $0x51c] ss:$24 sps:$4 sm:$0xff]   ;;  %v11640_v16 = vld [vmem:[#allocation7 + $0x520] ss:$24 sps:$4 sm:$0xff]   ;;  %v11645_v10 = vld [vmem:[#allocation7 + $0x4ec] ss:$24 sps:$4 sm:$0xff]  }
 0x2b6   :  { %v13075_v29 = vpack.c.bf16 %v3001_v18, %v3001_v18  ;;  %5004 = vmatpush2.bf16.msra.mxu1 %v11562_v26  ;;  %v11642_v26 = vld [vmem:[#allocation7 + $0x524] ss:$24 sps:$4 sm:$0xff]   ;;  %v11648_v63 = vld [vmem:[#allocation7 + $0x4f4] ss:$24 sps:$4 sm:$0xff]   ;;  %v11643_v18 = vld [vmem:[#allocation7 + $0x4e8] ss:$24 sps:$4 sm:$0xff]  }
 0x2b7   :  { %5055 = vmatprep.subr.bf16.mxu1 %v11570_v9  ;;  %v11637_v9 = vld [vmem:[#allocation7 + $0x518] ss:$24 sps:$4 sm:$0xff]  }
 0x2b8   :  { %4882 = vmatprep.mubr.bf16.mxu0 %v13075_v29  ;;  %5005 = vmatprep.mubr.bf16.mxu1 %v13075_v29 }
 0x2b9   :  { %4883 = vmatmul.mubr.bf16.vlgmr.msra.gmra.mxu0 %v13077_v19  ;;  %5006 = vmatmul.mubr.bf16.vlgmr.msra.gmra.mxu1 %v13077_v19 }
 0x2ba   :  { %4933 = vmatpush1.bf16.msra.mxu0 %v11565_v27  ;;  %5056 = vmatpush1.bf16.msra.mxu1 %v11568_v28  ;;  %v11646_v27 = vld [vmem:[#allocation7 + $0x4f0] ss:$24 sps:$4 sm:$0xff]   ;;  %v11651_v28 = vld [vmem:[#allocation7 + $0x4bc] ss:$24 sps:$4 sm:$0xff]  }
 0x2bb   :  { %4964 = vmatprep.mubr.bf16.mxu0 %v13046_v50  ;;  %5087 = vmatprep.mubr.bf16.mxu1 %v13046_v50  ;;  %v11589_v50 = vld [vmem:[#allocation7 + $0x398] ss:$24 sps:$4 sm:$0xff]  }
 0x2bc   :  { %4934 = vmatprep.subr.bf16.mxu0 %v11573_v5  ;;  %5057 = vmatprep.subr.bf16.mxu1 %v11576_v30  ;;  %v11654_v5 = vld [vmem:[#allocation7 + $0x4c4] ss:$24 sps:$4 sm:$0xff]  }
 0x2be   :  { %4935 = vmatpush1.bf16.msra.mxu0 %v11571_v31  ;;  %5058 = vmatpush1.bf16.msra.mxu1 %v11574_v20  ;;  %v11649_v31 = vld [vmem:[#allocation7 + $0x4b8] ss:$24 sps:$4 sm:$0xff]  }
 0x2bf   :  { %4936 = vmatprep.subr.bf16.mxu0 %v11579_v39  ;;  %5059 = vmatprep.subr.bf16.mxu1 %v11582_v40  ;;  %v11652_v20 = vld [vmem:[#allocation7 + $0x4c0] ss:$24 sps:$4 sm:$0xff]   ;;  %v11657_v39 = vld [vmem:[#allocation7 + $0x48c] ss:$24 sps:$4 sm:$0xff]  }
 0x2c0   :  { %v13085_v40 = vld [vmem:[#allocation8] sm:$0x3f] }
 0x2c2   :  { %4937 = vmatpush1.bf16.msra.mxu0 %v11577_v43  ;;  %5060 = vmatpush1.bf16.msra.mxu1 %v11580_v44  ;;  %v11660_v44 = vld [vmem:[#allocation7 + $0x494] ss:$24 sps:$4 sm:$0xff]  }
 0x2c3   :  { %4938 = vmatprep.subr.bf16.mxu0 %v11585_v21  ;;  %5061 = vmatprep.subr.bf16.mxu1 %v11588_v22  ;;  %v11655_v22 = vld [vmem:[#allocation7 + $0x488] ss:$24 sps:$4 sm:$0xff]  }
 0x2c6   :  { %4939 = vmatpush1.bf16.msra.mxu0 %v11583_v47  ;;  %5062 = vmatpush1.bf16.msra.mxu1 %v11586_v48  ;;  %v11658_v47 = vld [vmem:[#allocation7 + $0x490] ss:$24 sps:$4 sm:$0xff]   ;;  %v11663_v48 = vld [vmem:[#allocation7 + $0x164] ss:$24 sps:$4 sm:$0xff]  }
 0x2c7   :  { %4940 = vmatprep.subr.bf16.mxu0 %v11591_v49  ;;  %5063 = vmatprep.subr.bf16.mxu1 %v11594_v51  ;;  %v11720_v51 = vld [vmem:[#allocation10 + $0x154] ss:$24 sps:$4 sm:$0xff]  }
 0x2ca   :  { %4941 = vmatpush1.bf16.msra.mxu0 %v11589_v50  ;;  %5064 = vmatpush1.bf16.msra.mxu1 %v11592_v52  ;;  %v3301_v50 = vrot.slane %v13085_v40, %v12984_v42  ;;  %v3305_v52 = vrot.slane %v13085_v40, %v12987_v45 }
 0x2cb   :  { %4942 = vmatprep.subr.bf16.mxu0 %v11597_v54  ;;  %5065 = vmatprep.subr.bf16.mxu1 %v11600_v55  ;;  %v11661_v54 = vld [vmem:[#allocation7 + $0x160] ss:$24 sps:$4 sm:$0xff]   ;;  %v11666_v55 = vld [vmem:[#allocation7 + $0x134] ss:$24 sps:$4 sm:$0xff]  }
 0x2ce   :  { %4943 = vmatpush1.bf16.msra.mxu0 %v11595_v56  ;;  %5066 = vmatpush1.bf16.msra.mxu1 %v11598_v58  ;;  %v11718_v56 = vld [vmem:[#allocation10 + $0x150] ss:$24 sps:$4 sm:$0xff]  }
 0x2cf   :  { %4944 = vmatprep.subr.bf16.mxu0 %v11603_v24  ;;  %5067 = vmatprep.subr.bf16.mxu1 %v11606_v61  ;;  %v11726_v24 = vld [vmem:[#allocation10 + $0x124] ss:$24 sps:$4 sm:$0xff]  }
 0x2d2   :  { %4945 = vmatpush1.bf16.msra.mxu0 %v11601_v38  ;;  %5068 = vmatpush1.bf16.msra.mxu1 %v11604_v62 }
 0x2d3   :  { %4946 = vmatprep.subr.bf16.mxu0 %v11609_v35  ;;  %5069 = vmatprep.subr.bf16.mxu1 %v11612_v0  ;;  %v11664_v35 = vld [vmem:[#allocation7 + $0x130] ss:$24 sps:$4 sm:$0xff]  }
 0x2d6   :  { %4947 = vmatpush1.bf16.msra.mxu0 %v11607_v1  ;;  %5070 = vmatpush1.bf16.msra.mxu1 %v11610_v2  ;;  %v11669_v1 = vld [vmem:[#allocation7 + $0x104] ss:$24 sps:$4 sm:$0xff]  }
 0x2d7   :  { %4948 = vmatprep.subr.bf16.mxu0 %v11615_v3  ;;  %5071 = vmatprep.subr.bf16.mxu1 %v11618_v34  ;;  %v11724_v2 = vld [vmem:[#allocation10 + $0x120] ss:$24 sps:$4 sm:$0xff]   ;;  %v11732_v34 = vld [vmem:[#allocation10 + $0xf4] ss:$24 sps:$4 sm:$0xff]  }
 0x2da   :  { %4949 = vmatpush2.bf16.msra.mxu0 %v11613_v4  ;;  %5072 = vmatpush2.bf16.msra.mxu1 %v11616_v6 }
 0x2db   :  { %4950 = vmatprep.subr.bf16.mxu0 %v11621_v7  ;;  %5073 = vmatprep.subr.bf16.mxu1 %v11624_v33  ;;  %v11672_v7 = vld [vmem:[#allocation7 + $0xd4] ss:$24 sps:$4 sm:$0xff]  }
 0x2dc   :  { %v11730_v33 = vld [vmem:[#allocation10 + $0xf0] ss:$24 sps:$4 sm:$0xff]  }
 0x2de   :  { %4951 = vmatpush2.bf16.msra.mxu0 %v11619_v46  ;;  %5074 = vmatpush2.bf16.msra.mxu1 %v11622_v8  ;;  %v11670_v46 = vld [vmem:[#allocation7 + $0xd0] ss:$24 sps:$4 sm:$0xff]   ;;  %v11675_v8 = vld [vmem:[#allocation7 + $0xa4] ss:$24 sps:$4 sm:$0xff]  }
 0x2df   :  { %4952 = vmatprep.subr.bf16.mxu0 %v11627_v11  ;;  %5075 = vmatprep.subr.bf16.mxu1 %v11630_v12  ;;  %v11736_v11 = vld [vmem:[#allocation10 + $0xc0] ss:$24 sps:$4 sm:$0xff]   ;;  %v11744_v12 = vld [vmem:[#allocation10 + $0x94] ss:$24 sps:$4 sm:$0xff]  }
 0x2e2   :  { %4953 = vmatpush2.bf16.msra.mxu0 %v11625_v13  ;;  %5076 = vmatpush2.bf16.msra.mxu1 %v11628_v14  ;;  %v11673_v13 = vld [vmem:[#allocation7 + $0xa0] ss:$24 sps:$4 sm:$0xff]   ;;  %v11678_v14 = vld [vmem:[#allocation7 + $0x74] ss:$24 sps:$4 sm:$0xff]  }
 0x2e3   :  { %4954 = vmatprep.subr.bf16.mxu0 %v11633_v36  ;;  %5077 = vmatprep.subr.bf16.mxu1 %v11636_v15  ;;  %v11742_v36 = vld [vmem:[#allocation10 + $0x90] ss:$24 sps:$4 sm:$0xff]   ;;  %v11750_v15 = vld [vmem:[#allocation10 + $0x64] ss:$24 sps:$4 sm:$0xff]  }
 0x2e6   :  { %4955 = vmatpush2.bf16.msra.mxu0 %v11631_v17  ;;  %5078 = vmatpush2.bf16.msra.mxu1 %v11634_v23  ;;  %v11676_v17 = vld [vmem:[#allocation7 + $0x70] ss:$24 sps:$4 sm:$0xff]   ;;  %v11681_v23 = vld [vmem:[#allocation7 + $0x44] ss:$24 sps:$4 sm:$0xff]  }
 0x2e7   :  { %4956 = vmatprep.subr.bf16.mxu0 %v11639_v25  ;;  %5079 = vmatprep.subr.bf16.mxu1 %v11642_v26  ;;  %v11748_v25 = vld [vmem:[#allocation10 + $0x60] ss:$24 sps:$4 sm:$0xff]   ;;  %v11756_v26 = vld [vmem:[#allocation10 + $0x34] ss:$24 sps:$4 sm:$0xff]  }
 0x2ea   :  { %4957 = vmatpush2.bf16.msra.mxu0 %v11637_v9  ;;  %5080 = vmatpush2.bf16.msra.mxu1 %v11640_v16  ;;  %v11679_v9 = vld [vmem:[#allocation7 + $0x40] ss:$24 sps:$4 sm:$0xff]   ;;  %v11684_v16 = vld [vmem:[#allocation7 + $0x14] ss:$24 sps:$4 sm:$0xff]  }
 0x2eb   :  { %4958 = vmatprep.subr.bf16.mxu0 %v11645_v10  ;;  %5081 = vmatprep.subr.bf16.mxu1 %v11648_v63  ;;  %v11754_v10 = vld [vmem:[#allocation10 + $0x30] ss:$24 sps:$4 sm:$0xff]   ;;  %v11762_v63 = vld [vmem:[#allocation10 + $0x4] ss:$24 sps:$4 sm:$0xff]  }
 0x2ed   :  { %v4802_v30 = vpop.f32.mrf.mxu0 }
 0x2ee   :  { %4959 = vmatpush2.bf16.msra.mxu0 %v11643_v18  ;;  %5082 = vmatpush2.bf16.msra.mxu1 %v11646_v27  ;;  %v4803_v58 = vadd.f32 %v4802_v30, %v3301_v50  ;;  %v11682_v18 = vld [vmem:[#allocation7 + $0x10] ss:$24 sps:$4 sm:$0xff]   ;;  %v11687_v27 = vld [vmem:[#allocation7 + $0x2e4] ss:$24 sps:$4 sm:$0xff]   ;;  %v11685_v30 = vld [vmem:[#allocation7 + $0x2e0] ss:$24 sps:$4 sm:$0xff]  }
 0x2ef   :  { %v4804_v43 = vpop.f32.mrf.mxu0  ;;  %4960 = vmatprep.subr.bf16.mxu0 %v11651_v28  ;;  %5083 = vmatprep.subr.bf16.mxu1 %v11654_v5  ;;  %v11760_v28 = vld [vmem:[#allocation10] ss:$24 sps:$4 sm:$0xff]   ;;  %v11768_v5 = vld [vmem:[#allocation10 + $0x2d4] ss:$24 sps:$4 sm:$0xff]  }
 0x2f0   :  { %v4805_v38 = vadd.f32 %v4804_v43, %v3305_v52  ;;  %v11688_v43 = vld [vmem:[#allocation7 + $0x2b0] ss:$24 sps:$4 sm:$0xff]   ;;  %v11699_v52 = vld [vmem:[#allocation7 + $0x224] ss:$24 sps:$4 sm:$0xff]  }
 0x2f1   :  { %v4806_v21 = vpop.f32.mrf.mxu0  ;;  %v11694_v50 = vld [vmem:[#allocation7 + $0x250] ss:$24 sps:$4 sm:$0xff]  }
 0x2f2   :  { %4961 = vmatpush2.bf16.msra.mxu0 %v11649_v31  ;;  %5084 = vmatpush2.bf16.msra.mxu1 %v11652_v20  ;;  %v11690_v31 = vld [vmem:[#allocation7 + $0x2b4] ss:$24 sps:$4 sm:$0xff]   ;;  %v11772_v21 = vld [vmem:[#allocation10 + $0x2a0] ss:$24 sps:$4 sm:$0xff]  }
 0x2f3   :  { %v4807_v49 = vpop.f32.mrf.mxu0  ;;  %4962 = vmatprep.subr.bf16.mxu0 %v11657_v39  ;;  %5085 = vmatprep.subr.bf16.mxu1 %v11660_v44  ;;  %v11766_v20 = vld [vmem:[#allocation10 + $0x2d0] ss:$24 sps:$4 sm:$0xff]   ;;  %v11774_v39 = vld [vmem:[#allocation10 + $0x2a4] ss:$24 sps:$4 sm:$0xff]  }
 0x2f4   :  { %v11693_v44 = vld [vmem:[#allocation7 + $0x284] ss:$24 sps:$4 sm:$0xff]   ;;  %v11778_v49 = vld [vmem:[#allocation10 + $0x270] ss:$24 sps:$4 sm:$0xff]  }
 0x2f6   :  { %4963 = vmatpush2.bf16.msra.mxu0 %v11655_v22  ;;  %5086 = vmatpush2.bf16.msra.mxu1 %v11658_v47  ;;  %v11780_v22 = vld [vmem:[#allocation10 + $0x274] ss:$24 sps:$4 sm:$0xff]  }
 0x2f7   :  { %5014 = vmatprep.subr.bf16.mxu0 %v11663_v48  ;;  %6909 = vmatprep.subr.bf16.mxu1 %v11720_v51  ;;  %v11691_v47 = vld [vmem:[#allocation7 + $0x280] ss:$24 sps:$4 sm:$0xff]   ;;  %v11696_v48 = vld [vmem:[#allocation7 + $0x254] ss:$24 sps:$4 sm:$0xff]  }
 0x2f8   :  { %v11786_v51 = vld [vmem:[#allocation10 + $0x244] ss:$24 sps:$4 sm:$0xff]  }
 0x2f9   :  { %4965 = vmatmul.mubr.bf16.vlgmr.msra.gmra.mxu0 %v13048_v53  ;;  %5088 = vmatmul.mubr.bf16.vlgmr.msra.gmra.mxu1 %v13048_v53  ;;  %v4843_v61 = vpop.f32.mrf.mxu1  ;;  %v11667_v53 = vld [vmem:[#allocation7 + $0x100] ss:$24 sps:$4 sm:$0xff]  }
 0x2fa   :  { %v13093_v62 = vadd.f32 %v4843_v61, %v4803_v58  ;;  %5015 = vmatpush1.bf16.msra.mxu0 %v11661_v54  ;;  %5046 = vmatprep.mubr.bf16.mxu0 %v13013_v32  ;;  %v11738_v32 = vld [vmem:[#allocation10 + $0xc4] ss:$24 sps:$4 sm:$0xff]   ;;  %v11784_v54 = vld [vmem:[#allocation10 + $0x240] ss:$24 sps:$4 sm:$0xff]  }
 0x2fb   :  { %v4845_v0 = vpop.f32.mrf.mxu1  ;;  %5016 = vmatprep.subr.bf16.mxu0 %v11666_v55  ;;  %6910 = vmatpush1.bf16.msra.mxu1 %v11718_v56  ;;  %v11792_v55 = vld [vmem:[#allocation10 + $0x214] ss:$24 sps:$4 sm:$0xff]   ;;  %v11798_v61 = vld [vmem:[#allocation10 + $0x1e4] ss:$24 sps:$4 sm:$0xff]  }
 0x2fc   :  { %v13096_v3 = vadd.f32 %v4845_v0, %v4805_v38  ;;  %6911 = vmatprep.subr.bf16.mxu1 %v11726_v24  ;;  %v11697_v56 = vld [vmem:[#allocation7 + $0x220] ss:$24 sps:$4 sm:$0xff]   ;;  %v11702_v58 = vld [vmem:[#allocation7 + $0x1f4] ss:$24 sps:$4 sm:$0xff]   ;;  %v11700_v38 = vld [vmem:[#allocation7 + $0x1f0] ss:$24 sps:$4 sm:$0xff]  }
 0x2fd   :  { %v4847_v4 = vpop.f32.mrf.mxu1  ;;  %v11790_v24 = vld [vmem:[#allocation10 + $0x210] ss:$24 sps:$4 sm:$0xff]   ;;  %v11796_v0 = vld [vmem:[#allocation10 + $0x1e0] ss:$24 sps:$4 sm:$0xff]  }
 0x2fe   :  { %5017 = vmatpush1.bf16.msra.mxu0 %v11664_v35  ;;  %v11705_v35 = vld [vmem:[#allocation7 + $0x1c4] ss:$24 sps:$4 sm:$0xff]   ;;  %v11799_v4 = vld [vmem:[#allocation10 + $0x1b0] ss:$24 sps:$4 sm:$0xff]  }
 0x2ff   :  { %v4848_v6 = vpop.f32.mrf.mxu1  ;;  %5018 = vmatprep.subr.bf16.mxu0 %v11669_v1  ;;  %6912 = vmatpush1.bf16.msra.mxu1 %v11724_v2  ;;  %v11801_v1 = vld [vmem:[#allocation10 + $0x1b4] ss:$24 sps:$4 sm:$0xff]  }
 0x300   :  { %6913 = vmatprep.subr.bf16.mxu1 %v11732_v34  ;;  %v11703_v2 = vld [vmem:[#allocation7 + $0x1c0] ss:$24 sps:$4 sm:$0xff]   ;;  %v11708_v34 = vld [vmem:[#allocation7 + $0x194] ss:$24 sps:$4 sm:$0xff]   ;;  %v11706_v6 = vld [vmem:[#allocation7 + $0x190] ss:$24 sps:$4 sm:$0xff]  }
 0x302   :  { %5019 = vmatpush1.bf16.msra.mxu0 %v11667_v53  ;;  %v11804_v53 = vld [vmem:[#allocation10 + $0x184] ss:$24 sps:$4 sm:$0xff]  }
 0x303   :  { %5020 = vmatprep.subr.bf16.mxu0 %v11672_v7  ;;  %6914 = vmatpush1.bf16.msra.mxu1 %v11730_v33  ;;  %v11711_v7 = vld [vmem:[#allocation7 + $0x764] ss:$24 sps:$4 sm:$0xff]  }
 0x304   :  { %6915 = vmatprep.subr.bf16.mxu1 %v11738_v32  ;;  %v11802_v33 = vld [vmem:[#allocation10 + $0x180] ss:$24 sps:$4 sm:$0xff]  }
 0x305   :  { %v11709_v32 = vld [vmem:[#allocation7 + $0x760] ss:$24 sps:$4 sm:$0xff]  }
 0x306   :  { %5021 = vmatpush1.bf16.msra.mxu0 %v11670_v46  ;;  %v11714_v46 = vld [vmem:[#allocation7 + $0x734] ss:$24 sps:$4 sm:$0xff]  }
 0x307   :  { %5022 = vmatprep.subr.bf16.mxu0 %v11675_v8  ;;  %6916 = vmatpush1.bf16.msra.mxu1 %v11736_v11  ;;  %v11712_v11 = vld [vmem:[#allocation7 + $0x730] ss:$24 sps:$4 sm:$0xff]  }
 0x308   :  { %6917 = vmatprep.subr.bf16.mxu1 %v11744_v12 }
 0x30a   :  { %5023 = vmatpush1.bf16.msra.mxu0 %v11673_v13  ;;  %v11717_v13 = vld [vmem:[#allocation7 + $0x704] ss:$24 sps:$4 sm:$0xff]  }
 0x30b   :  { %5024 = vmatprep.subr.bf16.mxu0 %v11678_v14  ;;  %6918 = vmatpush1.bf16.msra.mxu1 %v11742_v36  ;;  %v11715_v36 = vld [vmem:[#allocation7 + $0x700] ss:$24 sps:$4 sm:$0xff]  }
 0x30c   :  { %6919 = vmatprep.subr.bf16.mxu1 %v11750_v15 }
 0x30e   :  { %5025 = vmatpush1.bf16.msra.mxu0 %v11676_v17  ;;  %v11723_v17 = vld [vmem:[#allocation7 + $0x6d4] ss:$24 sps:$4 sm:$0xff]  }
 0x30f   :  { %5026 = vmatprep.subr.bf16.mxu0 %v11681_v23  ;;  %6920 = vmatpush1.bf16.msra.mxu1 %v11748_v25  ;;  %v11721_v23 = vld [vmem:[#allocation7 + $0x6d0] ss:$24 sps:$4 sm:$0xff]   ;;  %v11729_v25 = vld [vmem:[#allocation7 + $0x6a4] ss:$24 sps:$4 sm:$0xff]  }
 0x310   :  { %6921 = vmatprep.subr.bf16.mxu1 %v11756_v26  ;;  %v11735_v26 = vld [vmem:[#allocation7 + $0x674] ss:$24 sps:$4 sm:$0xff]  }
 0x312   :  { %5027 = vmatpush1.bf16.msra.mxu0 %v11679_v9  ;;  %v11741_v9 = vld [vmem:[#allocation7 + $0x644] ss:$24 sps:$4 sm:$0xff]  }
 0x313   :  { %5028 = vmatprep.subr.bf16.mxu0 %v11684_v16  ;;  %6922 = vmatpush1.bf16.msra.mxu1 %v11754_v10  ;;  %v11739_v16 = vld [vmem:[#allocation7 + $0x640] ss:$24 sps:$4 sm:$0xff]   ;;  %v11747_v10 = vld [vmem:[#allocation7 + $0x614] ss:$24 sps:$4 sm:$0xff]  }
 0x314   :  { %6923 = vmatprep.subr.bf16.mxu1 %v11762_v63  ;;  %v11745_v63 = vld [vmem:[#allocation7 + $0x610] ss:$24 sps:$4 sm:$0xff]  }
 0x316   :  { %5029 = vmatpush1.bf16.msra.mxu0 %v11682_v18  ;;  %v11753_v18 = vld [vmem:[#allocation7 + $0x8e4] ss:$24 sps:$4 sm:$0xff]  }
 0x317   :  { %5030 = vmatprep.subr.bf16.mxu0 %v11687_v27  ;;  %6924 = vmatpush1.bf16.msra.mxu1 %v11760_v28  ;;  %v11751_v27 = vld [vmem:[#allocation7 + $0x8e0] ss:$24 sps:$4 sm:$0xff]   ;;  %v11759_v28 = vld [vmem:[#allocation7 + $0x8b4] ss:$24 sps:$4 sm:$0xff]  }
 0x318   :  { %6925 = vmatprep.subr.bf16.mxu1 %v11768_v5  ;;  %v11757_v5 = vld [vmem:[#allocation7 + $0x8b0] ss:$24 sps:$4 sm:$0xff]  }
 0x31a   :  { %5031 = vmatpush2.bf16.msra.mxu0 %v11685_v30  ;;  %v11765_v30 = vld [vmem:[#allocation7 + $0x884] ss:$24 sps:$4 sm:$0xff]  }
 0x31b   :  { %5032 = vmatprep.subr.bf16.mxu0 %v11690_v31  ;;  %6926 = vmatpush2.bf16.msra.mxu1 %v11766_v20  ;;  %v11763_v31 = vld [vmem:[#allocation7 + $0x880] ss:$24 sps:$4 sm:$0xff]   ;;  %v11771_v20 = vld [vmem:[#allocation7 + $0x854] ss:$24 sps:$4 sm:$0xff]  }
 0x31c   :  { %6927 = vmatprep.subr.bf16.mxu1 %v11774_v39  ;;  %v11769_v39 = vld [vmem:[#allocation7 + $0x850] ss:$24 sps:$4 sm:$0xff]  }
 0x31e   :  { %5033 = vmatpush2.bf16.msra.mxu0 %v11688_v43  ;;  %v11777_v43 = vld [vmem:[#allocation7 + $0x824] ss:$24 sps:$4 sm:$0xff]  }
 0x31f   :  { %5034 = vmatprep.subr.bf16.mxu0 %v11693_v44  ;;  %6928 = vmatpush2.bf16.msra.mxu1 %v11772_v21  ;;  %v11775_v44 = vld [vmem:[#allocation7 + $0x820] ss:$24 sps:$4 sm:$0xff]   ;;  %v11783_v21 = vld [vmem:[#allocation7 + $0x7f4] ss:$24 sps:$4 sm:$0xff]  }
 0x320   :  { %6929 = vmatprep.subr.bf16.mxu1 %v11780_v22  ;;  %v11781_v22 = vld [vmem:[#allocation7 + $0x7f0] ss:$24 sps:$4 sm:$0xff]  }
 0x322   :  { %5035 = vmatpush2.bf16.msra.mxu0 %v11691_v47  ;;  %v11789_v47 = vld [vmem:[#allocation7 + $0x7c4] ss:$24 sps:$4 sm:$0xff]  }
 0x323   :  { %5036 = vmatprep.subr.bf16.mxu0 %v11696_v48  ;;  %6930 = vmatpush2.bf16.msra.mxu1 %v11778_v49  ;;  %v11787_v48 = vld [vmem:[#allocation7 + $0x7c0] ss:$24 sps:$4 sm:$0xff]   ;;  %v11795_v49 = vld [vmem:[#allocation7 + $0x794] ss:$24 sps:$4 sm:$0xff]  }
 0x324   :  { %6931 = vmatprep.subr.bf16.mxu1 %v11786_v51  ;;  %v11793_v51 = vld [vmem:[#allocation7 + $0x790] ss:$24 sps:$4 sm:$0xff]  }
 0x326   :  { %5037 = vmatpush2.bf16.msra.mxu0 %v11694_v50  ;;  %v11807_v50 = vld [vmem:[#allocation10 + $0x454] ss:$24 sps:$4 sm:$0xff]  }
 0x327   :  { %5038 = vmatprep.subr.bf16.mxu0 %v11699_v52  ;;  %6932 = vmatpush2.bf16.msra.mxu1 %v11784_v54  ;;  %v11805_v52 = vld [vmem:[#allocation10 + $0x450] ss:$24 sps:$4 sm:$0xff]   ;;  %v11810_v54 = vld [vmem:[#allocation10 + $0x424] ss:$24 sps:$4 sm:$0xff]  }
 0x328   :  { %6933 = vmatprep.subr.bf16.mxu1 %v11792_v55 }
 0x32a   :  { %5039 = vmatpush2.bf16.msra.mxu0 %v11697_v56 }
 0x32b   :  { %5040 = vmatprep.subr.bf16.mxu0 %v11702_v58  ;;  %6934 = vmatpush2.bf16.msra.mxu1 %v11790_v24  ;;  %v11808_v24 = vld [vmem:[#allocation10 + $0x420] ss:$24 sps:$4 sm:$0xff]  }
 0x32c   :  { %6935 = vmatprep.subr.bf16.mxu1 %v11798_v61 }
 0x32e   :  { %5041 = vmatpush2.bf16.msra.mxu0 %v11700_v38 }
 0x32f   :  { %5042 = vmatprep.subr.bf16.mxu0 %v11705_v35  ;;  %6936 = vmatpush2.bf16.msra.mxu1 %v11796_v0  ;;  %v11813_v35 = vld [vmem:[#allocation10 + $0x3f4] ss:$24 sps:$4 sm:$0xff]  }
 0x330   :  { %6937 = vmatprep.subr.bf16.mxu1 %v11801_v1 }
 0x332   :  { %5043 = vmatpush2.bf16.msra.mxu0 %v11703_v2 }
 0x333   :  { %5044 = vmatprep.subr.bf16.mxu0 %v11708_v34  ;;  %6938 = vmatpush2.bf16.msra.mxu1 %v11799_v4 }
 0x334   :  { %6939 = vmatprep.subr.bf16.mxu1 %v11804_v53 }
 0x336   :  { %5045 = vmatpush2.bf16.msra.mxu0 %v11706_v6 }
 0x337   :  { %5096 = vmatprep.subr.bf16.mxu0 %v11711_v7  ;;  %6940 = vmatpush2.bf16.msra.mxu1 %v11802_v33  ;;  %v11816_v7 = vld [vmem:[#allocation10 + $0x3c4] ss:$24 sps:$4 sm:$0xff]  }
 0x339   :  { %v13098_v8 = vpop.f32.mrf.mxu1  ;;  %5047 = vmatmul.mubr.bf16.vlgmr.msra.gmra.mxu0 %v13041_v57  ;;  %v11727_v57 = vld [vmem:[#allocation7 + $0x6a0] ss:$24 sps:$4 sm:$0xff]  }
 0x33a   :  { %5097 = vmatpush1.bf16.msra.mxu0 %v11709_v32  ;;  %5128 = vmatprep.mubr.bf16.mxu0 %v13075_v29  ;;  %v11733_v29 = vld [vmem:[#allocation7 + $0x670] ss:$24 sps:$4 sm:$0xff]  }
 0x33b   :  { %v13102_v12 = vpop.f32.mrf.mxu1  ;;  %5098 = vmatprep.subr.bf16.mxu0 %v11714_v46  ;;  %v11903_v32 = vld [vmem:[#allocation10 + $0x754] ss:$24 sps:$4 sm:$0xff]   ;;  %v11814_v46 = vld [vmem:[#allocation10 + $0x3c0] ss:$24 sps:$4 sm:$0xff]  }
 0x33c   :  { %6991 = vmatprep.subr.bf16.mxu1 %v11903_v32  ;;  %v11855_v32 = vld [vmem:[#allocation10 + $0x15c] ss:$24 sps:$4 sm:$0xff]  }
 0x33d   :  { %v4929_v14 = vpop.f32.mrf.mxu1 }
 0x33e   :  { %5099 = vmatpush1.bf16.msra.mxu0 %v11712_v11  ;;  %v11819_v11 = vld [vmem:[#allocation10 + $0x394] ss:$24 sps:$4 sm:$0xff]   ;;  %v11817_v14 = vld [vmem:[#allocation10 + $0x390] ss:$24 sps:$4 sm:$0xff]  }
 0x33f   :  { %v4930_v15 = vpop.f32.mrf.mxu1  ;;  %5100 = vmatprep.subr.bf16.mxu0 %v11717_v13  ;;  %v11909_v13 = vld [vmem:[#allocation10 + $0x724] ss:$24 sps:$4 sm:$0xff]  }
 0x340   :  { %v11822_v15 = vld [vmem:[#allocation10 + $0x364] ss:$24 sps:$4 sm:$0xff]  }
 0x342   :  { %5101 = vmatpush1.bf16.msra.mxu0 %v11715_v36  ;;  %v11907_v36 = vld [vmem:[#allocation10 + $0x720] ss:$24 sps:$4 sm:$0xff]  }
 0x343   :  { %5102 = vmatprep.subr.bf16.mxu0 %v11723_v17  ;;  %v11915_v17 = vld [vmem:[#allocation10 + $0x6f4] ss:$24 sps:$4 sm:$0xff]  }
 0x346   :  { %5103 = vmatpush1.bf16.msra.mxu0 %v11721_v23  ;;  %v11820_v23 = vld [vmem:[#allocation10 + $0x360] ss:$24 sps:$4 sm:$0xff]  }
 0x347   :  { %5104 = vmatprep.subr.bf16.mxu0 %v11729_v25  ;;  %v11913_v25 = vld [vmem:[#allocation10 + $0x6f0] ss:$24 sps:$4 sm:$0xff]  }
 0x34a   :  { %5105 = vmatpush1.bf16.msra.mxu0 %v11727_v57  ;;  %v11825_v57 = vld [vmem:[#allocation10 + $0x334] ss:$24 sps:$4 sm:$0xff]  }
 0x34b   :  { %5106 = vmatprep.subr.bf16.mxu0 %v11735_v26  ;;  %v11921_v26 = vld [vmem:[#allocation10 + $0x6c4] ss:$24 sps:$4 sm:$0xff]  }
 0x34e   :  { %5107 = vmatpush1.bf16.msra.mxu0 %v11733_v29  ;;  %v11823_v29 = vld [vmem:[#allocation10 + $0x330] ss:$24 sps:$4 sm:$0xff]  }
 0x34f   :  { %5108 = vmatprep.subr.bf16.mxu0 %v11741_v9  ;;  %v11919_v9 = vld [vmem:[#allocation10 + $0x6c0] ss:$24 sps:$4 sm:$0xff]  }
 0x352   :  { %5109 = vmatpush1.bf16.msra.mxu0 %v11739_v16  ;;  %v11828_v16 = vld [vmem:[#allocation10 + $0x304] ss:$24 sps:$4 sm:$0xff]  }
 0x353   :  { %5110 = vmatprep.subr.bf16.mxu0 %v11747_v10  ;;  %v11927_v10 = vld [vmem:[#allocation10 + $0x694] ss:$24 sps:$4 sm:$0xff]  }
 0x356   :  { %5111 = vmatpush1.bf16.msra.mxu0 %v11745_v63  ;;  %v11826_v63 = vld [vmem:[#allocation10 + $0x300] ss:$24 sps:$4 sm:$0xff]  }
 0x357   :  { %5112 = vmatprep.subr.bf16.mxu0 %v11753_v18  ;;  %v11925_v18 = vld [vmem:[#allocation10 + $0x690] ss:$24 sps:$4 sm:$0xff]  }
 0x35a   :  { %5113 = vmatpush2.bf16.msra.mxu0 %v11751_v27  ;;  %v11831_v27 = vld [vmem:[#allocation10 + $0x5d4] ss:$24 sps:$4 sm:$0xff]  }
 0x35b   :  { %5114 = vmatprep.subr.bf16.mxu0 %v11759_v28  ;;  %v11933_v28 = vld [vmem:[#allocation10 + $0x664] ss:$24 sps:$4 sm:$0xff]  }
 0x35e   :  { %5115 = vmatpush2.bf16.msra.mxu0 %v11757_v5  ;;  %v11829_v5 = vld [vmem:[#allocation10 + $0x5d0] ss:$24 sps:$4 sm:$0xff]  }
 0x35f   :  { %5116 = vmatprep.subr.bf16.mxu0 %v11765_v30  ;;  %v11931_v30 = vld [vmem:[#allocation10 + $0x660] ss:$24 sps:$4 sm:$0xff]  }
 0x362   :  { %5117 = vmatpush2.bf16.msra.mxu0 %v11763_v31  ;;  %v11834_v31 = vld [vmem:[#allocation10 + $0x5a4] ss:$24 sps:$4 sm:$0xff]  }
 0x363   :  { %5118 = vmatprep.subr.bf16.mxu0 %v11771_v20  ;;  %v11939_v20 = vld [vmem:[#allocation10 + $0x634] ss:$24 sps:$4 sm:$0xff]  }
 0x366   :  { %5119 = vmatpush2.bf16.msra.mxu0 %v11769_v39  ;;  %v11832_v39 = vld [vmem:[#allocation10 + $0x5a0] ss:$24 sps:$4 sm:$0xff]  }
 0x367   :  { %5120 = vmatprep.subr.bf16.mxu0 %v11777_v43  ;;  %v11937_v43 = vld [vmem:[#allocation10 + $0x630] ss:$24 sps:$4 sm:$0xff]  }
 0x36a   :  { %5121 = vmatpush2.bf16.msra.mxu0 %v11775_v44  ;;  %v11837_v44 = vld [vmem:[#allocation10 + $0x574] ss:$24 sps:$4 sm:$0xff]  }
 0x36b   :  { %5122 = vmatprep.subr.bf16.mxu0 %v11783_v21  ;;  %v11945_v21 = vld [vmem:[#allocation10 + $0x604] ss:$24 sps:$4 sm:$0xff]  }
 0x36e   :  { %5123 = vmatpush2.bf16.msra.mxu0 %v11781_v22  ;;  %v11835_v22 = vld [vmem:[#allocation10 + $0x570] ss:$24 sps:$4 sm:$0xff]  }
 0x36f   :  { %5124 = vmatprep.subr.bf16.mxu0 %v11789_v47  ;;  %v11943_v47 = vld [vmem:[#allocation10 + $0x600] ss:$24 sps:$4 sm:$0xff]  }
 0x372   :  { %5125 = vmatpush2.bf16.msra.mxu0 %v11787_v48  ;;  %v11840_v48 = vld [vmem:[#allocation10 + $0x544] ss:$24 sps:$4 sm:$0xff]  }
 0x373   :  { %5126 = vmatprep.subr.bf16.mxu0 %v11795_v49  ;;  %v11951_v49 = vld [vmem:[#allocation10 + $0x8d4] ss:$24 sps:$4 sm:$0xff]  }
 0x376   :  { %5127 = vmatpush2.bf16.msra.mxu0 %v11793_v51  ;;  %v11838_v51 = vld [vmem:[#allocation10 + $0x540] ss:$24 sps:$4 sm:$0xff]  }
 0x377   :  { %6950 = vmatprep.subr.bf16.mxu0 %v11807_v50  ;;  %v11949_v50 = vld [vmem:[#allocation10 + $0x8d0] ss:$24 sps:$4 sm:$0xff]  }
 0x379   :  { %5129 = vmatmul.mubr.bf16.vlgmr.msra.gmra.mxu0 %v13077_v19  ;;  %v4884_v55 = vpop.f32.mrf.mxu0  ;;  %v13105_v56 = vpop.f32.mrf.mxu1  ;;  %v11811_v19 = vld [vmem:[#allocation10 + $0x3f0] ss:$24 sps:$4 sm:$0xff]  }
 0x37a   :  { %v4885_v58 = vadd.f32 %v4884_v55, %v13093_v62  ;;  %6951 = vmatpush1.bf16.msra.mxu0 %v11805_v52  ;;  %v11843_v52 = vld [vmem:[#allocation10 + $0x514] ss:$24 sps:$4 sm:$0xff]   ;;  %v11841_v55 = vld [vmem:[#allocation10 + $0x510] ss:$24 sps:$4 sm:$0xff]  }
 0x37b   :  { %v4886_v61 = vpop.f32.mrf.mxu0  ;;  %v13108_v38 = vpop.f32.mrf.mxu1  ;;  %6952 = vmatprep.subr.bf16.mxu0 %v11810_v54  ;;  %v11957_v54 = vld [vmem:[#allocation10 + $0x8a4] ss:$24 sps:$4 sm:$0xff]  }
 0x37c   :  { %v4887_v0 = vadd.f32 %v4886_v61, %v13096_v3  ;;  %v5137_v1 = vmax.f32 %v4885_v58, 0.0  ;;  %v11901_v3 = vld [vmem:[#allocation10 + $0x750] ss:$24 sps:$4 sm:$0xff]   ;;  %v11955_v58 = vld [vmem:[#allocation10 + $0x8a0] ss:$24 sps:$4 sm:$0xff]  }
 0x37d   :  { %v4888_v2 = vpop.f32.mrf.mxu0  ;;  %v5011_v34 = vpop.f32.mrf.mxu1  ;;  %v11963_v61 = vld [vmem:[#allocation10 + $0x874] ss:$24 sps:$4 sm:$0xff]  }
 0x37e   :  { %v5138_v4 = vmax.f32 %v4887_v0, 0.0  ;;  %6953 = vmatpush1.bf16.msra.mxu0 %v11808_v24  ;;  %v13113_v33 = vpack.c.bf16 %v5137_v1, %v5137_v1  ;;  %v11846_v24 = vld [vmem:[#allocation10 + $0x4e4] ss:$24 sps:$4 sm:$0xff]   ;;  %v11961_v0 = vld [vmem:[#allocation10 + $0x870] ss:$24 sps:$4 sm:$0xff]  }
 0x37f   :  { %v4889_v53 = vpop.f32.mrf.mxu0  ;;  %v5012_v6 = vpop.f32.mrf.mxu1  ;;  %6954 = vmatprep.subr.bf16.mxu0 %v11813_v35  ;;  %v11844_v35 = vld [vmem:[#allocation10 + $0x4e0] ss:$24 sps:$4 sm:$0xff]   ;;  %v11849_v1 = vld [vmem:[#allocation10 + $0x4b4] ss:$24 sps:$4 sm:$0xff]   ;;  %v11969_v2 = vld [vmem:[#allocation10 + $0x844] ss:$24 sps:$4 sm:$0xff]  }
 0x380   :  { %v13111_v62 = vpack.c.bf16 %v5138_v4, %v5138_v4  ;;  %v11847_v34 = vld [vmem:[#allocation10 + $0x4b0] ss:$24 sps:$4 sm:$0xff]   ;;  %v11967_v4 = vld [vmem:[#allocation10 + $0x840] ss:$24 sps:$4 sm:$0xff]   ;;  %v11975_v53 = vld [vmem:[#allocation10 + $0x814] ss:$24 sps:$4 sm:$0xff]  }
 0x381   :  { %v11850_v6 = vld [vmem:[#allocation10 + $0x480] ss:$24 sps:$4 sm:$0xff]  }
 0x382   :  { %6941 = vmatprep.mubr.bf16.mxu1 %v13111_v62  ;;  %6955 = vmatpush1.bf16.msra.mxu0 %v11811_v19  ;;  %v11852_v19 = vld [vmem:[#allocation10 + $0x484] ss:$24 sps:$4 sm:$0xff]  }
 0x383   :  { %6942 = vmatmul.mubr.bf16.vlgmr.msra.gmra.mxu1 %v13113_v33  ;;  %6956 = vmatprep.subr.bf16.mxu0 %v11816_v7  ;;  %v11973_v7 = vld [vmem:[#allocation10 + $0x810] ss:$24 sps:$4 sm:$0xff]  }
 0x384   :  { %6992 = vmatpush1.bf16.msra.mxu1 %v11901_v3  ;;  %v11981_v3 = vld [vmem:[#allocation10 + $0x7e4] ss:$24 sps:$4 sm:$0xff]  }
 0x385   :  { %6993 = vmatprep.subr.bf16.mxu1 %v11909_v13  ;;  %v11979_v13 = vld [vmem:[#allocation10 + $0x7e0] ss:$24 sps:$4 sm:$0xff]  }
 0x386   :  { %6957 = vmatpush1.bf16.msra.mxu0 %v11814_v46  ;;  %v3309_v46 = vrot.slane %v13085_v40, %v13027_v41 }
 0x387   :  { %6958 = vmatprep.subr.bf16.mxu0 %v11819_v11  ;;  %v3313_v11 = vrot.slane %v13085_v40, %v13030_v37 }
 0x388   :  { %6994 = vmatpush1.bf16.msra.mxu1 %v11907_v36 }
 0x389   :  { %6995 = vmatprep.subr.bf16.mxu1 %v11915_v17  ;;  %v11987_v17 = vld [vmem:[#allocation10 + $0x7b4] ss:$24 sps:$4 sm:$0xff]  }
 0x38a   :  { %6959 = vmatpush1.bf16.msra.mxu0 %v11817_v14  ;;  %v4926_v14 = vadd.f32 %v13098_v8, %v3309_v46  ;;  %v11993_v8 = vld [vmem:[#allocation10 + $0x784] ss:$24 sps:$4 sm:$0xff]   ;;  %v11895_v46 = vld [vmem:[#allocation10 + $0x1b8] ss:$24 sps:$4 sm:$0xff]  }
 0x38b   :  { %6960 = vmatprep.subr.bf16.mxu0 %v11822_v15 }
 0x38c   :  { %6996 = vmatpush1.bf16.msra.mxu1 %v11913_v25 }
 0x38d   :  { %6997 = vmatprep.subr.bf16.mxu1 %v11921_v26 }
 0x38e   :  { %6961 = vmatpush1.bf16.msra.mxu0 %v11820_v23  ;;  %v4928_v23 = vadd.f32 %v13102_v12, %v3313_v11  ;;  %v11900_v11 = vld [vmem:[#allocation10 + $0x18c] ss:$24 sps:$4 sm:$0xff]  }
 0x38f   :  { %6962 = vmatprep.subr.bf16.mxu0 %v11825_v57  ;;  %v11985_v57 = vld [vmem:[#allocation10 + $0x7b0] ss:$24 sps:$4 sm:$0xff]  }
 0x390   :  { %6998 = vmatpush1.bf16.msra.mxu1 %v11919_v9 }
 0x391   :  { %6999 = vmatprep.subr.bf16.mxu1 %v11927_v10 }
 0x392   :  { %6963 = vmatpush1.bf16.msra.mxu0 %v11823_v29 }
 0x393   :  { %6964 = vmatprep.subr.bf16.mxu0 %v11828_v16 }
 0x394   :  { %7000 = vmatpush1.bf16.msra.mxu1 %v11925_v18  ;;  %v11991_v18 = vld [vmem:[#allocation10 + $0x780] ss:$24 sps:$4 sm:$0xff]  }
 0x395   :  { %7001 = vmatprep.subr.bf16.mxu1 %v11933_v28 }
 0x396   :  { %6965 = vmatpush1.bf16.msra.mxu0 %v11826_v63 }
 0x397   :  { %6966 = vmatprep.subr.bf16.mxu0 %v11831_v27 }
 0x398   :  { %7002 = vmatpush1.bf16.msra.mxu1 %v11931_v30  ;;  %v11999_v30 = vld [vmem:[#allocation10 + $0x45c] ss:$24 sps:$4 sm:$0xff]  }
 0x399   :  { %7003 = vmatprep.subr.bf16.mxu1 %v11939_v20  ;;  %v11853_v20 = vld [vmem:[#allocation10 + $0x158] ss:$24 sps:$4 sm:$0xff]  }
 0x39a   :  { %6967 = vmatpush2.bf16.msra.mxu0 %v11829_v5 }
 0x39b   :  { %6968 = vmatprep.subr.bf16.mxu0 %v11834_v31 }
 0x39c   :  { %7004 = vmatpush1.bf16.msra.mxu1 %v11937_v43  ;;  %v11861_v43 = vld [vmem:[#allocation10 + $0xfc] ss:$24 sps:$4 sm:$0xff]  }
 0x39d   :  { %7005 = vmatprep.subr.bf16.mxu1 %v11945_v21  ;;  %v11864_v21 = vld [vmem:[#allocation10 + $0xcc] ss:$24 sps:$4 sm:$0xff]  }
 0x39e   :  { %6969 = vmatpush2.bf16.msra.mxu0 %v11832_v39 }
 0x39f   :  { %6970 = vmatprep.subr.bf16.mxu0 %v11837_v44  ;;  %v11859_v44 = vld [vmem:[#allocation10 + $0xf8] ss:$24 sps:$4 sm:$0xff]  }
 0x3a0   :  { %7006 = vmatpush1.bf16.msra.mxu1 %v11943_v47  ;;  %v11867_v47 = vld [vmem:[#allocation10 + $0x9c] ss:$24 sps:$4 sm:$0xff]  }
 0x3a1   :  { %7007 = vmatprep.subr.bf16.mxu1 %v11951_v49  ;;  %v11870_v49 = vld [vmem:[#allocation10 + $0x6c] ss:$24 sps:$4 sm:$0xff]  }
 0x3a2   :  { %6971 = vmatpush2.bf16.msra.mxu0 %v11835_v22  ;;  %v11862_v22 = vld [vmem:[#allocation10 + $0xc8] ss:$24 sps:$4 sm:$0xff]  }
 0x3a3   :  { %6972 = vmatprep.subr.bf16.mxu0 %v11840_v48  ;;  %v11865_v48 = vld [vmem:[#allocation10 + $0x98] ss:$24 sps:$4 sm:$0xff]  }
 0x3a4   :  { %7008 = vmatpush2.bf16.msra.mxu1 %v11949_v50  ;;  %v11873_v50 = vld [vmem:[#allocation10 + $0x3c] ss:$24 sps:$4 sm:$0xff]  }
 0x3a5   :  { %7009 = vmatprep.subr.bf16.mxu1 %v11957_v54  ;;  %v11876_v54 = vld [vmem:[#allocation10 + $0xc] ss:$24 sps:$4 sm:$0xff]  }
 0x3a6   :  { %6973 = vmatpush2.bf16.msra.mxu0 %v11838_v51  ;;  %v11868_v51 = vld [vmem:[#allocation10 + $0x68] ss:$24 sps:$4 sm:$0xff]  }
 0x3a7   :  { %6974 = vmatprep.subr.bf16.mxu0 %v11843_v52  ;;  %v11871_v52 = vld [vmem:[#allocation10 + $0x38] ss:$24 sps:$4 sm:$0xff]  }
 0x3a8   :  { %7010 = vmatpush2.bf16.msra.mxu1 %v11955_v58  ;;  %v11879_v58 = vld [vmem:[#allocation10 + $0x2dc] ss:$24 sps:$4 sm:$0xff]  }
 0x3a9   :  { %7011 = vmatprep.subr.bf16.mxu1 %v11963_v61  ;;  %v11882_v61 = vld [vmem:[#allocation10 + $0x2ac] ss:$24 sps:$4 sm:$0xff]  }
 0x3aa   :  { %6975 = vmatpush2.bf16.msra.mxu0 %v11841_v55  ;;  %v11874_v55 = vld [vmem:[#allocation10 + $0x8] ss:$24 sps:$4 sm:$0xff]  }
 0x3ab   :  { %6976 = vmatprep.subr.bf16.mxu0 %v11846_v24  ;;  %v11877_v24 = vld [vmem:[#allocation10 + $0x2d8] ss:$24 sps:$4 sm:$0xff]  }
 0x3ac   :  { %7012 = vmatpush2.bf16.msra.mxu1 %v11961_v0  ;;  %v11885_v0 = vld [vmem:[#allocation10 + $0x27c] ss:$24 sps:$4 sm:$0xff]  }
 0x3ad   :  { %7013 = vmatprep.subr.bf16.mxu1 %v11969_v2  ;;  %v11888_v2 = vld [vmem:[#allocation10 + $0x24c] ss:$24 sps:$4 sm:$0xff]  }
 0x3ae   :  { %6977 = vmatpush2.bf16.msra.mxu0 %v11844_v35  ;;  %v11880_v35 = vld [vmem:[#allocation10 + $0x2a8] ss:$24 sps:$4 sm:$0xff]  }
 0x3af   :  { %6978 = vmatprep.subr.bf16.mxu0 %v11849_v1  ;;  %v11883_v1 = vld [vmem:[#allocation10 + $0x278] ss:$24 sps:$4 sm:$0xff]  }
 0x3b0   :  { %7014 = vmatpush2.bf16.msra.mxu1 %v11967_v4  ;;  %v11891_v4 = vld [vmem:[#allocation10 + $0x21c] ss:$24 sps:$4 sm:$0xff]  }
 0x3b1   :  { %7015 = vmatprep.subr.bf16.mxu1 %v11975_v53  ;;  %v11894_v53 = vld [vmem:[#allocation10 + $0x1ec] ss:$24 sps:$4 sm:$0xff]  }
 0x3b2   :  { %6979 = vmatpush2.bf16.msra.mxu0 %v11847_v34  ;;  %v11886_v34 = vld [vmem:[#allocation10 + $0x248] ss:$24 sps:$4 sm:$0xff]  }
 0x3b3   :  { %6980 = vmatprep.subr.bf16.mxu0 %v11852_v19  ;;  %v11889_v19 = vld [vmem:[#allocation10 + $0x218] ss:$24 sps:$4 sm:$0xff]  }
 0x3b4   :  { %7016 = vmatpush2.bf16.msra.mxu1 %v11973_v7  ;;  %v11897_v7 = vld [vmem:[#allocation10 + $0x1bc] ss:$24 sps:$4 sm:$0xff]  }
 0x3b5   :  { %7017 = vmatprep.subr.bf16.mxu1 %v11981_v3 }
 0x3b6   :  { %6981 = vmatpush2.bf16.msra.mxu0 %v11850_v6  ;;  %v11892_v6 = vld [vmem:[#allocation10 + $0x1e8] ss:$24 sps:$4 sm:$0xff]  }
 0x3b7   :  { %7032 = vmatprep.subr.bf16.mxu0 %v11855_v32 }
 0x3b8   :  { %7018 = vmatpush2.bf16.msra.mxu1 %v11979_v13 }
 0x3b9   :  { %v4966_v36 = vpop.f32.mrf.mxu0  ;;  %v13122_v15 = vpop.f32.mrf.mxu1  ;;  %7019 = vmatprep.subr.bf16.mxu1 %v11987_v17  ;;  %v11906_v17 = vld [vmem:[#allocation10 + $0x75c] ss:$24 sps:$4 sm:$0xff]  }
 0x3ba   :  { %v4967_v25 = vadd.f32 %v4966_v36, %v4926_v14  ;;  %v11898_v14 = vld [vmem:[#allocation10 + $0x188] ss:$24 sps:$4 sm:$0xff]  }
 0x3bb   :  { %v4968_v26 = vpop.f32.mrf.mxu0  ;;  %v13125_v29 = vpop.f32.mrf.mxu1 }
 0x3bc   :  { %v5008_v40 = vadd.f32 %v13105_v56, %v4967_v25  ;;  %v4969_v9 = vadd.f32 %v4968_v26, %v4928_v23  ;;  %7020 = vmatpush2.bf16.msra.mxu1 %v11985_v57  ;;  %v11858_v56 = vld [vmem:[#allocation10 + $0x12c] ss:$24 sps:$4 sm:$0xff]   ;;  %v11904_v23 = vld [vmem:[#allocation10 + $0x758] ss:$24 sps:$4 sm:$0xff]   ;;  %v11910_v57 = vld [vmem:[#allocation10 + $0x728] ss:$24 sps:$4 sm:$0xff]  }
 0x3bd   :  { %v4970_v16 = vpop.f32.mrf.mxu0  ;;  %v5093_v10 = vpop.f32.mrf.mxu1  ;;  %7021 = vmatprep.subr.bf16.mxu1 %v11993_v8  ;;  %v11912_v25 = vld [vmem:[#allocation10 + $0x72c] ss:$24 sps:$4 sm:$0xff]   ;;  %v11918_v26 = vld [vmem:[#allocation10 + $0x6fc] ss:$24 sps:$4 sm:$0xff]   ;;  %v11928_v8 = vld [vmem:[#allocation10 + $0x698] ss:$24 sps:$4 sm:$0xff]  }
 0x3be   :  { %v5010_v63 = vadd.f32 %v13108_v38, %v4969_v9  ;;  %v5139_v27 = vmax.f32 %v5008_v40, 0.0  ;;  %v11856_v38 = vld [vmem:[#allocation10 + $0x128] ss:$24 sps:$4 sm:$0xff]   ;;  %v11916_v40 = vld [vmem:[#allocation10 + $0x6f8] ss:$24 sps:$4 sm:$0xff]  }
 0x3bf   :  { %v4971_v28 = vpop.f32.mrf.mxu0  ;;  %v5094_v5 = vpop.f32.mrf.mxu1  ;;  %v11924_v9 = vld [vmem:[#allocation10 + $0x6cc] ss:$24 sps:$4 sm:$0xff]   ;;  %v11922_v16 = vld [vmem:[#allocation10 + $0x6c8] ss:$24 sps:$4 sm:$0xff]   ;;  %v11930_v10 = vld [vmem:[#allocation10 + $0x69c] ss:$24 sps:$4 sm:$0xff]  }
 0x3c0   :  { %v5140_v12 = vmax.f32 %v5010_v63, 0.0  ;;  %7022 = vmatpush2.bf16.msra.mxu1 %v11991_v18  ;;  %v13131_v39 = vpack.c.bf16 %v5139_v27, %v5139_v27  ;;  %v11936_v63 = vld [vmem:[#allocation10 + $0x66c] ss:$24 sps:$4 sm:$0xff]   ;;  %v11934_v18 = vld [vmem:[#allocation10 + $0x668] ss:$24 sps:$4 sm:$0xff]  }
 0x3c1   :  { %7073 = vmatprep.subr.bf16.mxu1 %v11999_v30  ;;  %v11942_v27 = vld [vmem:[#allocation10 + $0x63c] ss:$24 sps:$4 sm:$0xff]   ;;  %v11940_v28 = vld [vmem:[#allocation10 + $0x638] ss:$24 sps:$4 sm:$0xff]   ;;  %v11948_v5 = vld [vmem:[#allocation10 + $0x60c] ss:$24 sps:$4 sm:$0xff]  }
 0x3c2   :  { %v13129_v31 = vpack.c.bf16 %v5140_v12, %v5140_v12  ;;  %v11946_v12 = vld [vmem:[#allocation10 + $0x608] ss:$24 sps:$4 sm:$0xff]   ;;  %v11954_v30 = vld [vmem:[#allocation10 + $0x8dc] ss:$24 sps:$4 sm:$0xff]  }
 0x3c4   :  { %6982 = vmatprep.mubr.bf16.mxu0 %v13129_v31 }
 0x3c5   :  { %6983 = vmatmul.mubr.bf16.vlgmr.msra.gmra.mxu0 %v13131_v39 }
 0x3c6   :  { %7033 = vmatpush1.bf16.msra.mxu0 %v11853_v20  ;;  %7064 = vmatprep.mubr.bf16.mxu0 %v13111_v62  ;;  %v11952_v20 = vld [vmem:[#allocation10 + $0x8d8] ss:$24 sps:$4 sm:$0xff]  }
 0x3c7   :  { %7034 = vmatprep.subr.bf16.mxu0 %v11858_v56  ;;  %v11960_v56 = vld [vmem:[#allocation10 + $0x8ac] ss:$24 sps:$4 sm:$0xff]  }
 0x3ca   :  { %7035 = vmatpush1.bf16.msra.mxu0 %v11856_v38  ;;  %v11958_v38 = vld [vmem:[#allocation10 + $0x8a8] ss:$24 sps:$4 sm:$0xff]  }
 0x3cb   :  { %7036 = vmatprep.subr.bf16.mxu0 %v11861_v43  ;;  %v11966_v43 = vld [vmem:[#allocation10 + $0x87c] ss:$24 sps:$4 sm:$0xff]  }
 0x3ce   :  { %7037 = vmatpush1.bf16.msra.mxu0 %v11859_v44  ;;  %v11964_v44 = vld [vmem:[#allocation10 + $0x878] ss:$24 sps:$4 sm:$0xff]  }
 0x3cf   :  { %7038 = vmatprep.subr.bf16.mxu0 %v11864_v21  ;;  %v11972_v21 = vld [vmem:[#allocation10 + $0x84c] ss:$24 sps:$4 sm:$0xff]  }
 0x3d2   :  { %7039 = vmatpush1.bf16.msra.mxu0 %v11862_v22  ;;  %v11970_v22 = vld [vmem:[#allocation10 + $0x848] ss:$24 sps:$4 sm:$0xff]  }
 0x3d3   :  { %7040 = vmatprep.subr.bf16.mxu0 %v11867_v47  ;;  %v11978_v47 = vld [vmem:[#allocation10 + $0x81c] ss:$24 sps:$4 sm:$0xff]  }
 0x3d6   :  { %7041 = vmatpush1.bf16.msra.mxu0 %v11865_v48  ;;  %v12623_v48 = vld [vmem:[#allocation8] sm:$0x3f] }
 0x3d7   :  { %7042 = vmatprep.subr.bf16.mxu0 %v11870_v49  ;;  %v3317_v49 = vrot.slane %v12623_v48, %v13063_v59 }
 0x3da   :  { %7043 = vmatpush1.bf16.msra.mxu0 %v11868_v51  ;;  %v3321_v51 = vrot.slane %v12623_v48, %v13066_v60  ;;  %v12036_v48 = vld [vmem:[#allocation10 + $0x340] ss:$24 sps:$4 sm:$0xff]  }
 0x3db   :  { %7044 = vmatprep.subr.bf16.mxu0 %v11873_v50  ;;  %v11976_v50 = vld [vmem:[#allocation10 + $0x818] ss:$24 sps:$4 sm:$0xff]  }
 0x3de   :  { %7045 = vmatpush1.bf16.msra.mxu0 %v11871_v52  ;;  %v11984_v52 = vld [vmem:[#allocation10 + $0x7ec] ss:$24 sps:$4 sm:$0xff]  }
 0x3df   :  { %7046 = vmatprep.subr.bf16.mxu0 %v11876_v54 }
 0x3e2   :  { %7047 = vmatpush1.bf16.msra.mxu0 %v11874_v55 }
 0x3e3   :  { %7048 = vmatprep.subr.bf16.mxu0 %v11879_v58  ;;  %v11982_v58 = vld [vmem:[#allocation10 + $0x7e8] ss:$24 sps:$4 sm:$0xff]  }
 0x3e6   :  { %7049 = vmatpush2.bf16.msra.mxu0 %v11877_v24  ;;  %v11990_v24 = vld [vmem:[#allocation10 + $0x7bc] ss:$24 sps:$4 sm:$0xff]  }
 0x3e7   :  { %7050 = vmatprep.subr.bf16.mxu0 %v11882_v61 }
 0x3ea   :  { %7051 = vmatpush2.bf16.msra.mxu0 %v11880_v35 }
 0x3eb   :  { %7052 = vmatprep.subr.bf16.mxu0 %v11885_v0 }
 0x3ee   :  { %7053 = vmatpush2.bf16.msra.mxu0 %v11883_v1 }
 0x3ef   :  { %7054 = vmatprep.subr.bf16.mxu0 %v11888_v2  ;;  %v11988_v2 = vld [vmem:[#allocation10 + $0x7b8] ss:$24 sps:$4 sm:$0xff]  }
 0x3f2   :  { %7055 = vmatpush2.bf16.msra.mxu0 %v11886_v34 }
 0x3f3   :  { %7056 = vmatprep.subr.bf16.mxu0 %v11891_v4  ;;  %v11996_v4 = vld [vmem:[#allocation10 + $0x78c] ss:$24 sps:$4 sm:$0xff]  }
 0x3f6   :  { %7057 = vmatpush2.bf16.msra.mxu0 %v11889_v19 }
 0x3f7   :  { %7058 = vmatprep.subr.bf16.mxu0 %v11894_v53 }
 0x3f9   :  { %v13136_v32 = vpop.f32.mrf.mxu0 }
 0x3fa   :  { %7059 = vmatpush2.bf16.msra.mxu0 %v11892_v6  ;;  %v5049_v54 = vadd.f32 %v13136_v32, %v3317_v49  ;;  %v11994_v32 = vld [vmem:[#allocation10 + $0x788] ss:$24 sps:$4 sm:$0xff]   ;;  %v12044_v49 = vld [vmem:[#allocation10 + $0x314] ss:$24 sps:$4 sm:$0xff]  }
 0x3fb   :  { %v13138_v3 = vpop.f32.mrf.mxu0  ;;  %7060 = vmatprep.subr.bf16.mxu0 %v11897_v7 }
 0x3fc   :  { %v5051_v55 = vadd.f32 %v13138_v3, %v3321_v51  ;;  %v5090_v61 = vadd.f32 %v13122_v15, %v5049_v54  ;;  %v11997_v15 = vld [vmem:[#allocation10 + $0x458] ss:$24 sps:$4 sm:$0xff]   ;;  %v12039_v51 = vld [vmem:[#allocation10 + $0x308] ss:$24 sps:$4 sm:$0xff]   ;;  %v12050_v54 = vld [vmem:[#allocation10 + $0x5e4] ss:$24 sps:$4 sm:$0xff]  }
 0x3fd   :  { %v5052_v13 = vpop.f32.mrf.mxu0 }
 0x3fe   :  { %7061 = vmatpush2.bf16.msra.mxu0 %v11895_v46  ;;  %v5092_v1 = vadd.f32 %v13125_v29, %v5051_v55  ;;  %v12002_v13 = vld [vmem:[#allocation10 + $0x464] ss:$24 sps:$4 sm:$0xff]   ;;  %v12000_v29 = vld [vmem:[#allocation10 + $0x460] ss:$24 sps:$4 sm:$0xff]  }
 0x3ff   :  { %v5053_v36 = vpop.f32.mrf.mxu0  ;;  %7062 = vmatprep.subr.bf16.mxu0 %v11900_v11  ;;  %v12045_v55 = vld [vmem:[#allocation10 + $0x5d8] ss:$24 sps:$4 sm:$0xff]  }
 0x400   :  { %v12005_v36 = vld [vmem:[#allocation10 + $0x42c] ss:$24 sps:$4 sm:$0xff]  }
 0x402   :  { %7063 = vmatpush2.bf16.msra.mxu0 %v11898_v14 }
 0x403   :  { %7114 = vmatprep.subr.bf16.mxu0 %v11906_v17  ;;  %v12008_v17 = vld [vmem:[#allocation10 + $0x434] ss:$24 sps:$4 sm:$0xff]  }
 0x405   :  { %7065 = vmatmul.mubr.bf16.vlgmr.msra.gmra.mxu0 %v13113_v33 }
 0x406   :  { %7115 = vmatpush1.bf16.msra.mxu0 %v11904_v23  ;;  %v12003_v23 = vld [vmem:[#allocation10 + $0x428] ss:$24 sps:$4 sm:$0xff]  }
 0x407   :  { %7116 = vmatprep.subr.bf16.mxu0 %v11912_v25 }
 0x40a   :  { %7117 = vmatpush1.bf16.msra.mxu0 %v11910_v57  ;;  %v12011_v57 = vld [vmem:[#allocation10 + $0x3fc] ss:$24 sps:$4 sm:$0xff]  }
 0x40b   :  { %7118 = vmatprep.subr.bf16.mxu0 %v11918_v26  ;;  %v12006_v26 = vld [vmem:[#allocation10 + $0x430] ss:$24 sps:$4 sm:$0xff]  }
 0x40e   :  { %7119 = vmatpush1.bf16.msra.mxu0 %v11916_v40 }
 0x40f   :  { %7120 = vmatprep.subr.bf16.mxu0 %v11924_v9  ;;  %v12014_v9 = vld [vmem:[#allocation10 + $0x404] ss:$24 sps:$4 sm:$0xff]  }
 0x412   :  { %7121 = vmatpush1.bf16.msra.mxu0 %v11922_v16  ;;  %v12009_v16 = vld [vmem:[#allocation10 + $0x3f8] ss:$24 sps:$4 sm:$0xff]  }
 0x413   :  { %7122 = vmatprep.subr.bf16.mxu0 %v11930_v10 }
 0x416   :  { %7123 = vmatpush1.bf16.msra.mxu0 %v11928_v8  ;;  %v12017_v8 = vld [vmem:[#allocation10 + $0x3cc] ss:$24 sps:$4 sm:$0xff]  }
 0x417   :  { %7124 = vmatprep.subr.bf16.mxu0 %v11936_v63  ;;  %v12012_v63 = vld [vmem:[#allocation10 + $0x400] ss:$24 sps:$4 sm:$0xff]  }
 0x41a   :  { %7125 = vmatpush1.bf16.msra.mxu0 %v11934_v18  ;;  %v12020_v18 = vld [vmem:[#allocation10 + $0x3d4] ss:$24 sps:$4 sm:$0xff]  }
 0x41b   :  { %7126 = vmatprep.subr.bf16.mxu0 %v11942_v27  ;;  %v12015_v27 = vld [vmem:[#allocation10 + $0x3c8] ss:$24 sps:$4 sm:$0xff]  }
 0x41e   :  { %7127 = vmatpush1.bf16.msra.mxu0 %v11940_v28  ;;  %v12023_v28 = vld [vmem:[#allocation10 + $0x39c] ss:$24 sps:$4 sm:$0xff]  }
 0x41f   :  { %7128 = vmatprep.subr.bf16.mxu0 %v11948_v5  ;;  %v12026_v5 = vld [vmem:[#allocation10 + $0x3a4] ss:$24 sps:$4 sm:$0xff]  }
 0x422   :  { %7129 = vmatpush1.bf16.msra.mxu0 %v11946_v12  ;;  %v12021_v12 = vld [vmem:[#allocation10 + $0x398] ss:$24 sps:$4 sm:$0xff]  }
 0x423   :  { %7130 = vmatprep.subr.bf16.mxu0 %v11954_v30  ;;  %v12029_v30 = vld [vmem:[#allocation10 + $0x36c] ss:$24 sps:$4 sm:$0xff]  }
 0x426   :  { %7131 = vmatpush2.bf16.msra.mxu0 %v11952_v20  ;;  %v12024_v20 = vld [vmem:[#allocation10 + $0x3a0] ss:$24 sps:$4 sm:$0xff]  }
 0x427   :  { %7132 = vmatprep.subr.bf16.mxu0 %v11960_v56  ;;  %v12032_v56 = vld [vmem:[#allocation10 + $0x374] ss:$24 sps:$4 sm:$0xff]  }
 0x42a   :  { %7133 = vmatpush2.bf16.msra.mxu0 %v11958_v38  ;;  %v12027_v38 = vld [vmem:[#allocation10 + $0x368] ss:$24 sps:$4 sm:$0xff]  }
 0x42b   :  { %7134 = vmatprep.subr.bf16.mxu0 %v11966_v43  ;;  %v12035_v43 = vld [vmem:[#allocation10 + $0x33c] ss:$24 sps:$4 sm:$0xff]  }
 0x42e   :  { %7135 = vmatpush2.bf16.msra.mxu0 %v11964_v44  ;;  %v12030_v44 = vld [vmem:[#allocation10 + $0x370] ss:$24 sps:$4 sm:$0xff]  }
 0x42f   :  { %7136 = vmatprep.subr.bf16.mxu0 %v11972_v21  ;;  %v12038_v21 = vld [vmem:[#allocation10 + $0x344] ss:$24 sps:$4 sm:$0xff]  }
 0x432   :  { %7137 = vmatpush2.bf16.msra.mxu0 %v11970_v22  ;;  %v12033_v22 = vld [vmem:[#allocation10 + $0x338] ss:$24 sps:$4 sm:$0xff]  }
 0x433   :  { %7138 = vmatprep.subr.bf16.mxu0 %v11978_v47  ;;  %v12041_v47 = vld [vmem:[#allocation10 + $0x30c] ss:$24 sps:$4 sm:$0xff]  }
 0x436   :  { %7139 = vmatpush2.bf16.msra.mxu0 %v11976_v50  ;;  %v12047_v50 = vld [vmem:[#allocation10 + $0x5dc] ss:$24 sps:$4 sm:$0xff]  }
 0x437   :  { %7140 = vmatprep.subr.bf16.mxu0 %v11984_v52  ;;  %v12042_v52 = vld [vmem:[#allocation10 + $0x310] ss:$24 sps:$4 sm:$0xff]  }
 0x439   :  { %v5130_v35 = vpop.f32.mrf.mxu0 }
 0x43a   :  { %v5131_v0 = vadd.f32 %v5130_v35, %v5090_v61  ;;  %7141 = vmatpush2.bf16.msra.mxu0 %v11982_v58  ;;  %v12053_v58 = vld [vmem:[#allocation10 + $0x5ac] ss:$24 sps:$4 sm:$0xff]   ;;  %v12051_v35 = vld [vmem:[#allocation10 + $0x5a8] ss:$24 sps:$4 sm:$0xff]  }
 0x43b   :  { %v5132_v34 = vpop.f32.mrf.mxu0  ;;  %7142 = vmatprep.subr.bf16.mxu0 %v11990_v24  ;;  %v12048_v24 = vld [vmem:[#allocation10 + $0x5e0] ss:$24 sps:$4 sm:$0xff]   ;;  %v12056_v61 = vld [vmem:[#allocation10 + $0x5b4] ss:$24 sps:$4 sm:$0xff]  }
 0x43c   :  { %v5133_v19 = vadd.f32 %v5132_v34, %v5092_v1  ;;  %v5141_v53 = vmax.f32 %v5131_v0, 0.0  ;;  %v12059_v0 = vld [vmem:[#allocation10 + $0x57c] ss:$24 sps:$4 sm:$0xff]   ;;  %v12054_v1 = vld [vmem:[#allocation10 + $0x5b0] ss:$24 sps:$4 sm:$0xff]  }
 0x43d   :  { %v5134_v6 = vpop.f32.mrf.mxu0  ;;  %v12057_v34 = vld [vmem:[#allocation10 + $0x578] ss:$24 sps:$4 sm:$0xff]  }
 0x43e   :  { %v5142_v7 = vmax.f32 %v5133_v19, 0.0  ;;  %7143 = vmatpush2.bf16.msra.mxu0 %v11988_v2  ;;  %v13149_v11 = vpack.c.bf16 %v5141_v53, %v5141_v53  ;;  %v12062_v2 = vld [vmem:[#allocation10 + $0x584] ss:$24 sps:$4 sm:$0xff]   ;;  %v12060_v19 = vld [vmem:[#allocation10 + $0x580] ss:$24 sps:$4 sm:$0xff]  }
 0x43f   :  { %v5135_v46 = vpop.f32.mrf.mxu0  ;;  %7144 = vmatprep.subr.bf16.mxu0 %v11996_v4  ;;  %v12065_v4 = vld [vmem:[#allocation10 + $0x54c] ss:$24 sps:$4 sm:$0xff]   ;;  %v12063_v6 = vld [vmem:[#allocation10 + $0x548] ss:$24 sps:$4 sm:$0xff]  }
 0x440   :  { %v13147_v3 = vpack.c.bf16 %v5142_v7, %v5142_v7  ;;  %v12068_v53 = vld [vmem:[#allocation10 + $0x554] ss:$24 sps:$4 sm:$0xff]   ;;  %v12074_v46 = vld [vmem:[#allocation10 + $0x524] ss:$24 sps:$4 sm:$0xff]  }
 0x441   :  { %v12071_v7 = vld [vmem:[#allocation10 + $0x51c] ss:$24 sps:$4 sm:$0xff]  }
 0x442   :  { %7145 = vmatpush2.bf16.msra.mxu0 %v11994_v32  ;;  %7023 = vmatprep.mubr.bf16.mxu1 %v13147_v3  ;;  %v12066_v32 = vld [vmem:[#allocation10 + $0x550] ss:$24 sps:$4 sm:$0xff]  }
 0x443   :  { %7146 = vmatprep.mubr.bf16.mxu0 %v13147_v3  ;;  %7024 = vmatmul.mubr.bf16.vlgmr.msra.gmra.mxu1 %v13149_v11  ;;  %v13154_v14 = vpop.f32.mrf.mxu1 }
 0x444   :  { %7074 = vmatpush1.bf16.msra.mxu1 %v11997_v15  ;;  %7105 = vmatprep.mubr.bf16.mxu1 %v13129_v31  ;;  %v12069_v15 = vld [vmem:[#allocation10 + $0x518] ss:$24 sps:$4 sm:$0xff]  }
 0x445   :  { %7147 = vmatmul.mubr.bf16.vlgmr.msra.gmra.mxu0 %v13149_v11  ;;  %7196 = vmatprep.subr.bf16.mxu0 %v12002_v13  ;;  %v13158_v25 = vpop.f32.mrf.mxu1  ;;  %v12077_v13 = vld [vmem:[#allocation10 + $0x4ec] ss:$24 sps:$4 sm:$0xff]  }
 0x446   :  { %7197 = vmatpush1.bf16.msra.mxu0 %v12000_v29  ;;  %7228 = vmatprep.mubr.bf16.mxu0 %v13129_v31  ;;  %v12018_v31 = vld [vmem:[#allocation10 + $0x3d0] ss:$24 sps:$4 sm:$0xff]   ;;  %v12072_v29 = vld [vmem:[#allocation10 + $0x520] ss:$24 sps:$4 sm:$0xff]  }
 0x447   :  { %7075 = vmatprep.subr.bf16.mxu1 %v12005_v36  ;;  %v6947_v40 = vpop.f32.mrf.mxu1  ;;  %7198 = vmatprep.subr.bf16.mxu0 %v12008_v17  ;;  %v12080_v36 = vld [vmem:[#allocation10 + $0x4f4] ss:$24 sps:$4 sm:$0xff]   ;;  %v12075_v17 = vld [vmem:[#allocation10 + $0x4e8] ss:$24 sps:$4 sm:$0xff]  }
 0x448   :  { %7076 = vmatpush1.bf16.msra.mxu1 %v12003_v23  ;;  %v12083_v23 = vld [vmem:[#allocation10 + $0x4bc] ss:$24 sps:$4 sm:$0xff]   ;;  %v12081_v40 = vld [vmem:[#allocation10 + $0x4b8] ss:$24 sps:$4 sm:$0xff]  }
 0x449   :  { %v6948_v10 = vpop.f32.mrf.mxu1  ;;  %7077 = vmatprep.subr.bf16.mxu1 %v12011_v57  ;;  %v12078_v57 = vld [vmem:[#allocation10 + $0x4f0] ss:$24 sps:$4 sm:$0xff]  }
 0x44a   :  { %7199 = vmatpush1.bf16.msra.mxu0 %v12006_v26  ;;  %v12086_v26 = vld [vmem:[#allocation10 + $0x4c4] ss:$24 sps:$4 sm:$0xff]   ;;  %v12092_v10 = vld [vmem:[#allocation10 + $0x494] ss:$24 sps:$4 sm:$0xff]  }
 0x44b   :  { %7200 = vmatprep.subr.bf16.mxu0 %v12014_v9  ;;  %v12089_v9 = vld [vmem:[#allocation10 + $0x48c] ss:$24 sps:$4 sm:$0xff]  }
 0x44c   :  { %7078 = vmatpush1.bf16.msra.mxu1 %v12009_v16  ;;  %v12084_v16 = vld [vmem:[#allocation10 + $0x4c0] ss:$24 sps:$4 sm:$0xff]  }
 0x44d   :  { %7079 = vmatprep.subr.bf16.mxu1 %v12017_v8  ;;  %v12087_v8 = vld [vmem:[#allocation10 + $0x488] ss:$24 sps:$4 sm:$0xff]  }
 0x44e   :  { %7201 = vmatpush1.bf16.msra.mxu0 %v12012_v63  ;;  %v13161_v63 = vld [vmem:[#allocation11] sm:$0x3f] }
 0x44f   :  { %7202 = vmatprep.subr.bf16.mxu0 %v12020_v18  ;;  %v12095_v18 = vld [vmem:[#allocation10 + $0x164] ss:$24 sps:$4 sm:$0xff]  }
 0x450   :  { %7080 = vmatpush1.bf16.msra.mxu1 %v12015_v27  ;;  %v12090_v27 = vld [vmem:[#allocation10 + $0x490] ss:$24 sps:$4 sm:$0xff]  }
 0x451   :  { %7081 = vmatprep.subr.bf16.mxu1 %v12023_v28  ;;  %v12152_v28 = vld [vmem:[#allocation13 + $0x154] ss:$24 sps:$4 sm:$0xff]  }
 0x452   :  { %7203 = vmatpush1.bf16.msra.mxu0 %v12018_v31  ;;  %v5442_v31 = vrot.slane %v13161_v63, %v12984_v42 }
 0x453   :  { %7204 = vmatprep.subr.bf16.mxu0 %v12026_v5  ;;  %v12093_v5 = vld [vmem:[#allocation10 + $0x160] ss:$24 sps:$4 sm:$0xff]  }
 0x454   :  { %7082 = vmatpush1.bf16.msra.mxu1 %v12021_v12  ;;  %v12098_v12 = vld [vmem:[#allocation10 + $0x134] ss:$24 sps:$4 sm:$0xff]  }
 0x455   :  { %7083 = vmatprep.subr.bf16.mxu1 %v12029_v30  ;;  %v5446_v30 = vrot.slane %v13161_v63, %v12987_v45 }
 0x456   :  { %7205 = vmatpush1.bf16.msra.mxu0 %v12024_v20  ;;  %v12150_v20 = vld [vmem:[#allocation13 + $0x150] ss:$24 sps:$4 sm:$0xff]  }
 0x457   :  { %7206 = vmatprep.subr.bf16.mxu0 %v12032_v56  ;;  %v12158_v56 = vld [vmem:[#allocation13 + $0x124] ss:$24 sps:$4 sm:$0xff]  }
 0x458   :  { %7084 = vmatpush1.bf16.msra.mxu1 %v12027_v38  ;;  %v6944_v38 = vadd.f32 %v13154_v14, %v5442_v31  ;;  %v12099_v14 = vld [vmem:[#allocation10 + $0x100] ss:$24 sps:$4 sm:$0xff]   ;;  %v12126_v31 = vld [vmem:[#allocation10 + $0x250] ss:$24 sps:$4 sm:$0xff]  }
 0x459   :  { %7085 = vmatprep.subr.bf16.mxu1 %v12035_v43  ;;  %v12096_v43 = vld [vmem:[#allocation10 + $0x130] ss:$24 sps:$4 sm:$0xff]  }
 0x45a   :  { %7207 = vmatpush1.bf16.msra.mxu0 %v12030_v44 }
 0x45b   :  { %7208 = vmatprep.subr.bf16.mxu0 %v12038_v21  ;;  %v12101_v21 = vld [vmem:[#allocation10 + $0x104] ss:$24 sps:$4 sm:$0xff]  }
 0x45c   :  { %7086 = vmatpush1.bf16.msra.mxu1 %v12033_v22  ;;  %v6946_v22 = vadd.f32 %v13158_v25, %v5446_v30  ;;  %v12102_v25 = vld [vmem:[#allocation10 + $0xd0] ss:$24 sps:$4 sm:$0xff]  }
 0x45d   :  { %7087 = vmatprep.subr.bf16.mxu1 %v12041_v47  ;;  %v12224_v30 = vld [vmem:[#allocation13 + $0x214] ss:$24 sps:$4 sm:$0xff]  }
 0x45e   :  { %7209 = vmatpush1.bf16.msra.mxu0 %v12036_v48  ;;  %v12156_v48 = vld [vmem:[#allocation13 + $0x120] ss:$24 sps:$4 sm:$0xff]  }
 0x45f   :  { %7210 = vmatprep.subr.bf16.mxu0 %v12044_v49 }
 0x460   :  { %7088 = vmatpush1.bf16.msra.mxu1 %v12039_v51  ;;  %v12164_v51 = vld [vmem:[#allocation13 + $0xf4] ss:$24 sps:$4 sm:$0xff]  }
 0x461   :  { %7089 = vmatprep.subr.bf16.mxu1 %v12047_v50 }
 0x462   :  { %7211 = vmatpush1.bf16.msra.mxu0 %v12042_v52  ;;  %v12104_v52 = vld [vmem:[#allocation10 + $0xd4] ss:$24 sps:$4 sm:$0xff]  }
 0x463   :  { %7212 = vmatprep.subr.bf16.mxu0 %v12050_v54 }
 0x464   :  { %7090 = vmatpush2.bf16.msra.mxu1 %v12045_v55  ;;  %v12170_v55 = vld [vmem:[#allocation13 + $0xc4] ss:$24 sps:$4 sm:$0xff]  }
 0x465   :  { %7091 = vmatprep.subr.bf16.mxu1 %v12053_v58  ;;  %v12107_v58 = vld [vmem:[#allocation10 + $0xa4] ss:$24 sps:$4 sm:$0xff]  }
 0x466   :  { %7213 = vmatpush2.bf16.msra.mxu0 %v12048_v24  ;;  %v12168_v24 = vld [vmem:[#allocation13 + $0xc0] ss:$24 sps:$4 sm:$0xff]  }
 0x467   :  { %7214 = vmatprep.subr.bf16.mxu0 %v12056_v61  ;;  %v12176_v61 = vld [vmem:[#allocation13 + $0x94] ss:$24 sps:$4 sm:$0xff]  }
 0x468   :  { %7092 = vmatpush2.bf16.msra.mxu1 %v12051_v35  ;;  %v12105_v35 = vld [vmem:[#allocation10 + $0xa0] ss:$24 sps:$4 sm:$0xff]  }
 0x469   :  { %7093 = vmatprep.subr.bf16.mxu1 %v12059_v0  ;;  %v12110_v0 = vld [vmem:[#allocation10 + $0x74] ss:$24 sps:$4 sm:$0xff]  }
 0x46a   :  { %7215 = vmatpush2.bf16.msra.mxu0 %v12054_v1  ;;  %v12174_v1 = vld [vmem:[#allocation13 + $0x90] ss:$24 sps:$4 sm:$0xff]  }
 0x46b   :  { %7216 = vmatprep.subr.bf16.mxu0 %v12062_v2  ;;  %v12182_v2 = vld [vmem:[#allocation13 + $0x64] ss:$24 sps:$4 sm:$0xff]  }
 0x46c   :  { %7094 = vmatpush2.bf16.msra.mxu1 %v12057_v34  ;;  %v12108_v34 = vld [vmem:[#allocation10 + $0x70] ss:$24 sps:$4 sm:$0xff]  }
 0x46d   :  { %7095 = vmatprep.subr.bf16.mxu1 %v12065_v4  ;;  %v12113_v4 = vld [vmem:[#allocation10 + $0x44] ss:$24 sps:$4 sm:$0xff]  }
 0x46e   :  { %7217 = vmatpush2.bf16.msra.mxu0 %v12060_v19  ;;  %v12180_v19 = vld [vmem:[#allocation13 + $0x60] ss:$24 sps:$4 sm:$0xff]  }
 0x46f   :  { %7218 = vmatprep.subr.bf16.mxu0 %v12068_v53  ;;  %v12188_v53 = vld [vmem:[#allocation13 + $0x34] ss:$24 sps:$4 sm:$0xff]  }
 0x470   :  { %7096 = vmatpush2.bf16.msra.mxu1 %v12063_v6  ;;  %v12111_v6 = vld [vmem:[#allocation10 + $0x40] ss:$24 sps:$4 sm:$0xff]  }
 0x471   :  { %7097 = vmatprep.subr.bf16.mxu1 %v12071_v7  ;;  %v12116_v7 = vld [vmem:[#allocation10 + $0x14] ss:$24 sps:$4 sm:$0xff]  }
 0x472   :  { %7219 = vmatpush2.bf16.msra.mxu0 %v12066_v32  ;;  %v12186_v32 = vld [vmem:[#allocation13 + $0x30] ss:$24 sps:$4 sm:$0xff]  }
 0x473   :  { %7220 = vmatprep.subr.bf16.mxu0 %v12074_v46  ;;  %v12194_v46 = vld [vmem:[#allocation13 + $0x4] ss:$24 sps:$4 sm:$0xff]  }
 0x474   :  { %7098 = vmatpush2.bf16.msra.mxu1 %v12069_v15  ;;  %v12114_v15 = vld [vmem:[#allocation10 + $0x10] ss:$24 sps:$4 sm:$0xff]  }
 0x475   :  { %7099 = vmatprep.subr.bf16.mxu1 %v12077_v13  ;;  %v12119_v13 = vld [vmem:[#allocation10 + $0x2e4] ss:$24 sps:$4 sm:$0xff]  }
 0x476   :  { %7221 = vmatpush2.bf16.msra.mxu0 %v12072_v29  ;;  %v12192_v29 = vld [vmem:[#allocation13] ss:$24 sps:$4 sm:$0xff]  }
 0x477   :  { %7222 = vmatprep.subr.bf16.mxu0 %v12080_v36  ;;  %v12200_v36 = vld [vmem:[#allocation13 + $0x2d4] ss:$24 sps:$4 sm:$0xff]  }
 0x478   :  { %7100 = vmatpush2.bf16.msra.mxu1 %v12075_v17  ;;  %v12117_v17 = vld [vmem:[#allocation10 + $0x2e0] ss:$24 sps:$4 sm:$0xff]  }
 0x479   :  { %7101 = vmatprep.subr.bf16.mxu1 %v12083_v23  ;;  %v12122_v23 = vld [vmem:[#allocation10 + $0x2b4] ss:$24 sps:$4 sm:$0xff]  }
 0x47a   :  { %7223 = vmatpush2.bf16.msra.mxu0 %v12078_v57  ;;  %v12198_v57 = vld [vmem:[#allocation13 + $0x2d0] ss:$24 sps:$4 sm:$0xff]  }
 0x47b   :  { %7224 = vmatprep.subr.bf16.mxu0 %v12086_v26  ;;  %v12206_v26 = vld [vmem:[#allocation13 + $0x2a4] ss:$24 sps:$4 sm:$0xff]  }
 0x47c   :  { %7102 = vmatpush2.bf16.msra.mxu1 %v12081_v40  ;;  %v12120_v40 = vld [vmem:[#allocation10 + $0x2b0] ss:$24 sps:$4 sm:$0xff]  }
 0x47d   :  { %7103 = vmatprep.subr.bf16.mxu1 %v12089_v9  ;;  %v12125_v9 = vld [vmem:[#allocation10 + $0x284] ss:$24 sps:$4 sm:$0xff]  }
 0x47e   :  { %7225 = vmatpush2.bf16.msra.mxu0 %v12084_v16  ;;  %v12204_v16 = vld [vmem:[#allocation13 + $0x2a0] ss:$24 sps:$4 sm:$0xff]  }
 0x47f   :  { %7226 = vmatprep.subr.bf16.mxu0 %v12092_v10  ;;  %v12212_v10 = vld [vmem:[#allocation13 + $0x274] ss:$24 sps:$4 sm:$0xff]  }
 0x480   :  { %7104 = vmatpush2.bf16.msra.mxu1 %v12087_v8  ;;  %v12123_v8 = vld [vmem:[#allocation10 + $0x280] ss:$24 sps:$4 sm:$0xff]  }
 0x481   :  { %7155 = vmatprep.subr.bf16.mxu1 %v12095_v18  ;;  %v12128_v18 = vld [vmem:[#allocation10 + $0x254] ss:$24 sps:$4 sm:$0xff]  }
 0x482   :  { %7227 = vmatpush2.bf16.msra.mxu0 %v12090_v27  ;;  %v12210_v27 = vld [vmem:[#allocation13 + $0x270] ss:$24 sps:$4 sm:$0xff]  }
 0x483   :  { %7106 = vmatmul.mubr.bf16.vlgmr.msra.gmra.mxu1 %v13131_v39  ;;  %9050 = vmatprep.subr.bf16.mxu0 %v12152_v28  ;;  %v12218_v28 = vld [vmem:[#allocation13 + $0x244] ss:$24 sps:$4 sm:$0xff]  }
 0x484   :  { %7156 = vmatpush1.bf16.msra.mxu1 %v12093_v5  ;;  %7187 = vmatprep.mubr.bf16.mxu1 %v13111_v62  ;;  %v12131_v5 = vld [vmem:[#allocation10 + $0x224] ss:$24 sps:$4 sm:$0xff]  }
 0x485   :  { %7229 = vmatmul.mubr.bf16.vlgmr.msra.gmra.mxu0 %v13131_v39  ;;  %v6984_v44 = vpop.f32.mrf.mxu0  ;;  %7157 = vmatprep.subr.bf16.mxu1 %v12098_v12  ;;  %v12162_v39 = vld [vmem:[#allocation13 + $0xf0] ss:$24 sps:$4 sm:$0xff]   ;;  %v12216_v12 = vld [vmem:[#allocation13 + $0x240] ss:$24 sps:$4 sm:$0xff]  }
 0x486   :  { %v13172_v47 = vadd.f32 %v6984_v44, %v6944_v38  ;;  %9051 = vmatpush1.bf16.msra.mxu0 %v12150_v20  ;;  %v12129_v20 = vld [vmem:[#allocation10 + $0x220] ss:$24 sps:$4 sm:$0xff]   ;;  %v12132_v44 = vld [vmem:[#allocation10 + $0x1f0] ss:$24 sps:$4 sm:$0xff]  }
 0x487   :  { %v6986_v49 = vpop.f32.mrf.mxu0  ;;  %9052 = vmatprep.subr.bf16.mxu0 %v12158_v56  ;;  %v12134_v56 = vld [vmem:[#allocation10 + $0x1f4] ss:$24 sps:$4 sm:$0xff]  }
 0x488   :  { %v13174_v50 = vadd.f32 %v6986_v49, %v6946_v22  ;;  %7158 = vmatpush1.bf16.msra.mxu1 %v12096_v43  ;;  %v12222_v38 = vld [vmem:[#allocation13 + $0x210] ss:$24 sps:$4 sm:$0xff]   ;;  %v12230_v43 = vld [vmem:[#allocation13 + $0x1e4] ss:$24 sps:$4 sm:$0xff]   ;;  %v12228_v22 = vld [vmem:[#allocation13 + $0x1e0] ss:$24 sps:$4 sm:$0xff]  }
 0x489   :  { %v6988_v62 = vpop.f32.mrf.mxu0  ;;  %7159 = vmatprep.subr.bf16.mxu1 %v12101_v21  ;;  %v12137_v21 = vld [vmem:[#allocation10 + $0x1c4] ss:$24 sps:$4 sm:$0xff]   ;;  %v12135_v49 = vld [vmem:[#allocation10 + $0x1c0] ss:$24 sps:$4 sm:$0xff]  }
 0x48a   :  { %9053 = vmatpush1.bf16.msra.mxu0 %v12156_v48  ;;  %v12233_v48 = vld [vmem:[#allocation13 + $0x1b4] ss:$24 sps:$4 sm:$0xff]   ;;  %v12236_v62 = vld [vmem:[#allocation13 + $0x184] ss:$24 sps:$4 sm:$0xff]  }
 0x48b   :  { %v6989_v54 = vpop.f32.mrf.mxu0  ;;  %9054 = vmatprep.subr.bf16.mxu0 %v12164_v51  ;;  %v12140_v51 = vld [vmem:[#allocation10 + $0x194] ss:$24 sps:$4 sm:$0xff]  }
 0x48c   :  { %7160 = vmatpush1.bf16.msra.mxu1 %v12099_v14  ;;  %v12231_v14 = vld [vmem:[#allocation13 + $0x1b0] ss:$24 sps:$4 sm:$0xff]   ;;  %v12234_v54 = vld [vmem:[#allocation13 + $0x180] ss:$24 sps:$4 sm:$0xff]  }
 0x48d   :  { %7161 = vmatprep.subr.bf16.mxu1 %v12104_v52  ;;  %v12138_v52 = vld [vmem:[#allocation10 + $0x190] ss:$24 sps:$4 sm:$0xff]  }
 0x48e   :  { %9055 = vmatpush1.bf16.msra.mxu0 %v12162_v39  ;;  %v12143_v39 = vld [vmem:[#allocation10 + $0x764] ss:$24 sps:$4 sm:$0xff]  }
 0x48f   :  { %9056 = vmatprep.subr.bf16.mxu0 %v12170_v55  ;;  %v12141_v55 = vld [vmem:[#allocation10 + $0x760] ss:$24 sps:$4 sm:$0xff]  }
 0x490   :  { %7162 = vmatpush1.bf16.msra.mxu1 %v12102_v25  ;;  %v12146_v25 = vld [vmem:[#allocation10 + $0x734] ss:$24 sps:$4 sm:$0xff]  }
 0x491   :  { %7163 = vmatprep.subr.bf16.mxu1 %v12107_v58  ;;  %v12144_v58 = vld [vmem:[#allocation10 + $0x730] ss:$24 sps:$4 sm:$0xff]  }
 0x492   :  { %9057 = vmatpush1.bf16.msra.mxu0 %v12168_v24 }
 0x493   :  { %9058 = vmatprep.subr.bf16.mxu0 %v12176_v61  ;;  %v12149_v61 = vld [vmem:[#allocation10 + $0x704] ss:$24 sps:$4 sm:$0xff]  }
 0x494   :  { %7164 = vmatpush1.bf16.msra.mxu1 %v12105_v35 }
 0x495   :  { %7165 = vmatprep.subr.bf16.mxu1 %v12110_v0  ;;  %v12147_v0 = vld [vmem:[#allocation10 + $0x700] ss:$24 sps:$4 sm:$0xff]  }
 0x496   :  { %9059 = vmatpush1.bf16.msra.mxu0 %v12174_v1 }
 0x497   :  { %9060 = vmatprep.subr.bf16.mxu0 %v12182_v2  ;;  %v12155_v2 = vld [vmem:[#allocation10 + $0x6d4] ss:$24 sps:$4 sm:$0xff]  }
 0x498   :  { %7166 = vmatpush1.bf16.msra.mxu1 %v12108_v34 }
 0x499   :  { %7167 = vmatprep.subr.bf16.mxu1 %v12113_v4  ;;  %v12153_v4 = vld [vmem:[#allocation10 + $0x6d0] ss:$24 sps:$4 sm:$0xff]  }
 0x49a   :  { %9061 = vmatpush1.bf16.msra.mxu0 %v12180_v19  ;;  %v12159_v19 = vld [vmem:[#allocation10 + $0x6a0] ss:$24 sps:$4 sm:$0xff]  }
 0x49b   :  { %9062 = vmatprep.subr.bf16.mxu0 %v12188_v53  ;;  %v12165_v53 = vld [vmem:[#allocation10 + $0x670] ss:$24 sps:$4 sm:$0xff]  }
 0x49c   :  { %7168 = vmatpush1.bf16.msra.mxu1 %v12111_v6  ;;  %v12173_v6 = vld [vmem:[#allocation10 + $0x644] ss:$24 sps:$4 sm:$0xff]  }
 0x49d   :  { %7169 = vmatprep.subr.bf16.mxu1 %v12116_v7  ;;  %v12171_v7 = vld [vmem:[#allocation10 + $0x640] ss:$24 sps:$4 sm:$0xff]  }
 0x49e   :  { %9063 = vmatpush1.bf16.msra.mxu0 %v12186_v32  ;;  %v12179_v32 = vld [vmem:[#allocation10 + $0x614] ss:$24 sps:$4 sm:$0xff]  }
 0x49f   :  { %9064 = vmatprep.subr.bf16.mxu0 %v12194_v46  ;;  %v12177_v46 = vld [vmem:[#allocation10 + $0x610] ss:$24 sps:$4 sm:$0xff]  }
 0x4a0   :  { %7170 = vmatpush1.bf16.msra.mxu1 %v12114_v15  ;;  %v12185_v15 = vld [vmem:[#allocation10 + $0x8e4] ss:$24 sps:$4 sm:$0xff]  }
 0x4a1   :  { %7171 = vmatprep.subr.bf16.mxu1 %v12119_v13  ;;  %v12183_v13 = vld [vmem:[#allocation10 + $0x8e0] ss:$24 sps:$4 sm:$0xff]  }
 0x4a2   :  { %9065 = vmatpush1.bf16.msra.mxu0 %v12192_v29  ;;  %v12191_v29 = vld [vmem:[#allocation10 + $0x8b4] ss:$24 sps:$4 sm:$0xff]  }
 0x4a3   :  { %9066 = vmatprep.subr.bf16.mxu0 %v12200_v36  ;;  %v12189_v36 = vld [vmem:[#allocation10 + $0x8b0] ss:$24 sps:$4 sm:$0xff]  }
 0x4a4   :  { %7172 = vmatpush2.bf16.msra.mxu1 %v12117_v17  ;;  %v12197_v17 = vld [vmem:[#allocation10 + $0x884] ss:$24 sps:$4 sm:$0xff]  }
 0x4a5   :  { %7173 = vmatprep.subr.bf16.mxu1 %v12122_v23  ;;  %v12195_v23 = vld [vmem:[#allocation10 + $0x880] ss:$24 sps:$4 sm:$0xff]  }
 0x4a6   :  { %9067 = vmatpush2.bf16.msra.mxu0 %v12198_v57  ;;  %v12203_v57 = vld [vmem:[#allocation10 + $0x854] ss:$24 sps:$4 sm:$0xff]  }
 0x4a7   :  { %9068 = vmatprep.subr.bf16.mxu0 %v12206_v26  ;;  %v12201_v26 = vld [vmem:[#allocation10 + $0x850] ss:$24 sps:$4 sm:$0xff]  }
 0x4a8   :  { %7174 = vmatpush2.bf16.msra.mxu1 %v12120_v40  ;;  %v12209_v40 = vld [vmem:[#allocation10 + $0x824] ss:$24 sps:$4 sm:$0xff]  }
 0x4a9   :  { %7175 = vmatprep.subr.bf16.mxu1 %v12125_v9  ;;  %v12207_v9 = vld [vmem:[#allocation10 + $0x820] ss:$24 sps:$4 sm:$0xff]  }
 0x4aa   :  { %9069 = vmatpush2.bf16.msra.mxu0 %v12204_v16  ;;  %v12215_v16 = vld [vmem:[#allocation10 + $0x7f4] ss:$24 sps:$4 sm:$0xff]  }
 0x4ab   :  { %9070 = vmatprep.subr.bf16.mxu0 %v12212_v10  ;;  %v12213_v10 = vld [vmem:[#allocation10 + $0x7f0] ss:$24 sps:$4 sm:$0xff]  }
 0x4ac   :  { %7176 = vmatpush2.bf16.msra.mxu1 %v12123_v8  ;;  %v12221_v8 = vld [vmem:[#allocation10 + $0x7c4] ss:$24 sps:$4 sm:$0xff]  }
 0x4ad   :  { %7177 = vmatprep.subr.bf16.mxu1 %v12128_v18  ;;  %v12219_v18 = vld [vmem:[#allocation10 + $0x7c0] ss:$24 sps:$4 sm:$0xff]  }
 0x4ae   :  { %9071 = vmatpush2.bf16.msra.mxu0 %v12210_v27  ;;  %v12227_v27 = vld [vmem:[#allocation10 + $0x794] ss:$24 sps:$4 sm:$0xff]  }
 0x4af   :  { %9072 = vmatprep.subr.bf16.mxu0 %v12218_v28  ;;  %v12225_v28 = vld [vmem:[#allocation10 + $0x790] ss:$24 sps:$4 sm:$0xff]  }
 0x4b0   :  { %7178 = vmatpush2.bf16.msra.mxu1 %v12126_v31  ;;  %v12239_v31 = vld [vmem:[#allocation13 + $0x454] ss:$24 sps:$4 sm:$0xff]  }
 0x4b1   :  { %7179 = vmatprep.subr.bf16.mxu1 %v12131_v5  ;;  %v12237_v5 = vld [vmem:[#allocation13 + $0x450] ss:$24 sps:$4 sm:$0xff]  }
 0x4b2   :  { %9073 = vmatpush2.bf16.msra.mxu0 %v12216_v12  ;;  %v12242_v12 = vld [vmem:[#allocation13 + $0x424] ss:$24 sps:$4 sm:$0xff]  }
 0x4b3   :  { %9074 = vmatprep.subr.bf16.mxu0 %v12224_v30 }
 0x4b4   :  { %7180 = vmatpush2.bf16.msra.mxu1 %v12129_v20 }
 0x4b5   :  { %7181 = vmatprep.subr.bf16.mxu1 %v12134_v56  ;;  %v12240_v56 = vld [vmem:[#allocation13 + $0x420] ss:$24 sps:$4 sm:$0xff]  }
 0x4b6   :  { %9075 = vmatpush2.bf16.msra.mxu0 %v12222_v38 }
 0x4b7   :  { %9076 = vmatprep.subr.bf16.mxu0 %v12230_v43 }
 0x4b8   :  { %7182 = vmatpush2.bf16.msra.mxu1 %v12132_v44  ;;  %v12245_v44 = vld [vmem:[#allocation13 + $0x3f4] ss:$24 sps:$4 sm:$0xff]  }
 0x4b9   :  { %7183 = vmatprep.subr.bf16.mxu1 %v12137_v21 }
 0x4ba   :  { %9077 = vmatpush2.bf16.msra.mxu0 %v12228_v22 }
 0x4bb   :  { %9078 = vmatprep.subr.bf16.mxu0 %v12233_v48 }
 0x4bc   :  { %7184 = vmatpush2.bf16.msra.mxu1 %v12135_v49 }
 0x4bd   :  { %7185 = vmatprep.subr.bf16.mxu1 %v12140_v51 }
 0x4be   :  { %9079 = vmatpush2.bf16.msra.mxu0 %v12231_v14  ;;  %v12243_v14 = vld [vmem:[#allocation13 + $0x3f0] ss:$24 sps:$4 sm:$0xff]  }
 0x4bf   :  { %9080 = vmatprep.subr.bf16.mxu0 %v12236_v62 }
 0x4c0   :  { %7186 = vmatpush2.bf16.msra.mxu1 %v12138_v52 }
 0x4c1   :  { %7237 = vmatprep.subr.bf16.mxu1 %v12143_v39 }
 0x4c2   :  { %9081 = vmatpush2.bf16.msra.mxu0 %v12234_v54 }
 0x4c3   :  { %7188 = vmatmul.mubr.bf16.vlgmr.msra.gmra.mxu1 %v13113_v33  ;;  %v12161_v33 = vld [vmem:[#allocation10 + $0x6a4] ss:$24 sps:$4 sm:$0xff]  }
 0x4c4   :  { %7238 = vmatpush1.bf16.msra.mxu1 %v12141_v55  ;;  %7269 = vmatprep.mubr.bf16.mxu1 %v13147_v3  ;;  %v12167_v3 = vld [vmem:[#allocation10 + $0x674] ss:$24 sps:$4 sm:$0xff]  }
 0x4c5   :  { %v13178_v24 = vpop.f32.mrf.mxu0  ;;  %7239 = vmatprep.subr.bf16.mxu1 %v12146_v25  ;;  %v12335_v55 = vld [vmem:[#allocation13 + $0x754] ss:$24 sps:$4 sm:$0xff]   ;;  %v12333_v25 = vld [vmem:[#allocation13 + $0x750] ss:$24 sps:$4 sm:$0xff]  }
 0x4c6   :  { %9132 = vmatprep.subr.bf16.mxu0 %v12335_v55  ;;  %v12287_v55 = vld [vmem:[#allocation13 + $0x15c] ss:$24 sps:$4 sm:$0xff]  }
 0x4c7   :  { %v13180_v35 = vpop.f32.mrf.mxu0 }
 0x4c8   :  { %7240 = vmatpush1.bf16.msra.mxu1 %v12144_v58  ;;  %v12251_v58 = vld [vmem:[#allocation13 + $0x394] ss:$24 sps:$4 sm:$0xff]  }
 0x4c9   :  { %v7070_v1 = vpop.f32.mrf.mxu0  ;;  %7241 = vmatprep.subr.bf16.mxu1 %v12149_v61  ;;  %v12341_v61 = vld [vmem:[#allocation13 + $0x724] ss:$24 sps:$4 sm:$0xff]  }
 0x4ca   :  { %v12339_v1 = vld [vmem:[#allocation13 + $0x720] ss:$24 sps:$4 sm:$0xff]  }
 0x4cb   :  { %v7071_v34 = vpop.f32.mrf.mxu0 }
 0x4cc   :  { %7242 = vmatpush1.bf16.msra.mxu1 %v12147_v0  ;;  %v12249_v0 = vld [vmem:[#allocation13 + $0x390] ss:$24 sps:$4 sm:$0xff]   ;;  %v12347_v34 = vld [vmem:[#allocation13 + $0x6f4] ss:$24 sps:$4 sm:$0xff]  }
 0x4cd   :  { %7243 = vmatprep.subr.bf16.mxu1 %v12155_v2  ;;  %v12254_v2 = vld [vmem:[#allocation13 + $0x364] ss:$24 sps:$4 sm:$0xff]  }
 0x4d0   :  { %7244 = vmatpush1.bf16.msra.mxu1 %v12153_v4  ;;  %v12252_v4 = vld [vmem:[#allocation13 + $0x360] ss:$24 sps:$4 sm:$0xff]  }
 0x4d1   :  { %7245 = vmatprep.subr.bf16.mxu1 %v12161_v33  ;;  %v12345_v33 = vld [vmem:[#allocation13 + $0x6f0] ss:$24 sps:$4 sm:$0xff]  }
 0x4d4   :  { %7246 = vmatpush1.bf16.msra.mxu1 %v12159_v19  ;;  %v12257_v19 = vld [vmem:[#allocation13 + $0x334] ss:$24 sps:$4 sm:$0xff]  }
 0x4d5   :  { %7247 = vmatprep.subr.bf16.mxu1 %v12167_v3  ;;  %v12353_v3 = vld [vmem:[#allocation13 + $0x6c4] ss:$24 sps:$4 sm:$0xff]  }
 0x4d8   :  { %7248 = vmatpush1.bf16.msra.mxu1 %v12165_v53  ;;  %v12255_v53 = vld [vmem:[#allocation13 + $0x330] ss:$24 sps:$4 sm:$0xff]  }
 0x4d9   :  { %7249 = vmatprep.subr.bf16.mxu1 %v12173_v6  ;;  %v12351_v6 = vld [vmem:[#allocation13 + $0x6c0] ss:$24 sps:$4 sm:$0xff]  }
 0x4dc   :  { %7250 = vmatpush1.bf16.msra.mxu1 %v12171_v7  ;;  %v12260_v7 = vld [vmem:[#allocation13 + $0x304] ss:$24 sps:$4 sm:$0xff]  }
 0x4dd   :  { %7251 = vmatprep.subr.bf16.mxu1 %v12179_v32  ;;  %v12359_v32 = vld [vmem:[#allocation13 + $0x694] ss:$24 sps:$4 sm:$0xff]  }
 0x4e0   :  { %7252 = vmatpush1.bf16.msra.mxu1 %v12177_v46  ;;  %v12258_v46 = vld [vmem:[#allocation13 + $0x300] ss:$24 sps:$4 sm:$0xff]  }
 0x4e1   :  { %7253 = vmatprep.subr.bf16.mxu1 %v12185_v15  ;;  %v12357_v15 = vld [vmem:[#allocation13 + $0x690] ss:$24 sps:$4 sm:$0xff]  }
 0x4e4   :  { %7254 = vmatpush2.bf16.msra.mxu1 %v12183_v13  ;;  %v12263_v13 = vld [vmem:[#allocation13 + $0x5d4] ss:$24 sps:$4 sm:$0xff]  }
 0x4e5   :  { %7255 = vmatprep.subr.bf16.mxu1 %v12191_v29  ;;  %v12365_v29 = vld [vmem:[#allocation13 + $0x664] ss:$24 sps:$4 sm:$0xff]  }
 0x4e8   :  { %7256 = vmatpush2.bf16.msra.mxu1 %v12189_v36  ;;  %v12261_v36 = vld [vmem:[#allocation13 + $0x5d0] ss:$24 sps:$4 sm:$0xff]  }
 0x4e9   :  { %7257 = vmatprep.subr.bf16.mxu1 %v12197_v17  ;;  %v12363_v17 = vld [vmem:[#allocation13 + $0x660] ss:$24 sps:$4 sm:$0xff]  }
 0x4ec   :  { %7258 = vmatpush2.bf16.msra.mxu1 %v12195_v23  ;;  %v12266_v23 = vld [vmem:[#allocation13 + $0x5a4] ss:$24 sps:$4 sm:$0xff]  }
 0x4ed   :  { %7259 = vmatprep.subr.bf16.mxu1 %v12203_v57  ;;  %v12371_v57 = vld [vmem:[#allocation13 + $0x634] ss:$24 sps:$4 sm:$0xff]  }
 0x4f0   :  { %7260 = vmatpush2.bf16.msra.mxu1 %v12201_v26  ;;  %v12264_v26 = vld [vmem:[#allocation13 + $0x5a0] ss:$24 sps:$4 sm:$0xff]  }
 0x4f1   :  { %7261 = vmatprep.subr.bf16.mxu1 %v12209_v40  ;;  %v12369_v40 = vld [vmem:[#allocation13 + $0x630] ss:$24 sps:$4 sm:$0xff]  }
 0x4f4   :  { %7262 = vmatpush2.bf16.msra.mxu1 %v12207_v9  ;;  %v12269_v9 = vld [vmem:[#allocation13 + $0x574] ss:$24 sps:$4 sm:$0xff]  }
 0x4f5   :  { %7263 = vmatprep.subr.bf16.mxu1 %v12215_v16  ;;  %v12377_v16 = vld [vmem:[#allocation13 + $0x604] ss:$24 sps:$4 sm:$0xff]  }
 0x4f8   :  { %7264 = vmatpush2.bf16.msra.mxu1 %v12213_v10  ;;  %v12267_v10 = vld [vmem:[#allocation13 + $0x570] ss:$24 sps:$4 sm:$0xff]  }
 0x4f9   :  { %7265 = vmatprep.subr.bf16.mxu1 %v12221_v8  ;;  %v12375_v8 = vld [vmem:[#allocation13 + $0x600] ss:$24 sps:$4 sm:$0xff]  }
 0x4fc   :  { %7266 = vmatpush2.bf16.msra.mxu1 %v12219_v18  ;;  %v12272_v18 = vld [vmem:[#allocation13 + $0x544] ss:$24 sps:$4 sm:$0xff]  }
 0x4fd   :  { %7267 = vmatprep.subr.bf16.mxu1 %v12227_v27  ;;  %v12383_v27 = vld [vmem:[#allocation13 + $0x8d4] ss:$24 sps:$4 sm:$0xff]  }
 0x500   :  { %7268 = vmatpush2.bf16.msra.mxu1 %v12225_v28  ;;  %v12270_v28 = vld [vmem:[#allocation13 + $0x540] ss:$24 sps:$4 sm:$0xff]  }
 0x501   :  { %9091 = vmatprep.subr.bf16.mxu1 %v12239_v31  ;;  %v12381_v31 = vld [vmem:[#allocation13 + $0x8d0] ss:$24 sps:$4 sm:$0xff]  }
 0x503   :  { %7270 = vmatmul.mubr.bf16.vlgmr.msra.gmra.mxu1 %v13149_v11  ;;  %v7025_v30 = vpop.f32.mrf.mxu1 }
 0x504   :  { %v7026_v20 = vadd.f32 %v7025_v30, %v13172_v47  ;;  %9092 = vmatpush1.bf16.msra.mxu1 %v12237_v5  ;;  %v12248_v47 = vld [vmem:[#allocation13 + $0x3c4] ss:$24 sps:$4 sm:$0xff]   ;;  %v12275_v5 = vld [vmem:[#allocation13 + $0x514] ss:$24 sps:$4 sm:$0xff]   ;;  %v12273_v30 = vld [vmem:[#allocation13 + $0x510] ss:$24 sps:$4 sm:$0xff]  }
 0x505   :  { %v13184_v38 = vpop.f32.mrf.mxu0  ;;  %v7027_v43 = vpop.f32.mrf.mxu1  ;;  %9093 = vmatprep.subr.bf16.mxu1 %v12242_v12  ;;  %v12389_v12 = vld [vmem:[#allocation13 + $0x8a4] ss:$24 sps:$4 sm:$0xff]  }
 0x506   :  { %v7028_v21 = vadd.f32 %v7027_v43, %v13174_v50  ;;  %v7278_v22 = vmax.f32 %v7026_v20, 0.0  ;;  %v12246_v50 = vld [vmem:[#allocation13 + $0x3c0] ss:$24 sps:$4 sm:$0xff]   ;;  %v12395_v43 = vld [vmem:[#allocation13 + $0x874] ss:$24 sps:$4 sm:$0xff]  }
 0x507   :  { %v13187_v48 = vpop.f32.mrf.mxu0  ;;  %v7029_v49 = vpop.f32.mrf.mxu1  ;;  %v12387_v20 = vld [vmem:[#allocation13 + $0x8a0] ss:$24 sps:$4 sm:$0xff]  }
 0x508   :  { %v7279_v51 = vmax.f32 %v7028_v21, 0.0  ;;  %9094 = vmatpush1.bf16.msra.mxu1 %v12240_v56  ;;  %v13191_v39 = vpack.c.bf16 %v7278_v22, %v7278_v22  ;;  %v12278_v56 = vld [vmem:[#allocation13 + $0x4e4] ss:$24 sps:$4 sm:$0xff]   ;;  %v12393_v21 = vld [vmem:[#allocation13 + $0x870] ss:$24 sps:$4 sm:$0xff]  }
 0x509   :  { %v7152_v11 = vpop.f32.mrf.mxu0  ;;  %v7030_v62 = vpop.f32.mrf.mxu1  ;;  %9095 = vmatprep.subr.bf16.mxu1 %v12245_v44  ;;  %v12276_v44 = vld [vmem:[#allocation13 + $0x4e0] ss:$24 sps:$4 sm:$0xff]   ;;  %v12281_v22 = vld [vmem:[#allocation13 + $0x4b4] ss:$24 sps:$4 sm:$0xff]   ;;  %v12401_v49 = vld [vmem:[#allocation13 + $0x844] ss:$24 sps:$4 sm:$0xff]  }
 0x50a   :  { %v13189_v52 = vpack.c.bf16 %v7279_v51, %v7279_v51  ;;  %v12279_v51 = vld [vmem:[#allocation13 + $0x4b0] ss:$24 sps:$4 sm:$0xff]   ;;  %v12284_v11 = vld [vmem:[#allocation13 + $0x484] ss:$24 sps:$4 sm:$0xff]   ;;  %v12407_v62 = vld [vmem:[#allocation13 + $0x814] ss:$24 sps:$4 sm:$0xff]  }
 0x50b   :  { %v7153_v54 = vpop.f32.mrf.mxu0 }
 0x50c   :  { %9082 = vmatprep.mubr.bf16.mxu0 %v13189_v52  ;;  %9096 = vmatpush1.bf16.msra.mxu1 %v12243_v14  ;;  %v12399_v14 = vld [vmem:[#allocation13 + $0x840] ss:$24 sps:$4 sm:$0xff]   ;;  %v12405_v54 = vld [vmem:[#allocation13 + $0x810] ss:$24 sps:$4 sm:$0xff]  }
 0x50d   :  { %9083 = vmatmul.mubr.bf16.vlgmr.msra.gmra.mxu0 %v13191_v39  ;;  %9097 = vmatprep.subr.bf16.mxu1 %v12248_v47  ;;  %v12282_v47 = vld [vmem:[#allocation13 + $0x480] ss:$24 sps:$4 sm:$0xff]  }
 0x50e   :  { %9133 = vmatpush1.bf16.msra.mxu0 %v12333_v25  ;;  %v12413_v25 = vld [vmem:[#allocation13 + $0x7e4] ss:$24 sps:$4 sm:$0xff]  }
 0x50f   :  { %9134 = vmatprep.subr.bf16.mxu0 %v12341_v61  ;;  %v12411_v61 = vld [vmem:[#allocation13 + $0x7e0] ss:$24 sps:$4 sm:$0xff]  }
 0x510   :  { %9098 = vmatpush1.bf16.msra.mxu1 %v12246_v50  ;;  %v5450_v50 = vrot.slane %v13161_v63, %v13027_v41 }
 0x511   :  { %9099 = vmatprep.subr.bf16.mxu1 %v12251_v58  ;;  %v5454_v58 = vrot.slane %v13161_v63, %v13030_v37 }
 0x512   :  { %9135 = vmatpush1.bf16.msra.mxu0 %v12339_v1 }
 0x513   :  { %9136 = vmatprep.subr.bf16.mxu0 %v12347_v34  ;;  %v7069_v34 = vadd.f32 %v13180_v35, %v5454_v58 }
 0x514   :  { %9100 = vmatpush1.bf16.msra.mxu1 %v12249_v0  ;;  %v7067_v0 = vadd.f32 %v13178_v24, %v5450_v50 }
 0x515   :  { %9101 = vmatprep.subr.bf16.mxu1 %v12254_v2  ;;  %v12419_v2 = vld [vmem:[#allocation13 + $0x7b4] ss:$24 sps:$4 sm:$0xff]  }
 0x516   :  { %9137 = vmatpush1.bf16.msra.mxu0 %v12345_v33  ;;  %v12417_v33 = vld [vmem:[#allocation13 + $0x7b0] ss:$24 sps:$4 sm:$0xff]  }
 0x517   :  { %9138 = vmatprep.subr.bf16.mxu0 %v12353_v3 }
 0x518   :  { %9102 = vmatpush1.bf16.msra.mxu1 %v12252_v4 }
 0x519   :  { %9103 = vmatprep.subr.bf16.mxu1 %v12257_v19 }
 0x51a   :  { %9139 = vmatpush1.bf16.msra.mxu0 %v12351_v6 }
 0x51b   :  { %9140 = vmatprep.subr.bf16.mxu0 %v12359_v32 }
 0x51c   :  { %9104 = vmatpush1.bf16.msra.mxu1 %v12255_v53 }
 0x51d   :  { %9105 = vmatprep.subr.bf16.mxu1 %v12260_v7 }
 0x51e   :  { %9141 = vmatpush1.bf16.msra.mxu0 %v12357_v15  ;;  %v12423_v15 = vld [vmem:[#allocation13 + $0x780] ss:$24 sps:$4 sm:$0xff]  }
 0x51f   :  { %9142 = vmatprep.subr.bf16.mxu0 %v12365_v29 }
 0x520   :  { %9106 = vmatpush1.bf16.msra.mxu1 %v12258_v46  ;;  %v12425_v46 = vld [vmem:[#allocation13 + $0x784] ss:$24 sps:$4 sm:$0xff]  }
 0x521   :  { %9107 = vmatprep.subr.bf16.mxu1 %v12263_v13 }
 0x522   :  { %9143 = vmatpush1.bf16.msra.mxu0 %v12363_v17 }
 0x523   :  { %9144 = vmatprep.subr.bf16.mxu0 %v12371_v57 }
 0x524   :  { %9108 = vmatpush2.bf16.msra.mxu1 %v12261_v36 }
 0x525   :  { %9109 = vmatprep.subr.bf16.mxu1 %v12266_v23  ;;  %v12431_v23 = vld [vmem:[#allocation13 + $0x45c] ss:$24 sps:$4 sm:$0xff]  }
 0x526   :  { %9145 = vmatpush1.bf16.msra.mxu0 %v12369_v40  ;;  %v12290_v40 = vld [vmem:[#allocation13 + $0x12c] ss:$24 sps:$4 sm:$0xff]  }
 0x527   :  { %9146 = vmatprep.subr.bf16.mxu0 %v12377_v16  ;;  %v12291_v16 = vld [vmem:[#allocation13 + $0xf8] ss:$24 sps:$4 sm:$0xff]  }
 0x528   :  { %9110 = vmatpush2.bf16.msra.mxu1 %v12264_v26 }
 0x529   :  { %9111 = vmatprep.subr.bf16.mxu1 %v12269_v9  ;;  %v12293_v9 = vld [vmem:[#allocation13 + $0xfc] ss:$24 sps:$4 sm:$0xff]  }
 0x52a   :  { %9147 = vmatpush1.bf16.msra.mxu0 %v12375_v8  ;;  %v12294_v8 = vld [vmem:[#allocation13 + $0xc8] ss:$24 sps:$4 sm:$0xff]  }
 0x52b   :  { %9148 = vmatprep.subr.bf16.mxu0 %v12383_v27  ;;  %v12297_v27 = vld [vmem:[#allocation13 + $0x98] ss:$24 sps:$4 sm:$0xff]  }
 0x52c   :  { %9112 = vmatpush2.bf16.msra.mxu1 %v12267_v10  ;;  %v12296_v10 = vld [vmem:[#allocation13 + $0xcc] ss:$24 sps:$4 sm:$0xff]  }
 0x52d   :  { %9113 = vmatprep.subr.bf16.mxu1 %v12272_v18  ;;  %v12299_v18 = vld [vmem:[#allocation13 + $0x9c] ss:$24 sps:$4 sm:$0xff]  }
 0x52e   :  { %9149 = vmatpush2.bf16.msra.mxu0 %v12381_v31  ;;  %v12300_v31 = vld [vmem:[#allocation13 + $0x68] ss:$24 sps:$4 sm:$0xff]  }
 0x52f   :  { %9150 = vmatprep.subr.bf16.mxu0 %v12389_v12  ;;  %v12303_v12 = vld [vmem:[#allocation13 + $0x38] ss:$24 sps:$4 sm:$0xff]  }
 0x530   :  { %9114 = vmatpush2.bf16.msra.mxu1 %v12270_v28  ;;  %v12302_v28 = vld [vmem:[#allocation13 + $0x6c] ss:$24 sps:$4 sm:$0xff]  }
 0x531   :  { %9115 = vmatprep.subr.bf16.mxu1 %v12275_v5  ;;  %v12305_v5 = vld [vmem:[#allocation13 + $0x3c] ss:$24 sps:$4 sm:$0xff]  }
 0x532   :  { %9151 = vmatpush2.bf16.msra.mxu0 %v12387_v20  ;;  %v12306_v20 = vld [vmem:[#allocation13 + $0x8] ss:$24 sps:$4 sm:$0xff]  }
 0x533   :  { %9152 = vmatprep.subr.bf16.mxu0 %v12395_v43  ;;  %v12309_v43 = vld [vmem:[#allocation13 + $0x2d8] ss:$24 sps:$4 sm:$0xff]  }
 0x534   :  { %9116 = vmatpush2.bf16.msra.mxu1 %v12273_v30  ;;  %v12308_v30 = vld [vmem:[#allocation13 + $0xc] ss:$24 sps:$4 sm:$0xff]  }
 0x535   :  { %9117 = vmatprep.subr.bf16.mxu1 %v12278_v56  ;;  %v12311_v56 = vld [vmem:[#allocation13 + $0x2dc] ss:$24 sps:$4 sm:$0xff]  }
 0x536   :  { %9153 = vmatpush2.bf16.msra.mxu0 %v12393_v21  ;;  %v12312_v21 = vld [vmem:[#allocation13 + $0x2a8] ss:$24 sps:$4 sm:$0xff]  }
 0x537   :  { %9154 = vmatprep.subr.bf16.mxu0 %v12401_v49  ;;  %v12315_v49 = vld [vmem:[#allocation13 + $0x278] ss:$24 sps:$4 sm:$0xff]  }
 0x538   :  { %9118 = vmatpush2.bf16.msra.mxu1 %v12276_v44  ;;  %v12314_v44 = vld [vmem:[#allocation13 + $0x2ac] ss:$24 sps:$4 sm:$0xff]  }
 0x539   :  { %9119 = vmatprep.subr.bf16.mxu1 %v12281_v22  ;;  %v12317_v22 = vld [vmem:[#allocation13 + $0x27c] ss:$24 sps:$4 sm:$0xff]  }
 0x53a   :  { %9155 = vmatpush2.bf16.msra.mxu0 %v12399_v14  ;;  %v12318_v14 = vld [vmem:[#allocation13 + $0x248] ss:$24 sps:$4 sm:$0xff]  }
 0x53b   :  { %9156 = vmatprep.subr.bf16.mxu0 %v12407_v62  ;;  %v12321_v62 = vld [vmem:[#allocation13 + $0x218] ss:$24 sps:$4 sm:$0xff]  }
 0x53c   :  { %9120 = vmatpush2.bf16.msra.mxu1 %v12279_v51  ;;  %v12320_v51 = vld [vmem:[#allocation13 + $0x24c] ss:$24 sps:$4 sm:$0xff]  }
 0x53d   :  { %9121 = vmatprep.subr.bf16.mxu1 %v12284_v11  ;;  %v12323_v11 = vld [vmem:[#allocation13 + $0x21c] ss:$24 sps:$4 sm:$0xff]  }
 0x53e   :  { %9157 = vmatpush2.bf16.msra.mxu0 %v12405_v54  ;;  %v12324_v54 = vld [vmem:[#allocation13 + $0x1e8] ss:$24 sps:$4 sm:$0xff]  }
 0x53f   :  { %9158 = vmatprep.subr.bf16.mxu0 %v12413_v25  ;;  %v12327_v25 = vld [vmem:[#allocation13 + $0x1b8] ss:$24 sps:$4 sm:$0xff]  }
 0x540   :  { %9122 = vmatpush2.bf16.msra.mxu1 %v12282_v47  ;;  %v12326_v47 = vld [vmem:[#allocation13 + $0x1ec] ss:$24 sps:$4 sm:$0xff]  }
 0x541   :  { %9173 = vmatprep.subr.bf16.mxu1 %v12287_v55  ;;  %v12329_v55 = vld [vmem:[#allocation13 + $0x1bc] ss:$24 sps:$4 sm:$0xff]  }
 0x542   :  { %9159 = vmatpush2.bf16.msra.mxu0 %v12411_v61  ;;  %v12332_v61 = vld [vmem:[#allocation13 + $0x18c] ss:$24 sps:$4 sm:$0xff]  }
 0x543   :  { %v7107_v1 = vpop.f32.mrf.mxu1  ;;  %9160 = vmatprep.subr.bf16.mxu0 %v12419_v2 }
 0x544   :  { %v7108_v4 = vadd.f32 %v7107_v1, %v7067_v0  ;;  %v12330_v1 = vld [vmem:[#allocation13 + $0x188] ss:$24 sps:$4 sm:$0xff]  }
 0x545   :  { %v7109_v19 = vpop.f32.mrf.mxu1  ;;  %v13201_v3 = vpop.f32.mrf.mxu0 }
 0x546   :  { %v7149_v53 = vadd.f32 %v13184_v38, %v7108_v4  ;;  %v7110_v6 = vadd.f32 %v7109_v19, %v7069_v34  ;;  %9161 = vmatpush2.bf16.msra.mxu0 %v12417_v33  ;;  %v12285_v38 = vld [vmem:[#allocation13 + $0x158] ss:$24 sps:$4 sm:$0xff]   ;;  %v12338_v34 = vld [vmem:[#allocation13 + $0x75c] ss:$24 sps:$4 sm:$0xff]   ;;  %v12344_v33 = vld [vmem:[#allocation13 + $0x72c] ss:$24 sps:$4 sm:$0xff]  }
 0x547   :  { %v7111_v7 = vpop.f32.mrf.mxu1  ;;  %v13204_v32 = vpop.f32.mrf.mxu0  ;;  %9162 = vmatprep.subr.bf16.mxu0 %v12425_v46  ;;  %v12336_v4 = vld [vmem:[#allocation13 + $0x758] ss:$24 sps:$4 sm:$0xff]   ;;  %v12342_v19 = vld [vmem:[#allocation13 + $0x728] ss:$24 sps:$4 sm:$0xff]  }
 0x548   :  { %v7151_v24 = vadd.f32 %v13187_v48, %v7110_v6  ;;  %v7280_v13 = vmax.f32 %v7149_v53, 0.0  ;;  %v12288_v48 = vld [vmem:[#allocation13 + $0x128] ss:$24 sps:$4 sm:$0xff]   ;;  %v12350_v53 = vld [vmem:[#allocation13 + $0x6fc] ss:$24 sps:$4 sm:$0xff]  }
 0x549   :  { %v7112_v29 = vpop.f32.mrf.mxu1  ;;  %v7234_v35 = vpop.f32.mrf.mxu0  ;;  %v12348_v6 = vld [vmem:[#allocation13 + $0x6f8] ss:$24 sps:$4 sm:$0xff]   ;;  %v12356_v7 = vld [vmem:[#allocation13 + $0x6cc] ss:$24 sps:$4 sm:$0xff]   ;;  %v12354_v46 = vld [vmem:[#allocation13 + $0x6c8] ss:$24 sps:$4 sm:$0xff]  }
 0x54a   :  { %v7281_v36 = vmax.f32 %v7151_v24, 0.0  ;;  %9163 = vmatpush2.bf16.msra.mxu0 %v12423_v15  ;;  %v13209_v26 = vpack.c.bf16 %v7280_v13, %v7280_v13  ;;  %v12362_v24 = vld [vmem:[#allocation13 + $0x69c] ss:$24 sps:$4 sm:$0xff]   ;;  %v12360_v15 = vld [vmem:[#allocation13 + $0x698] ss:$24 sps:$4 sm:$0xff]  }
 0x54b   :  { %v7235_v17 = vpop.f32.mrf.mxu0  ;;  %9214 = vmatprep.subr.bf16.mxu0 %v12431_v23  ;;  %v12368_v13 = vld [vmem:[#allocation13 + $0x66c] ss:$24 sps:$4 sm:$0xff]   ;;  %v12366_v29 = vld [vmem:[#allocation13 + $0x668] ss:$24 sps:$4 sm:$0xff]   ;;  %v12374_v35 = vld [vmem:[#allocation13 + $0x63c] ss:$24 sps:$4 sm:$0xff]  }
 0x54c   :  { %v13207_v57 = vpack.c.bf16 %v7281_v36, %v7281_v36  ;;  %v12372_v36 = vld [vmem:[#allocation13 + $0x638] ss:$24 sps:$4 sm:$0xff]   ;;  %v12380_v17 = vld [vmem:[#allocation13 + $0x60c] ss:$24 sps:$4 sm:$0xff]   ;;  %v12378_v23 = vld [vmem:[#allocation13 + $0x608] ss:$24 sps:$4 sm:$0xff]  }
 0x54e   :  { %9123 = vmatprep.mubr.bf16.mxu1 %v13207_v57 }
 0x54f   :  { %9124 = vmatmul.mubr.bf16.vlgmr.msra.gmra.mxu1 %v13209_v26 }
 0x550   :  { %9174 = vmatpush1.bf16.msra.mxu1 %v12285_v38  ;;  %9205 = vmatprep.mubr.bf16.mxu1 %v13189_v52  ;;  %v12386_v38 = vld [vmem:[#allocation13 + $0x8dc] ss:$24 sps:$4 sm:$0xff]  }
 0x551   :  { %9175 = vmatprep.subr.bf16.mxu1 %v12290_v40  ;;  %v12384_v40 = vld [vmem:[#allocation13 + $0x8d8] ss:$24 sps:$4 sm:$0xff]  }
 0x554   :  { %9176 = vmatpush1.bf16.msra.mxu1 %v12288_v48  ;;  %v12392_v48 = vld [vmem:[#allocation13 + $0x8ac] ss:$24 sps:$4 sm:$0xff]  }
 0x555   :  { %9177 = vmatprep.subr.bf16.mxu1 %v12293_v9  ;;  %v12390_v9 = vld [vmem:[#allocation13 + $0x8a8] ss:$24 sps:$4 sm:$0xff]  }
 0x558   :  { %9178 = vmatpush1.bf16.msra.mxu1 %v12291_v16  ;;  %v12398_v16 = vld [vmem:[#allocation13 + $0x87c] ss:$24 sps:$4 sm:$0xff]  }
 0x559   :  { %9179 = vmatprep.subr.bf16.mxu1 %v12296_v10  ;;  %v12396_v10 = vld [vmem:[#allocation13 + $0x878] ss:$24 sps:$4 sm:$0xff]  }
 0x55c   :  { %9180 = vmatpush1.bf16.msra.mxu1 %v12294_v8  ;;  %v12404_v8 = vld [vmem:[#allocation13 + $0x84c] ss:$24 sps:$4 sm:$0xff]  }
 0x55d   :  { %9181 = vmatprep.subr.bf16.mxu1 %v12299_v18  ;;  %v12402_v18 = vld [vmem:[#allocation13 + $0x848] ss:$24 sps:$4 sm:$0xff]  }
 0x560   :  { %9182 = vmatpush1.bf16.msra.mxu1 %v12297_v27  ;;  %v12410_v27 = vld [vmem:[#allocation13 + $0x81c] ss:$24 sps:$4 sm:$0xff]  }
 0x561   :  { %9183 = vmatprep.subr.bf16.mxu1 %v12302_v28  ;;  %v5458_v28 = vrot.slane %v13161_v63, %v13063_v59 }
 0x564   :  { %9184 = vmatpush1.bf16.msra.mxu1 %v12300_v31  ;;  %v5462_v31 = vrot.slane %v13161_v63, %v13066_v60  ;;  %v12420_v63 = vld [vmem:[#allocation13 + $0x7b8] ss:$24 sps:$4 sm:$0xff]  }
 0x565   :  { %9185 = vmatprep.subr.bf16.mxu1 %v12305_v5  ;;  %v12408_v5 = vld [vmem:[#allocation13 + $0x818] ss:$24 sps:$4 sm:$0xff]  }
 0x568   :  { %9186 = vmatpush1.bf16.msra.mxu1 %v12303_v12  ;;  %v12416_v12 = vld [vmem:[#allocation13 + $0x7ec] ss:$24 sps:$4 sm:$0xff]  }
 0x569   :  { %9187 = vmatprep.subr.bf16.mxu1 %v12308_v30 }
 0x56c   :  { %9188 = vmatpush1.bf16.msra.mxu1 %v12306_v20 }
 0x56d   :  { %9189 = vmatprep.subr.bf16.mxu1 %v12311_v56  ;;  %v12414_v56 = vld [vmem:[#allocation13 + $0x7e8] ss:$24 sps:$4 sm:$0xff]  }
 0x570   :  { %9190 = vmatpush2.bf16.msra.mxu1 %v12309_v43  ;;  %v12422_v43 = vld [vmem:[#allocation13 + $0x7bc] ss:$24 sps:$4 sm:$0xff]  }
 0x571   :  { %9191 = vmatprep.subr.bf16.mxu1 %v12314_v44 }
 0x574   :  { %9192 = vmatpush2.bf16.msra.mxu1 %v12312_v21 }
 0x575   :  { %9193 = vmatprep.subr.bf16.mxu1 %v12317_v22 }
 0x578   :  { %9194 = vmatpush2.bf16.msra.mxu1 %v12315_v49 }
 0x579   :  { %9195 = vmatprep.subr.bf16.mxu1 %v12320_v51 }
 0x57c   :  { %9196 = vmatpush2.bf16.msra.mxu1 %v12318_v14  ;;  %v12428_v14 = vld [vmem:[#allocation13 + $0x78c] ss:$24 sps:$4 sm:$0xff]  }
 0x57d   :  { %9197 = vmatprep.subr.bf16.mxu1 %v12323_v11 }
 0x580   :  { %9198 = vmatpush2.bf16.msra.mxu1 %v12321_v62 }
 0x581   :  { %9199 = vmatprep.subr.bf16.mxu1 %v12326_v47 }
 0x583   :  { %v13214_v50 = vpop.f32.mrf.mxu1 }
 0x584   :  { %9200 = vmatpush2.bf16.msra.mxu1 %v12324_v54  ;;  %v7190_v30 = vadd.f32 %v13214_v50, %v5458_v28  ;;  %v12476_v28 = vld [vmem:[#allocation13 + $0x314] ss:$24 sps:$4 sm:$0xff]  }
 0x585   :  { %v13216_v58 = vpop.f32.mrf.mxu1  ;;  %9201 = vmatprep.subr.bf16.mxu1 %v12329_v55  ;;  %v12426_v55 = vld [vmem:[#allocation13 + $0x788] ss:$24 sps:$4 sm:$0xff]  }
 0x586   :  { %v7192_v20 = vadd.f32 %v13216_v58, %v5462_v31  ;;  %v7231_v44 = vadd.f32 %v13201_v3, %v7190_v30  ;;  %v12429_v3 = vld [vmem:[#allocation13 + $0x458] ss:$24 sps:$4 sm:$0xff]   ;;  %v12471_v31 = vld [vmem:[#allocation13 + $0x308] ss:$24 sps:$4 sm:$0xff]   ;;  %v12482_v30 = vld [vmem:[#allocation13 + $0x5e4] ss:$24 sps:$4 sm:$0xff]  }
 0x587   :  { %v7193_v0 = vpop.f32.mrf.mxu1 }
 0x588   :  { %9202 = vmatpush2.bf16.msra.mxu1 %v12327_v25  ;;  %v7233_v49 = vadd.f32 %v13204_v32, %v7192_v20  ;;  %v12432_v32 = vld [vmem:[#allocation13 + $0x460] ss:$24 sps:$4 sm:$0xff]  }
 0x589   :  { %v7194_v2 = vpop.f32.mrf.mxu1  ;;  %9203 = vmatprep.subr.bf16.mxu1 %v12332_v61  ;;  %v12434_v61 = vld [vmem:[#allocation13 + $0x464] ss:$24 sps:$4 sm:$0xff]   ;;  %v12477_v20 = vld [vmem:[#allocation13 + $0x5d8] ss:$24 sps:$4 sm:$0xff]  }
 0x58a   :  { %v12440_v2 = vld [vmem:[#allocation13 + $0x434] ss:$24 sps:$4 sm:$0xff]  }
 0x58c   :  { %9204 = vmatpush2.bf16.msra.mxu1 %v12330_v1  ;;  %v12437_v1 = vld [vmem:[#allocation13 + $0x42c] ss:$24 sps:$4 sm:$0xff]  }
 0x58d   :  { %9255 = vmatprep.subr.bf16.mxu1 %v12338_v34  ;;  %v12435_v34 = vld [vmem:[#allocation13 + $0x428] ss:$24 sps:$4 sm:$0xff]  }
 0x58f   :  { %9206 = vmatmul.mubr.bf16.vlgmr.msra.gmra.mxu1 %v13191_v39 }
 0x590   :  { %9256 = vmatpush1.bf16.msra.mxu1 %v12336_v4 }
 0x591   :  { %9257 = vmatprep.subr.bf16.mxu1 %v12344_v33  ;;  %v12443_v33 = vld [vmem:[#allocation13 + $0x3fc] ss:$24 sps:$4 sm:$0xff]  }
 0x594   :  { %9258 = vmatpush1.bf16.msra.mxu1 %v12342_v19  ;;  %v12438_v19 = vld [vmem:[#allocation13 + $0x430] ss:$24 sps:$4 sm:$0xff]  }
 0x595   :  { %9259 = vmatprep.subr.bf16.mxu1 %v12350_v53 }
 0x598   :  { %9260 = vmatpush1.bf16.msra.mxu1 %v12348_v6  ;;  %v12446_v6 = vld [vmem:[#allocation13 + $0x404] ss:$24 sps:$4 sm:$0xff]  }
 0x599   :  { %9261 = vmatprep.subr.bf16.mxu1 %v12356_v7  ;;  %v12441_v7 = vld [vmem:[#allocation13 + $0x3f8] ss:$24 sps:$4 sm:$0xff]  }
 0x59c   :  { %9262 = vmatpush1.bf16.msra.mxu1 %v12354_v46 }
 0x59d   :  { %9263 = vmatprep.subr.bf16.mxu1 %v12362_v24  ;;  %v12449_v24 = vld [vmem:[#allocation13 + $0x3cc] ss:$24 sps:$4 sm:$0xff]  }
 0x5a0   :  { %9264 = vmatpush1.bf16.msra.mxu1 %v12360_v15  ;;  %v12444_v15 = vld [vmem:[#allocation13 + $0x400] ss:$24 sps:$4 sm:$0xff]  }
 0x5a1   :  { %9265 = vmatprep.subr.bf16.mxu1 %v12368_v13  ;;  %v12452_v13 = vld [vmem:[#allocation13 + $0x3d4] ss:$24 sps:$4 sm:$0xff]  }
 0x5a4   :  { %9266 = vmatpush1.bf16.msra.mxu1 %v12366_v29  ;;  %v12447_v29 = vld [vmem:[#allocation13 + $0x3c8] ss:$24 sps:$4 sm:$0xff]  }
 0x5a5   :  { %9267 = vmatprep.subr.bf16.mxu1 %v12374_v35  ;;  %v12455_v35 = vld [vmem:[#allocation13 + $0x39c] ss:$24 sps:$4 sm:$0xff]  }
 0x5a8   :  { %9268 = vmatpush1.bf16.msra.mxu1 %v12372_v36  ;;  %v12458_v36 = vld [vmem:[#allocation13 + $0x3a4] ss:$24 sps:$4 sm:$0xff]  }
 0x5a9   :  { %9269 = vmatprep.subr.bf16.mxu1 %v12380_v17  ;;  %v12453_v17 = vld [vmem:[#allocation13 + $0x398] ss:$24 sps:$4 sm:$0xff]  }
 0x5ac   :  { %9270 = vmatpush1.bf16.msra.mxu1 %v12378_v23  ;;  %v12461_v23 = vld [vmem:[#allocation13 + $0x36c] ss:$24 sps:$4 sm:$0xff]  }
 0x5ad   :  { %9271 = vmatprep.subr.bf16.mxu1 %v12386_v38  ;;  %v12456_v38 = vld [vmem:[#allocation13 + $0x3a0] ss:$24 sps:$4 sm:$0xff]  }
 0x5b0   :  { %9272 = vmatpush2.bf16.msra.mxu1 %v12384_v40  ;;  %v12464_v40 = vld [vmem:[#allocation13 + $0x374] ss:$24 sps:$4 sm:$0xff]  }
 0x5b1   :  { %9273 = vmatprep.subr.bf16.mxu1 %v12392_v48  ;;  %v12459_v48 = vld [vmem:[#allocation13 + $0x368] ss:$24 sps:$4 sm:$0xff]  }
 0x5b4   :  { %9274 = vmatpush2.bf16.msra.mxu1 %v12390_v9  ;;  %v12467_v9 = vld [vmem:[#allocation13 + $0x33c] ss:$24 sps:$4 sm:$0xff]  }
 0x5b5   :  { %9275 = vmatprep.subr.bf16.mxu1 %v12398_v16  ;;  %v12462_v16 = vld [vmem:[#allocation13 + $0x370] ss:$24 sps:$4 sm:$0xff]  }
 0x5b8   :  { %9276 = vmatpush2.bf16.msra.mxu1 %v12396_v10  ;;  %v12470_v10 = vld [vmem:[#allocation13 + $0x344] ss:$24 sps:$4 sm:$0xff]  }
 0x5b9   :  { %9277 = vmatprep.subr.bf16.mxu1 %v12404_v8  ;;  %v12465_v8 = vld [vmem:[#allocation13 + $0x338] ss:$24 sps:$4 sm:$0xff]  }
 0x5bc   :  { %9278 = vmatpush2.bf16.msra.mxu1 %v12402_v18  ;;  %v12473_v18 = vld [vmem:[#allocation13 + $0x30c] ss:$24 sps:$4 sm:$0xff]  }
 0x5bd   :  { %9279 = vmatprep.subr.bf16.mxu1 %v12410_v27  ;;  %v12468_v27 = vld [vmem:[#allocation13 + $0x340] ss:$24 sps:$4 sm:$0xff]  }
 0x5c0   :  { %9280 = vmatpush2.bf16.msra.mxu1 %v12408_v5  ;;  %v12479_v5 = vld [vmem:[#allocation13 + $0x5dc] ss:$24 sps:$4 sm:$0xff]  }
 0x5c1   :  { %9281 = vmatprep.subr.bf16.mxu1 %v12416_v12  ;;  %v12474_v12 = vld [vmem:[#allocation13 + $0x310] ss:$24 sps:$4 sm:$0xff]  }
 0x5c3   :  { %v7271_v21 = vpop.f32.mrf.mxu1 }
 0x5c4   :  { %v7272_v22 = vadd.f32 %v7271_v21, %v7231_v44  ;;  %9282 = vmatpush2.bf16.msra.mxu1 %v12414_v56  ;;  %v12485_v56 = vld [vmem:[#allocation13 + $0x5ac] ss:$24 sps:$4 sm:$0xff]   ;;  %v12483_v21 = vld [vmem:[#allocation13 + $0x5a8] ss:$24 sps:$4 sm:$0xff]  }
 0x5c5   :  { %v7273_v51 = vpop.f32.mrf.mxu1  ;;  %9283 = vmatprep.subr.bf16.mxu1 %v12422_v43  ;;  %v12480_v43 = vld [vmem:[#allocation13 + $0x5e0] ss:$24 sps:$4 sm:$0xff]   ;;  %v12488_v44 = vld [vmem:[#allocation13 + $0x5b4] ss:$24 sps:$4 sm:$0xff]  }
 0x5c6   :  { %v7274_v11 = vadd.f32 %v7273_v51, %v7233_v49  ;;  %v7282_v62 = vmax.f32 %v7272_v22, 0.0  ;;  %v12491_v22 = vld [vmem:[#allocation13 + $0x57c] ss:$24 sps:$4 sm:$0xff]   ;;  %v12486_v49 = vld [vmem:[#allocation13 + $0x5b0] ss:$24 sps:$4 sm:$0xff]  }
 0x5c7   :  { %v7275_v47 = vpop.f32.mrf.mxu1  ;;  %v12489_v51 = vld [vmem:[#allocation13 + $0x578] ss:$24 sps:$4 sm:$0xff]  }
 0x5c8   :  { %v7283_v54 = vmax.f32 %v7274_v11, 0.0  ;;  %9284 = vmatpush2.bf16.msra.mxu1 %v12420_v63  ;;  %v13229_v58 = vpack.c.bf16 %v7282_v62, %v7282_v62  ;;  %v12494_v63 = vld [vmem:[#allocation13 + $0x584] ss:$24 sps:$4 sm:$0xff]   ;;  %v12492_v11 = vld [vmem:[#allocation13 + $0x580] ss:$24 sps:$4 sm:$0xff]  }
 0x5c9   :  { %v7276_v50 = vpop.f32.mrf.mxu1  ;;  %9285 = vmatprep.subr.bf16.mxu1 %v12428_v14  ;;  %v12497_v14 = vld [vmem:[#allocation13 + $0x54c] ss:$24 sps:$4 sm:$0xff]   ;;  %v12495_v47 = vld [vmem:[#allocation13 + $0x548] ss:$24 sps:$4 sm:$0xff]  }
 0x5ca   :  { %v13227_v25 = vpack.c.bf16 %v7283_v54, %v7283_v54  ;;  %v12500_v62 = vld [vmem:[#allocation13 + $0x554] ss:$24 sps:$4 sm:$0xff]   ;;  %v12506_v50 = vld [vmem:[#allocation13 + $0x524] ss:$24 sps:$4 sm:$0xff]  }
 0x5cb   :  { %v12503_v54 = vld [vmem:[#allocation13 + $0x51c] ss:$24 sps:$4 sm:$0xff]  }
 0x5cc   :  { %9286 = vmatpush2.bf16.msra.mxu1 %v12426_v55  ;;  %9164 = vmatprep.mubr.bf16.mxu0 %v13227_v25  ;;  %v12498_v55 = vld [vmem:[#allocation13 + $0x550] ss:$24 sps:$4 sm:$0xff]  }
 0x5cd   :  { %9287 = vmatprep.mubr.bf16.mxu1 %v13227_v25  ;;  %9165 = vmatmul.mubr.bf16.vlgmr.msra.gmra.mxu0 %v13229_v58  ;;  %v13234_v0 = vpop.f32.mrf.mxu0 }
 0x5ce   :  { %9215 = vmatpush1.bf16.msra.mxu0 %v12429_v3  ;;  %9246 = vmatprep.mubr.bf16.mxu0 %v13207_v57  ;;  %v12501_v3 = vld [vmem:[#allocation13 + $0x518] ss:$24 sps:$4 sm:$0xff]  }
 0x5cf   :  { %9288 = vmatmul.mubr.bf16.vlgmr.msra.gmra.mxu1 %v13229_v58  ;;  %9337 = vmatprep.subr.bf16.mxu1 %v12434_v61  ;;  %v13238_v4 = vpop.f32.mrf.mxu0  ;;  %v12509_v61 = vld [vmem:[#allocation13 + $0x4ec] ss:$24 sps:$4 sm:$0xff]  }
 0x5d0   :  { %9338 = vmatpush1.bf16.msra.mxu1 %v12432_v32  ;;  %9369 = vmatprep.mubr.bf16.mxu1 %v13207_v57  ;;  %v12450_v57 = vld [vmem:[#allocation13 + $0x3d0] ss:$24 sps:$4 sm:$0xff]   ;;  %v12504_v32 = vld [vmem:[#allocation13 + $0x520] ss:$24 sps:$4 sm:$0xff]  }
 0x5d1   :  { %9216 = vmatprep.subr.bf16.mxu0 %v12437_v1  ;;  %v9088_v53 = vpop.f32.mrf.mxu0  ;;  %9339 = vmatprep.subr.bf16.mxu1 %v12440_v2  ;;  %v12512_v1 = vld [vmem:[#allocation13 + $0x4f4] ss:$24 sps:$4 sm:$0xff]   ;;  %v12507_v2 = vld [vmem:[#allocation13 + $0x4e8] ss:$24 sps:$4 sm:$0xff]  }
 0x5d2   :  { %9217 = vmatpush1.bf16.msra.mxu0 %v12435_v34  ;;  %v12515_v34 = vld [vmem:[#allocation13 + $0x4bc] ss:$24 sps:$4 sm:$0xff]   ;;  %v12513_v53 = vld [vmem:[#allocation13 + $0x4b8] ss:$24 sps:$4 sm:$0xff]  }
 0x5d3   :  { %v9089_v46 = vpop.f32.mrf.mxu0  ;;  %9218 = vmatprep.subr.bf16.mxu0 %v12443_v33  ;;  %v12510_v33 = vld [vmem:[#allocation13 + $0x4f0] ss:$24 sps:$4 sm:$0xff]  }
 0x5d4   :  { %9340 = vmatpush1.bf16.msra.mxu1 %v12438_v19  ;;  %v12518_v19 = vld [vmem:[#allocation13 + $0x4c4] ss:$24 sps:$4 sm:$0xff]   ;;  %v12524_v46 = vld [vmem:[#allocation13 + $0x494] ss:$24 sps:$4 sm:$0xff]  }
 0x5d5   :  { %9341 = vmatprep.subr.bf16.mxu1 %v12446_v6  ;;  %v12521_v6 = vld [vmem:[#allocation13 + $0x48c] ss:$24 sps:$4 sm:$0xff]  }
 0x5d6   :  { %9219 = vmatpush1.bf16.msra.mxu0 %v12441_v7  ;;  %v12516_v7 = vld [vmem:[#allocation13 + $0x4c0] ss:$24 sps:$4 sm:$0xff]  }
 0x5d7   :  { %9220 = vmatprep.subr.bf16.mxu0 %v12449_v24  ;;  %v12519_v24 = vld [vmem:[#allocation13 + $0x488] ss:$24 sps:$4 sm:$0xff]  }
 0x5d8   :  { %9342 = vmatpush1.bf16.msra.mxu1 %v12444_v15  ;;  %v13241_v15 = vld [vmem:[#allocation14] sm:$0x3f] }
 0x5d9   :  { %9343 = vmatprep.subr.bf16.mxu1 %v12452_v13  ;;  %v12527_v13 = vld [vmem:[#allocation13 + $0x164] ss:$24 sps:$4 sm:$0xff]  }
 0x5da   :  { %9221 = vmatpush1.bf16.msra.mxu0 %v12447_v29  ;;  %v12522_v29 = vld [vmem:[#allocation13 + $0x490] ss:$24 sps:$4 sm:$0xff]  }
 0x5db   :  { %9222 = vmatprep.subr.bf16.mxu0 %v12455_v35  ;;  %v7583_v35 = vrot.slane %v13241_v15, %v12984_v42 }
 0x5dc   :  { %9344 = vmatpush1.bf16.msra.mxu1 %v12450_v57  ;;  %v12525_v57 = vld [vmem:[#allocation13 + $0x160] ss:$24 sps:$4 sm:$0xff]  }
 0x5dd   :  { %9345 = vmatprep.subr.bf16.mxu1 %v12458_v36  ;;  %v12530_v36 = vld [vmem:[#allocation13 + $0x134] ss:$24 sps:$4 sm:$0xff]  }
 0x5de   :  { %9223 = vmatpush1.bf16.msra.mxu0 %v12453_v17  ;;  %v7587_v17 = vrot.slane %v13241_v15, %v12987_v45 }
 0x5df   :  { %9224 = vmatprep.subr.bf16.mxu0 %v12461_v23  ;;  %v9085_v23 = vadd.f32 %v13234_v0, %v7583_v35  ;;  %v12536_v0 = vld [vmem:[#allocation13 + $0xd4] ss:$24 sps:$4 sm:$0xff]   ;;  %v12588_v35 = vld [vmem:[#allocation13 + $0x670] ss:$24 sps:$4 sm:$0xff]  }
 0x5e0   :  { %9346 = vmatpush1.bf16.msra.mxu1 %v12456_v38  ;;  %v12528_v38 = vld [vmem:[#allocation13 + $0x130] ss:$24 sps:$4 sm:$0xff]  }
 0x5e1   :  { %9347 = vmatprep.subr.bf16.mxu1 %v12464_v40 }
 0x5e2   :  { %9225 = vmatpush1.bf16.msra.mxu0 %v12459_v48  ;;  %v12533_v48 = vld [vmem:[#allocation13 + $0x104] ss:$24 sps:$4 sm:$0xff]  }
 0x5e3   :  { %9226 = vmatprep.subr.bf16.mxu0 %v12467_v9  ;;  %v9087_v9 = vadd.f32 %v13238_v4, %v7587_v17  ;;  %v12540_v4 = vld [vmem:[#allocation13 + $0x70] ss:$24 sps:$4 sm:$0xff]   ;;  %v12596_v17 = vld [vmem:[#allocation13 + $0x614] ss:$24 sps:$4 sm:$0xff]  }
 0x5e4   :  { %9348 = vmatpush1.bf16.msra.mxu1 %v12462_v16 }
 0x5e5   :  { %9349 = vmatprep.subr.bf16.mxu1 %v12470_v10 }
 0x5e6   :  { %9227 = vmatpush1.bf16.msra.mxu0 %v12465_v8 }
 0x5e7   :  { %9228 = vmatprep.subr.bf16.mxu0 %v12473_v18  ;;  %v12531_v18 = vld [vmem:[#allocation13 + $0x100] ss:$24 sps:$4 sm:$0xff]  }
 0x5e8   :  { %9350 = vmatpush1.bf16.msra.mxu1 %v12468_v27 }
 0x5e9   :  { %9351 = vmatprep.subr.bf16.mxu1 %v12476_v28 }
 0x5ea   :  { %9229 = vmatpush1.bf16.msra.mxu0 %v12471_v31  ;;  %v12537_v31 = vld [vmem:[#allocation13 + $0xa0] ss:$24 sps:$4 sm:$0xff]  }
 0x5eb   :  { %9230 = vmatprep.subr.bf16.mxu0 %v12479_v5  ;;  %v12542_v5 = vld [vmem:[#allocation13 + $0x74] ss:$24 sps:$4 sm:$0xff]  }
 0x5ec   :  { %9352 = vmatpush1.bf16.msra.mxu1 %v12474_v12  ;;  %v12545_v12 = vld [vmem:[#allocation13 + $0x44] ss:$24 sps:$4 sm:$0xff]  }
 0x5ed   :  { %9353 = vmatprep.subr.bf16.mxu1 %v12482_v30  ;;  %v12543_v30 = vld [vmem:[#allocation13 + $0x40] ss:$24 sps:$4 sm:$0xff]  }
 0x5ee   :  { %9231 = vmatpush2.bf16.msra.mxu0 %v12477_v20  ;;  %v12548_v20 = vld [vmem:[#allocation13 + $0x14] ss:$24 sps:$4 sm:$0xff]  }
 0x5ef   :  { %9232 = vmatprep.subr.bf16.mxu0 %v12485_v56  ;;  %v12546_v56 = vld [vmem:[#allocation13 + $0x10] ss:$24 sps:$4 sm:$0xff]  }
 0x5f0   :  { %9354 = vmatpush2.bf16.msra.mxu1 %v12480_v43  ;;  %v12551_v43 = vld [vmem:[#allocation13 + $0x2e4] ss:$24 sps:$4 sm:$0xff]  }
 0x5f1   :  { %9355 = vmatprep.subr.bf16.mxu1 %v12488_v44  ;;  %v12549_v44 = vld [vmem:[#allocation13 + $0x2e0] ss:$24 sps:$4 sm:$0xff]  }
 0x5f2   :  { %9233 = vmatpush2.bf16.msra.mxu0 %v12483_v21  ;;  %v12554_v21 = vld [vmem:[#allocation13 + $0x2b4] ss:$24 sps:$4 sm:$0xff]  }
 0x5f3   :  { %9234 = vmatprep.subr.bf16.mxu0 %v12491_v22  ;;  %v12552_v22 = vld [vmem:[#allocation13 + $0x2b0] ss:$24 sps:$4 sm:$0xff]  }
 0x5f4   :  { %9356 = vmatpush2.bf16.msra.mxu1 %v12486_v49  ;;  %v12557_v49 = vld [vmem:[#allocation13 + $0x284] ss:$24 sps:$4 sm:$0xff]  }
 0x5f5   :  { %9357 = vmatprep.subr.bf16.mxu1 %v12494_v63  ;;  %v12555_v63 = vld [vmem:[#allocation13 + $0x280] ss:$24 sps:$4 sm:$0xff]  }
 0x5f6   :  { %9235 = vmatpush2.bf16.msra.mxu0 %v12489_v51  ;;  %v12560_v51 = vld [vmem:[#allocation13 + $0x254] ss:$24 sps:$4 sm:$0xff]  }
 0x5f7   :  { %9236 = vmatprep.subr.bf16.mxu0 %v12497_v14  ;;  %v12558_v14 = vld [vmem:[#allocation13 + $0x250] ss:$24 sps:$4 sm:$0xff]  }
 0x5f8   :  { %9358 = vmatpush2.bf16.msra.mxu1 %v12492_v11  ;;  %v12563_v11 = vld [vmem:[#allocation13 + $0x224] ss:$24 sps:$4 sm:$0xff]  }
 0x5f9   :  { %9359 = vmatprep.subr.bf16.mxu1 %v12500_v62  ;;  %v12561_v62 = vld [vmem:[#allocation13 + $0x220] ss:$24 sps:$4 sm:$0xff]  }
 0x5fa   :  { %9237 = vmatpush2.bf16.msra.mxu0 %v12495_v47  ;;  %v12566_v47 = vld [vmem:[#allocation13 + $0x1f4] ss:$24 sps:$4 sm:$0xff]  }
 0x5fb   :  { %9238 = vmatprep.subr.bf16.mxu0 %v12503_v54  ;;  %v12564_v54 = vld [vmem:[#allocation13 + $0x1f0] ss:$24 sps:$4 sm:$0xff]  }
 0x5fc   :  { %9360 = vmatpush2.bf16.msra.mxu1 %v12498_v55  ;;  %v12569_v55 = vld [vmem:[#allocation13 + $0x1c4] ss:$24 sps:$4 sm:$0xff]  }
 0x5fd   :  { %9361 = vmatprep.subr.bf16.mxu1 %v12506_v50  ;;  %v12567_v50 = vld [vmem:[#allocation13 + $0x1c0] ss:$24 sps:$4 sm:$0xff]  }
 0x5fe   :  { %9239 = vmatpush2.bf16.msra.mxu0 %v12501_v3  ;;  %v12572_v3 = vld [vmem:[#allocation13 + $0x194] ss:$24 sps:$4 sm:$0xff]  }
 0x5ff   :  { %9240 = vmatprep.subr.bf16.mxu0 %v12509_v61  ;;  %v12570_v61 = vld [vmem:[#allocation13 + $0x190] ss:$24 sps:$4 sm:$0xff]  }
 0x600   :  { %9362 = vmatpush2.bf16.msra.mxu1 %v12504_v32  ;;  %v12575_v32 = vld [vmem:[#allocation13 + $0x764] ss:$24 sps:$4 sm:$0xff]  }
 0x601   :  { %9363 = vmatprep.subr.bf16.mxu1 %v12512_v1  ;;  %v12573_v1 = vld [vmem:[#allocation13 + $0x760] ss:$24 sps:$4 sm:$0xff]  }
 0x602   :  { %9241 = vmatpush2.bf16.msra.mxu0 %v12507_v2  ;;  %v12578_v2 = vld [vmem:[#allocation13 + $0x734] ss:$24 sps:$4 sm:$0xff]  }
 0x603   :  { %9242 = vmatprep.subr.bf16.mxu0 %v12515_v34  ;;  %v12576_v34 = vld [vmem:[#allocation13 + $0x730] ss:$24 sps:$4 sm:$0xff]  }
 0x604   :  { %9364 = vmatpush2.bf16.msra.mxu1 %v12510_v33 }
 0x605   :  { %9365 = vmatprep.subr.bf16.mxu1 %v12518_v19  ;;  %v12581_v19 = vld [vmem:[#allocation13 + $0x704] ss:$24 sps:$4 sm:$0xff]  }
 0x606   :  { %9243 = vmatpush2.bf16.msra.mxu0 %v12513_v53 }
 0x607   :  { %9244 = vmatprep.subr.bf16.mxu0 %v12521_v6  ;;  %v12579_v6 = vld [vmem:[#allocation13 + $0x700] ss:$24 sps:$4 sm:$0xff]  }
 0x608   :  { %9366 = vmatpush2.bf16.msra.mxu1 %v12516_v7 }
 0x609   :  { %9367 = vmatprep.subr.bf16.mxu1 %v12524_v46  ;;  %v12584_v46 = vld [vmem:[#allocation13 + $0x6d4] ss:$24 sps:$4 sm:$0xff]  }
 0x60a   :  { %9245 = vmatpush2.bf16.msra.mxu0 %v12519_v24 }
 0x60b   :  { %9296 = vmatprep.subr.bf16.mxu0 %v12527_v13  ;;  %v12582_v13 = vld [vmem:[#allocation13 + $0x6d0] ss:$24 sps:$4 sm:$0xff]  }
 0x60c   :  { %9368 = vmatpush2.bf16.msra.mxu1 %v12522_v29  ;;  %v12585_v29 = vld [vmem:[#allocation13 + $0x6a0] ss:$24 sps:$4 sm:$0xff]  }
 0x60d   :  { %9247 = vmatmul.mubr.bf16.vlgmr.msra.gmra.mxu0 %v13209_v26 }
 0x60e   :  { %9297 = vmatpush1.bf16.msra.mxu0 %v12525_v57  ;;  %9328 = vmatprep.mubr.bf16.mxu0 %v13189_v52  ;;  %v12534_v52 = vld [vmem:[#allocation13 + $0xd0] ss:$24 sps:$4 sm:$0xff]   ;;  %v12593_v57 = vld [vmem:[#allocation13 + $0x644] ss:$24 sps:$4 sm:$0xff]  }
 0x60f   :  { %9370 = vmatmul.mubr.bf16.vlgmr.msra.gmra.mxu1 %v13209_v26  ;;  %v9125_v40 = vpop.f32.mrf.mxu1  ;;  %9298 = vmatprep.subr.bf16.mxu0 %v12530_v36  ;;  %v12539_v26 = vld [vmem:[#allocation13 + $0xa4] ss:$24 sps:$4 sm:$0xff]   ;;  %v12591_v36 = vld [vmem:[#allocation13 + $0x640] ss:$24 sps:$4 sm:$0xff]  }
 0x610   :  { %v13252_v16 = vadd.f32 %v9125_v40, %v9085_v23  ;;  %v12594_v23 = vld [vmem:[#allocation13 + $0x610] ss:$24 sps:$4 sm:$0xff]   ;;  %v12597_v40 = vld [vmem:[#allocation13 + $0x8e0] ss:$24 sps:$4 sm:$0xff]  }
 0x611   :  { %v9127_v10 = vpop.f32.mrf.mxu1 }
 0x612   :  { %v13254_v8 = vadd.f32 %v9127_v10, %v9087_v9  ;;  %9299 = vmatpush1.bf16.msra.mxu0 %v12528_v38  ;;  %v12599_v38 = vld [vmem:[#allocation13 + $0x8e4] ss:$24 sps:$4 sm:$0xff]   ;;  %v12600_v9 = vld [vmem:[#allocation13 + $0x8b0] ss:$24 sps:$4 sm:$0xff]  }
 0x613   :  { %v9129_v27 = vpop.f32.mrf.mxu1  ;;  %9300 = vmatprep.subr.bf16.mxu0 %v12533_v48  ;;  %v12602_v48 = vld [vmem:[#allocation13 + $0x8b4] ss:$24 sps:$4 sm:$0xff]   ;;  %v12605_v10 = vld [vmem:[#allocation13 + $0x884] ss:$24 sps:$4 sm:$0xff]  }
 0x614   :  { %v12608_v27 = vld [vmem:[#allocation13 + $0x854] ss:$24 sps:$4 sm:$0xff]  }
 0x615   :  { %v9130_v28 = vpop.f32.mrf.mxu1 }
 0x616   :  { %9301 = vmatpush1.bf16.msra.mxu0 %v12531_v18  ;;  %v12603_v18 = vld [vmem:[#allocation13 + $0x880] ss:$24 sps:$4 sm:$0xff]   ;;  %v12611_v28 = vld [vmem:[#allocation13 + $0x824] ss:$24 sps:$4 sm:$0xff]  }
 0x617   :  { %9302 = vmatprep.subr.bf16.mxu0 %v12536_v0  ;;  %v12606_v0 = vld [vmem:[#allocation13 + $0x850] ss:$24 sps:$4 sm:$0xff]  }
 0x61a   :  { %9303 = vmatpush1.bf16.msra.mxu0 %v12534_v52  ;;  %v12609_v52 = vld [vmem:[#allocation13 + $0x820] ss:$24 sps:$4 sm:$0xff]  }
 0x61b   :  { %9304 = vmatprep.subr.bf16.mxu0 %v12539_v26  ;;  %v12614_v26 = vld [vmem:[#allocation13 + $0x7f4] ss:$24 sps:$4 sm:$0xff]  }
 0x61e   :  { %9305 = vmatpush1.bf16.msra.mxu0 %v12537_v31  ;;  %v12612_v31 = vld [vmem:[#allocation13 + $0x7f0] ss:$24 sps:$4 sm:$0xff]  }
 0x61f   :  { %9306 = vmatprep.subr.bf16.mxu0 %v12542_v5  ;;  %v12617_v5 = vld [vmem:[#allocation13 + $0x7c4] ss:$24 sps:$4 sm:$0xff]  }
 0x622   :  { %9307 = vmatpush1.bf16.msra.mxu0 %v12540_v4  ;;  %v12615_v4 = vld [vmem:[#allocation13 + $0x7c0] ss:$24 sps:$4 sm:$0xff]  }
 0x623   :  { %9308 = vmatprep.subr.bf16.mxu0 %v12545_v12  ;;  %v12620_v12 = vld [vmem:[#allocation13 + $0x794] ss:$24 sps:$4 sm:$0xff]  }
 0x626   :  { %9309 = vmatpush1.bf16.msra.mxu0 %v12543_v30  ;;  %v12618_v30 = vld [vmem:[#allocation13 + $0x790] ss:$24 sps:$4 sm:$0xff]  }
 0x627   :  { %9310 = vmatprep.subr.bf16.mxu0 %v12548_v20 }
 0x62a   :  { %9311 = vmatpush1.bf16.msra.mxu0 %v12546_v56  ;;  %v13263_v56 = vld [vmem:[#allocation16] sm:$0x3f] }
 0x62b   :  { %9312 = vmatprep.subr.bf16.mxu0 %v12551_v43 }
 0x62e   :  { %9313 = vmatpush2.bf16.msra.mxu0 %v12549_v44 }
 0x62f   :  { %9314 = vmatprep.subr.bf16.mxu0 %v12554_v21 }
 0x632   :  { %9315 = vmatpush2.bf16.msra.mxu0 %v12552_v22 }
 0x633   :  { %9316 = vmatprep.subr.bf16.mxu0 %v12557_v49  ;;  %v9430_v49 = vrot.slane %v13263_v56, %v12984_v42  ;;  %v7595_v42 = vrot.slane %v13241_v15, %v13030_v37 }
 0x636   :  { %9317 = vmatpush2.bf16.msra.mxu0 %v12555_v63 }
 0x637   :  { %9318 = vmatprep.subr.bf16.mxu0 %v12560_v51  ;;  %v9434_v51 = vrot.slane %v13263_v56, %v12987_v45 }
 0x63a   :  { %9319 = vmatpush2.bf16.msra.mxu0 %v12558_v14 }
 0x63b   :  { %9320 = vmatprep.subr.bf16.mxu0 %v12563_v11 }
 0x63e   :  { %9321 = vmatpush2.bf16.msra.mxu0 %v12561_v62 }
 0x63f   :  { %9322 = vmatprep.subr.bf16.mxu0 %v12566_v47 }
 0x642   :  { %9323 = vmatpush2.bf16.msra.mxu0 %v12564_v54 }
 0x643   :  { %9324 = vmatprep.subr.bf16.mxu0 %v12569_v55 }
 0x646   :  { %9325 = vmatpush2.bf16.msra.mxu0 %v12567_v50 }
 0x647   :  { %9326 = vmatprep.subr.bf16.mxu0 %v12572_v3  ;;  %v7591_v3 = vrot.slane %v13241_v15, %v13027_v41 }
 0x64a   :  { %9327 = vmatpush2.bf16.msra.mxu0 %v12570_v61 }
 0x64b   :  { %9378 = vmatprep.subr.bf16.mxu0 %v12575_v32 }
 0x64d   :  { %9329 = vmatmul.mubr.bf16.vlgmr.msra.gmra.mxu0 %v13191_v39  ;;  %v12587_v39 = vld [vmem:[#allocation13 + $0x6a4] ss:$24 sps:$4 sm:$0xff]  }
 0x64e   :  { %9379 = vmatpush1.bf16.msra.mxu0 %v12573_v1  ;;  %9410 = vmatprep.mubr.bf16.mxu0 %v13227_v25  ;;  %v12590_v25 = vld [vmem:[#allocation13 + $0x674] ss:$24 sps:$4 sm:$0xff]  }
 0x64f   :  { %v13258_v33 = vpop.f32.mrf.mxu1  ;;  %9380 = vmatprep.subr.bf16.mxu0 %v12578_v2 }
 0x651   :  { %v13260_v53 = vpop.f32.mrf.mxu1 }
 0x652   :  { %9381 = vmatpush1.bf16.msra.mxu0 %v12576_v34  ;;  %v9210_v45 = vadd.f32 %v13260_v53, %v7595_v42 }
 0x653   :  { %v9211_v7 = vpop.f32.mrf.mxu1  ;;  %9382 = vmatprep.subr.bf16.mxu0 %v12581_v19  ;;  %v9438_v19 = vrot.slane %v13263_v56, %v13027_v41 }
 0x655   :  { %v9212_v24 = vpop.f32.mrf.mxu1 }
 0x656   :  { %9383 = vmatpush1.bf16.msra.mxu0 %v12579_v6 }
 0x657   :  { %9384 = vmatprep.subr.bf16.mxu0 %v12584_v46 }
 0x65a   :  { %9385 = vmatpush1.bf16.msra.mxu0 %v12582_v13 }
 0x65b   :  { %9386 = vmatprep.subr.bf16.mxu0 %v12587_v39  ;;  %v9442_v39 = vrot.slane %v13263_v56, %v13030_v37 }
 0x65e   :  { %9387 = vmatpush1.bf16.msra.mxu0 %v12585_v29 }
 0x65f   :  { %9388 = vmatprep.subr.bf16.mxu0 %v12590_v25 }
 0x662   :  { %9389 = vmatpush1.bf16.msra.mxu0 %v12588_v35 }
 0x663   :  { %9390 = vmatprep.subr.bf16.mxu0 %v12593_v57 }
 0x666   :  { %9391 = vmatpush1.bf16.msra.mxu0 %v12591_v36 }
 0x667   :  { %9392 = vmatprep.subr.bf16.mxu0 %v12596_v17 }
 0x66a   :  { %9393 = vmatpush1.bf16.msra.mxu0 %v12594_v23 }
 0x66b   :  { %9394 = vmatprep.subr.bf16.mxu0 %v12599_v38 }
 0x66e   :  { %9395 = vmatpush2.bf16.msra.mxu0 %v12597_v40 }
 0x66f   :  { %9396 = vmatprep.subr.bf16.mxu0 %v12602_v48  ;;  %v7599_v48 = vrot.slane %v13241_v15, %v13063_v59 }
 0x672   :  { %9397 = vmatpush2.bf16.msra.mxu0 %v12600_v9  ;;  %v7603_v9 = vrot.slane %v13241_v15, %v13066_v60 }
 0x673   :  { %9398 = vmatprep.subr.bf16.mxu0 %v12605_v10 }
 0x676   :  { %9399 = vmatpush2.bf16.msra.mxu0 %v12603_v18 }
 0x677   :  { %9400 = vmatprep.subr.bf16.mxu0 %v12608_v27 }
 0x67a   :  { %9401 = vmatpush2.bf16.msra.mxu0 %v12606_v0 }
 0x67b   :  { %9402 = vmatprep.subr.bf16.mxu0 %v12611_v28  ;;  %v9446_v28 = vrot.slane %v13263_v56, %v13063_v59 }
 0x67e   :  { %9403 = vmatpush2.bf16.msra.mxu0 %v12609_v52 }
 0x67f   :  { %9404 = vmatprep.subr.bf16.mxu0 %v12614_v26 }
 0x682   :  { %9405 = vmatpush2.bf16.msra.mxu0 %v12612_v31 }
 0x683   :  { %9406 = vmatprep.subr.bf16.mxu0 %v12617_v5 }
 0x686   :  { %9407 = vmatpush2.bf16.msra.mxu0 %v12615_v4  ;;  %v9450_v4 = vrot.slane %v13263_v56, %v13066_v60 }
 0x687   :  { %9408 = vmatprep.subr.bf16.mxu0 %v12620_v12 }
 0x68a   :  { %9409 = vmatpush2.bf16.msra.mxu0 %v12618_v30 }
 0x68d   :  { %9411 = vmatmul.mubr.bf16.vlgmr.msra.gmra.mxu0 %v13229_v58  ;;  %v9166_v20 = vpop.f32.mrf.mxu0 }
 0x68e   :  { %v9167_v43 = vadd.f32 %v9166_v20, %v13252_v16 }
 0x68f   :  { %v9289_v44 = vpop.f32.mrf.mxu1  ;;  %v9168_v21 = vpop.f32.mrf.mxu0 }
 0x690   :  { %v9419_v22 = vmax.f32 %v9167_v43, 0.0  ;;  %v9169_v63 = vadd.f32 %v9168_v21, %v13254_v8  ;;  %v9208_v8 = vadd.f32 %v13258_v33, %v7591_v3 }
 0x691   :  { %v9291_v14 = vpop.f32.mrf.mxu1  ;;  %v9170_v11 = vpop.f32.mrf.mxu0 }
 0x692   :  { %v9420_v62 = vmax.f32 %v9169_v63, 0.0  ;;  %v9457_v54 = vmul.f32 %v9430_v49, %v9419_v22  ;;  %v10737_v22 = vld [vmem:[#allocation2] ss:$0 sm:$0xff] }
 0x693   :  { %v9293_v58 = vpop.f32.mrf.mxu1  ;;  %v9171_v47 = vpop.f32.mrf.mxu0 }
 0x694   :  { %v9458_v55 = vmul.f32 %v9434_v51, %v9420_v62 }
 0x695   :  { %v9294_v50 = vpop.f32.mrf.mxu1 }
 0x696   :  { %v9463_v16 = vadd.f32 %v9458_v55, %v9457_v54 }
 0x6cd   :  { %v9248_v61 = vpop.f32.mrf.mxu0 }
 0x6ce   :  { %v9249_v32 = vadd.f32 %v9248_v61, %v9208_v8 }
 0x6cf   :  { %v9250_v1 = vpop.f32.mrf.mxu0  ;;  %v9371_v2 = vpop.f32.mrf.mxu1 }
 0x6d0   :  { %v9290_v34 = vadd.f32 %v9289_v44, %v9249_v32  ;;  %v9251_v6 = vadd.f32 %v9250_v1, %v9210_v45 }
 0x6d1   :  { %v9252_v7 = vpop.f32.mrf.mxu0  ;;  %v9373_v46 = vpop.f32.mrf.mxu1 }
 0x6d2   :  { %v9421_v24 = vmax.f32 %v9290_v34, 0.0  ;;  %v9292_v13 = vadd.f32 %v9291_v14, %v9251_v6 }
 0x6d3   :  { %v9253_v29 = vpop.f32.mrf.mxu0  ;;  %v9375_v33 = vpop.f32.mrf.mxu1 }
 0x6d4   :  { %v9459_v25 = vmul.f32 %v9438_v19, %v9421_v24  ;;  %v9422_v35 = vmax.f32 %v9292_v13, 0.0 }
 0x6d5   :  { %v9376_v53 = vpop.f32.mrf.mxu1 }
 0x6d6   :  { %v9460_v57 = vmul.f32 %v9442_v39, %v9422_v35  ;;  %v9464_v36 = vadd.f32 %v9463_v16, %v9459_v25 }
 0x6d8   :  { %v9465_v17 = vadd.f32 %v9464_v36, %v9460_v57 }
 0x70d   :  { %v9330_v23 = vpop.f32.mrf.mxu0 }
 0x70e   :  { %v9331_v10 = vadd.f32 %v9330_v23, %v7599_v48 }
 0x70f   :  { %v9332_v38 = vpop.f32.mrf.mxu0 }
 0x710   :  { %v9333_v37 = vadd.f32 %v9332_v38, %v7603_v9  ;;  %v9372_v18 = vadd.f32 %v9371_v2, %v9331_v10 }
 0x711   :  { %v9334_v40 = vpop.f32.mrf.mxu0 }
 0x712   :  { %v9374_v52 = vadd.f32 %v9373_v46, %v9333_v37 }
 0x713   :  { %v9335_v41 = vpop.f32.mrf.mxu0 }
 0x74d   :  { %v9412_v27 = vpop.f32.mrf.mxu0 }
 0x74e   :  { %v9413_v0 = vadd.f32 %v9412_v27, %v9372_v18 }
 0x74f   :  { %v9414_v26 = vpop.f32.mrf.mxu0 }
 0x750   :  { %v9423_v31 = vmax.f32 %v9413_v0, 0.0  ;;  %v9415_v5 = vadd.f32 %v9414_v26, %v9374_v52 }
 0x751   :  { %v9416_v12 = vpop.f32.mrf.mxu0 }
 0x752   :  { %v9461_v30 = vmul.f32 %v9446_v28, %v9423_v31  ;;  %v9424_v20 = vmax.f32 %v9415_v5, 0.0 }
 0x753   :  { %v9417_v43 = vpop.f32.mrf.mxu0 }
 0x754   :  { %v9462_v15 = vmul.f32 %v9450_v4, %v9424_v20  ;;  %v9466_v44 = vadd.f32 %v9465_v17, %v9461_v30 }
 0x756   :  { %v9467_v21 = vadd.f32 %v9466_v44, %v9462_v15 }
 0x758   :  { %9468 = vadd.xlane.f32.xlu0 %v9467_v21 }
 0x7e1   :  { %v9469_v49 = vpop.xlane.xlu0 %9468 }
 0x7e2   :  { %v9477_v63 = vadd.f32 %v10737_v22, %v9469_v49 }
 0x7e4   :  { %9479 = vst.msk [vmem:[%s13303_s11] sm:$0xff] %vm9478_vm0, %v9477_v63 }
 0x7e5   :  { %9484 = vsyncpa [#allocation4], 1 }
 0x7e6   :  { %9485 = vsyncpa [#allocation6], 1 }
 0x7e7   :  { %9486 = vsyncpa [#allocation9], 1 }
 0x7e8   :  { %9487 = vsyncpa [#allocation12], 1 }
 0x7e9   :  { %9488 = vsyncpa [#allocation15], 1 }

</bundles_post_ra>
